<compile_context>
chip_gen: v7x
topology: tpu7x:2x2x1
jax: 0.10.0
libtpu: 0.0.40
codegen_flags: <defaults>
</compile_context>

<pallas_src>
import functools

import jax
import jax.numpy as jnp
from jax.experimental import pallas as pl
from jax.experimental.pallas import tpu as pltpu

LEAKY_SLOPE = 0.2  # pydnet's Conv2d_same_leaky default negative slope

# 3x3 taps (oy, ox), row-major (dy, dx) order -- must match the weight reshape.
_TAPS = tuple((dy - 1, dx - 1) for dy in range(3) for dx in range(3))


def _round_up(x, m):
    return ((x + m - 1) // m) * m


# ---------------------------------------------------------------------------
# Fused kernel: one row strip of one image, all four conv layers in VMEM.
# ---------------------------------------------------------------------------
def _fused_estimater_kernel(x_ref, idx_ref,
                            w1_ref, b1_ref, w2_ref, b2_ref,
                            w3_ref, b3_ref, w4_ref, b4_ref,
                            o_ref,
                            col_ref, act_a_ref, act_b_ref,
                            *, H, W, S, R, PAD, cin0):
    """Fused 4x (3x3 'same' conv [+ LeakyReLU(0.2)]) for ONE row strip.

    The strip buffer holds R = S + 8 "buffer rows" (S output rows plus a 4-row
    halo on each side); flattened buffer position p in [0, R*W) corresponds to
    absolute image row  s*S + p//W - 4  and column  p % W.  Activation refs
    carry PAD extra lanes on both sides of the R*W centre, so the (oy, ox) tap
    is the static lane slice [PAD + oy*W + ox, ... + R*W).

    x_ref:    (1, 1, cin0, R*W + 2*PAD) bf16   strip of the zero-padded input
    idx_ref:  (2, R*W) int32                   rows [p//W - 4, p % W]
    w*_ref:   (Cout, 9*Cin) bf16               matmul-ready weights, rows (dy,dx,ci)
    b*_ref:   (Cout, 1) f32
    o_ref:    (1, 1, 8, S*W) f32
    col_ref:  (9*max(Cin), R*W) bf16 VMEM      shared im2col slab
    act_*:    (96 / 64, R*W + 2*PAD) bf16 VMEM inter-layer activation ping-pong
    """
    L = R * W
    s = pl.program_id(1)
    abs_row = idx_ref[0:1, :] + s * S          # (1, L) absolute image row of p
    col_idx = idx_ref[1:2, :]                  # (1, L) image column of p

    def tap_mask(oy, ox):
        # Exact validity predicate of the (oy, ox) source pixel inside the HxW
        # image ("same" zero padding).  None => always valid (nothing to mask).
        m = None

        def _and(a, b):
            return b if a is None else jnp.logical_and(a, b)

        if oy != 0:
            r = abs_row + oy
            m = _and(m, r >= 0)
            m = _and(m, r < H)
        if ox != 0:
            c = col_idx + ox
            m = _and(m, c >= 0)
            m = _and(m, c < W)
        return m

    def conv3x3(read_tap, cin, w_ref, b_ref, leaky):
        # im2col: 9 shifted, boundary-masked (cin, L) slabs written at
        # 16-aligned (bf16 packing) sublane offsets into the shared scratch;
        # this VPU/ld-st work hides under the MXU matmul below.
        for t, (oy, ox) in enumerate(_TAPS):
            v = read_tap(oy * W + ox)                         # (cin, L) bf16
            m = tap_mask(oy, ox)
            if m is not None:
                v = jnp.where(m, v, jnp.zeros_like(v))
            col_ref[t * cin:(t + 1) * cin, :] = v
        # single big-K MXU matmul, f32 accumulation
        out = jnp.dot(w_ref[...], col_ref[0:9 * cin, :],
                      preferred_element_type=jnp.float32)
        out = out + b_ref[...]                                # (Cout, 1) broadcast
        if leaky:
            out = jnp.where(out > 0, out, LEAKY_SLOPE * out)
        return out                                            # (Cout, L) f32

    def reader(src_ref, cin):
        def read(d):
            return src_ref[0:cin, PAD + d:PAD + d + L]
        return read

    def read_x(d):
        return x_ref[0, 0, 0:cin0, PAD + d:PAD + d + L]

    def store_act(dst_ref, val_f32, cout):
        dst_ref[0:cout, PAD:PAD + L] = val_f32.astype(dst_ref.dtype)

    a = conv3x3(read_x, cin0, w1_ref, b1_ref, True)                 # Cin -> 96
    store_act(act_a_ref, a, 96)
    a = conv3x3(reader(act_a_ref, 96), 96, w2_ref, b2_ref, True)    # 96 -> 64
    store_act(act_b_ref, a, 64)
    a = conv3x3(reader(act_b_ref, 64), 64, w3_ref, b3_ref, True)    # 64 -> 32
    store_act(act_a_ref, a, 32)
    a = conv3x3(reader(act_a_ref, 32), 32, w4_ref, b4_ref, False)   # 32 -> 8
    # Keep only the S central rows (drop the 4-row halo): lane-dense (8, S*W) store.
    o_ref[0, 0] = a[:, 4 * W:4 * W + S * W].astype(o_ref.dtype)


# ---------------------------------------------------------------------------
# Strip / VMEM sizing helpers.
# ---------------------------------------------------------------------------
def _vmem_budget():
    try:
        phys = int(pltpu.get_tpu_info().vmem_capacity_bytes)
    except Exception:
        phys = 64 * 1024 * 1024              # conservative (v7x per-TensorCore)
    # (working-set budget for strip sizing, vmem_limit_bytes for the compiler)
    return int(phys * 0.5), int(phys * 0.75)


def _pick_strip_rows(H, W, cin_p, budget_bytes):
    """Largest strip height S whose fused working set fits `budget_bytes`."""
    kmax = 9 * max(cin_p, 96)
    pad = _round_up(W + 1, 128)

    def need(s_rows):
        r = s_rows + 8                        # 4-row halo each side (4 fused 3x3 convs)
        l = r * W
        lp = l + 2 * pad
        scratch = 2 * (kmax * l + (96 + 64) * lp)   # bf16 col + activation ping-pong
        blocks = 2 * (2 * cin_p * lp + 4 * 2 * l + 4 * 8 * s_rows * W)  # dbl-buffered I/O
        return scratch + blocks

    cap = H if H <= 8 else -(-H // 2)         # >=2 strips when sensible: feeds v7x's 2nd TC
    for s_rows in range(cap, 0, -1):
        if need(s_rows) <= budget_bytes:
            return s_rows
    return 1


# ---------------------------------------------------------------------------
# Wrapper: NCHW in, NCHW out (matches estimater.forward).
# ---------------------------------------------------------------------------
def estimater_forward(disp2_nchw, params):
    N, Cin, H, W = disp2_nchw.shape
    cin_p = _round_up(Cin, 16)                # bf16 sublane packing is 16
    budget, vmem_limit = _vmem_budget()
    S = _pick_strip_rows(H, W, cin_p, budget)
    num_strips = -(-H // S)
    H_pad = num_strips * S
    R = S + 8
    L = R * W
    PAD = _round_up(W + 1, 128)               # 128-aligned lane halo: taps are static slices
    Lp = L + 2 * PAD

    # Input strips: zero-pad channels to cin_p and rows (4 halo + bottom fill),
    # flatten spatial, add the lane halo, then slice the overlapping row strips.
    x = disp2_nchw.astype(jnp.bfloat16)
    x = jnp.pad(x, ((0, 0), (0, cin_p - Cin), (4, 4 + (H_pad - H)), (0, 0)))
    flat = x.reshape(N, cin_p, (H_pad + 8) * W)
    flat = jnp.pad(flat, ((0, 0), (0, 0), (PAD, PAD)))
    strips = jnp.stack([flat[:, :, s * S * W: s * S * W + Lp]
                        for s in range(num_strips)], axis=1)   # (N, ns, cin_p, Lp)

    # Per-position (row, col) indices shared by every strip (the strip offset is
    # added in-kernel from program_id) -- no vector int-div in the kernel and no
    # (9,1,HW) f32 mask operand.
    p = jnp.arange(L, dtype=jnp.int32)
    idx = jnp.stack([p // W - 4, p % W], axis=0)               # (2, L) int32

    # Matmul-ready weights (Cout, 9*Cin) bf16, rows ordered (dy, dx, ci); bias (Cout,1) f32.
    mats, biases = [], []
    for li, (w_hwio, b) in enumerate(params):
        kh, kw, cin_l, cout_l = w_hwio.shape
        assert (kh, kw) == (3, 3)
        if li == 0 and cin_l != cin_p:
            w_hwio = jnp.pad(w_hwio, ((0, 0), (0, 0), (0, cin_p - cin_l), (0, 0)))
            cin_l = cin_p
        mats.append(w_hwio.reshape(9 * cin_l, cout_l).T.astype(jnp.bfloat16))
        biases.append(b.reshape(cout_l, 1).astype(jnp.float32))
    cout_final = mats[-1].shape[0]
    kmax = max(m.shape[1] for m in mats)

    kernel = functools.partial(_fused_estimater_kernel,
                               H=H, W=W, S=S, R=R, PAD=PAD, cin0=cin_p)

    in_specs = [
        pl.BlockSpec((1, 1, cin_p, Lp), lambda n, s: (n, s, 0, 0)),   # input strip
        pl.BlockSpec((2, L), lambda n, s: (0, 0)),                    # position indices
    ]
    operands = [strips, idx]
    for m, b2 in zip(mats, biases):
        in_specs.append(pl.BlockSpec(m.shape, lambda n, s: (0, 0)))
        in_specs.append(pl.BlockSpec(b2.shape, lambda n, s: (0, 0)))
        operands += [m, b2]

    flops = 2 * N * num_strips * L * sum(m.shape[0] * m.shape[1] for m in mats)
    bytes_accessed = (2 * strips.size + 4 * idx.size
                      + 2 * sum(m.size for m in mats)
                      + 4 * sum(b2.size for b2 in biases)
                      + 4 * N * num_strips * cout_final * S * W)

    out = pl.pallas_call(
        kernel,
        out_shape=jax.ShapeDtypeStruct((N, num_strips, cout_final, S * W),
                                       jnp.float32),
        grid_spec=pltpu.PrefetchScalarGridSpec(
            num_scalar_prefetch=0,
            grid=(N, num_strips),
            in_specs=in_specs,
            out_specs=pl.BlockSpec((1, 1, cout_final, S * W),
                                   lambda n, s: (n, s, 0, 0)),
            scratch_shapes=[
                pltpu.VMEM((kmax, L), jnp.bfloat16),    # shared im2col slab
                pltpu.VMEM((96, Lp), jnp.bfloat16),     # activation ping
                pltpu.VMEM((64, Lp), jnp.bfloat16),     # activation pong
            ],
        ),
        compiler_params=pltpu.CompilerParams(
            dimension_semantics=("parallel", "parallel"),
            vmem_limit_bytes=int(vmem_limit),
        ),
        cost_estimate=pl.CostEstimate(flops=int(flops), transcendentals=0,
                                      bytes_accessed=int(bytes_accessed)),
    )(*operands)

    # (N, ns, 8, S*W) -> (N, 8, ns*S, W), crop the bottom fill rows.
    out = out.transpose(0, 2, 1, 3).reshape(N, cout_final, H_pad, W)
    return out[:, :, :H, :]


# ---------------------------------------------------------------------------
# Params + pure-JAX references.
# ---------------------------------------------------------------------------
def init_estimater_params(in_channels, key):
    """Deterministic synthetic weights. HWIO layout: (3, 3, Cin, Cout)."""
    chans = [in_channels, 96, 64, 32, 8]
    params = []
    for i in range(4):
        cin, cout = chans[i], chans[i + 1]
        key, kw, kb = jax.random.split(key, 3)
        fan_in = cin * 9
        w = jax.random.normal(kw, (3, 3, cin, cout), jnp.float32) * (1.0 / fan_in) ** 0.5
        b = jax.random.normal(kb, (cout,), jnp.float32) * 0.01
        params.append((w, b))
    return params


def _reference_forward(disp2_nchw, params, *, bf16_operands):
    """Pure-JAX reference (lax.conv).  With bf16_operands=True it applies the
    same operand rounding as the kernel (bf16 inputs/weights, f32 accumulation)."""
    x = jnp.transpose(disp2_nchw, (0, 2, 3, 1))
    for i, (w, b) in enumerate(params):
        xin = x.astype(jnp.bfloat16) if bf16_operands else x
        win = w.astype(jnp.bfloat16) if bf16_operands else w
        x = jax.lax.conv_general_dilated(
            xin, win, window_strides=(1, 1), padding="SAME",
            dimension_numbers=("NHWC", "HWIO", "NHWC"),
            preferred_element_type=jnp.float32) + b
        if i < 3:
            x = jnp.where(x > 0, x, LEAKY_SLOPE * x)
    return jnp.transpose(x, (0, 3, 1, 2))


if __name__ == "__main__":
    key = jax.random.PRNGKey(0)
    key, kx = jax.random.split(key)

    N, Cin, H, W = 2, 4, 16, 16
    disp2 = jax.random.normal(kx, (N, Cin, H, W), jnp.float32)   # PyTorch NCHW input
    params = init_estimater_params(Cin, key)

    out = jax.block_until_ready(estimater_forward(disp2, params))
    assert out.shape == (N, 8, H, W), out.shape

    # Tight check vs a reference with the same bf16 operand rounding
    # (validates the fused conv structure; remaining delta = accumulation order).
    ref_bf16 = jax.block_until_ready(
        _reference_forward(disp2, params, bf16_operands=True))
    err_bf16 = float(jnp.max(jnp.abs(out - ref_bf16)))
    assert jnp.allclose(out, ref_bf16, atol=1e-3, rtol=1e-3), err_bf16

    # Loose sanity bound vs the pure-f32 reference (covers bf16 operand rounding).
    ref_f32 = jax.block_until_ready(
        _reference_forward(disp2, params, bf16_operands=False))
    err_f32 = float(jnp.max(jnp.abs(out - ref_f32)))
    assert err_f32 < 0.1, err_f32

    print("KERNEL_OK")
</pallas_src>

<mosaic_0001>
module attributes {stable_mosaic.version = 11 : i64} {
  func.func @_fused_estimater_kernel(%arg0: i32, %arg1: i32, %arg2: memref<1x1x16x512xbf16, #tpu.memory_space<vmem>>, %arg3: memref<2x256xi32, #tpu.memory_space<vmem>>, %arg4: memref<96x144xbf16, #tpu.memory_space<vmem>>, %arg5: memref<96x1xf32, #tpu.memory_space<vmem>>, %arg6: memref<64x864xbf16, #tpu.memory_space<vmem>>, %arg7: memref<64x1xf32, #tpu.memory_space<vmem>>, %arg8: memref<32x576xbf16, #tpu.memory_space<vmem>>, %arg9: memref<32x1xf32, #tpu.memory_space<vmem>>, %arg10: memref<8x288xbf16, #tpu.memory_space<vmem>>, %arg11: memref<8x1xf32, #tpu.memory_space<vmem>>, %arg12: memref<1x1x8x128xf32, #tpu.memory_space<vmem>>, %arg13: memref<864x256xbf16, #tpu.memory_space<vmem>>, %arg14: memref<96x512xbf16, #tpu.memory_space<vmem>>, %arg15: memref<64x512xbf16, #tpu.memory_space<vmem>>) attributes {dimension_semantics = [#tpu.dimension_semantics<parallel>, #tpu.dimension_semantics<parallel>], iteration_bounds = array<i64: 2, 2>, scalar_prefetch = 0 : i64, scratch_operands = 3 : i64, tpu.core_type = #tpu.core_type<tc>, window_params = [{transform_indices = @transform_0, window_bounds = array<i64: 1, 1, 16, 512>}, {pipeline_mode = #tpu.pipeline_mode<synchronous>, transform_indices = @transform_1, window_bounds = array<i64: 2, 256>}, {pipeline_mode = #tpu.pipeline_mode<synchronous>, transform_indices = @transform_2, window_bounds = array<i64: 96, 144>}, {pipeline_mode = #tpu.pipeline_mode<synchronous>, transform_indices = @transform_3, window_bounds = array<i64: 96, 1>}, {pipeline_mode = #tpu.pipeline_mode<synchronous>, transform_indices = @transform_4, window_bounds = array<i64: 64, 864>}, {pipeline_mode = #tpu.pipeline_mode<synchronous>, transform_indices = @transform_5, window_bounds = array<i64: 64, 1>}, {pipeline_mode = #tpu.pipeline_mode<synchronous>, transform_indices = @transform_6, window_bounds = array<i64: 32, 576>}, {pipeline_mode = #tpu.pipeline_mode<synchronous>, transform_indices = @transform_7, window_bounds = array<i64: 32, 1>}, {pipeline_mode = #tpu.pipeline_mode<synchronous>, transform_indices = @transform_8, window_bounds = array<i64: 8, 288>}, {pipeline_mode = #tpu.pipeline_mode<synchronous>, transform_indices = @transform_9, window_bounds = array<i64: 8, 1>}, {transform_indices = @transform_10, window_bounds = array<i64: 1, 1, 8, 128>}]} {
    %c0 = arith.constant 0 : index
    %c0_0 = arith.constant 0 : index
    %0 = vector.load %arg3[%c0, %c0_0] : memref<2x256xi32, #tpu.memory_space<vmem>>, vector<1x256xi32>
    %c8_i32 = arith.constant 8 : i32
    %1 = arith.muli %arg1, %c8_i32 : i32
    %2 = vector.broadcast %1 : i32 to vector<1x256xi32>
    %3 = arith.addi %0, %2 : vector<1x256xi32>
    %c1 = arith.constant 1 : index
    %c0_1 = arith.constant 0 : index
    %4 = vector.load %arg3[%c1, %c0_1] : memref<2x256xi32, #tpu.memory_space<vmem>>, vector<1x256xi32>
    %c0_2 = arith.constant 0 : index
    %c0_3 = arith.constant 0 : index
    %c0_4 = arith.constant 0 : index
    %c111 = arith.constant 111 : index
    %5 = vector.load %arg2[%c0_2, %c0_3, %c0_4, %c111] : memref<1x1x16x512xbf16, #tpu.memory_space<vmem>>, vector<1x1x16x256xbf16>
    %6 = vector.shape_cast %5 : vector<1x1x16x256xbf16> to vector<16x256xbf16>
    %c-1_i32 = arith.constant -1 : i32
    %7 = vector.broadcast %c-1_i32 : i32 to vector<1x256xi32>
    %8 = arith.addi %3, %7 : vector<1x256xi32>
    %c0_i32 = arith.constant 0 : i32
    %9 = vector.broadcast %c0_i32 : i32 to vector<1x256xi32>
    %10 = arith.cmpi sge, %8, %9 : vector<1x256xi32>
    %c16_i32 = arith.constant 16 : i32
    %11 = vector.broadcast %c16_i32 : i32 to vector<1x256xi32>
    %12 = arith.cmpi slt, %8, %11 : vector<1x256xi32>
    %13 = arith.andi %10, %12 : vector<1x256xi1>
    %c-1_i32_5 = arith.constant -1 : i32
    %14 = vector.broadcast %c-1_i32_5 : i32 to vector<1x256xi32>
    %15 = arith.addi %4, %14 : vector<1x256xi32>
    %c0_i32_6 = arith.constant 0 : i32
    %16 = vector.broadcast %c0_i32_6 : i32 to vector<1x256xi32>
    %17 = arith.cmpi sge, %15, %16 : vector<1x256xi32>
    %18 = arith.andi %13, %17 : vector<1x256xi1>
    %c16_i32_7 = arith.constant 16 : i32
    %19 = vector.broadcast %c16_i32_7 : i32 to vector<1x256xi32>
    %20 = arith.cmpi slt, %15, %19 : vector<1x256xi32>
    %21 = arith.andi %18, %20 : vector<1x256xi1>
    %cst = arith.constant 0.000000e+00 : bf16
    %22 = vector.broadcast %cst : bf16 to vector<16x256xbf16>
    %23 = vector.shape_cast %21 : vector<1x256xi1> to vector<1x256xi1>
    %24 = vector.broadcast %23 : vector<1x256xi1> to vector<16x256xi1>
    %25 = arith.select %24, %6, %22 : vector<16x256xi1>, vector<16x256xbf16>
    %c0_8 = arith.constant 0 : index
    %c0_9 = arith.constant 0 : index
    %26 = vector.load %arg13[%c0_8, %c0_9] : memref<864x256xbf16, #tpu.memory_space<vmem>>, vector<16x256xbf16>
    tpu.vector_store %arg13[%c0_8, %c0_9], %25 {strides = array<i32>} : memref<864x256xbf16, #tpu.memory_space<vmem>>, vector<16x256xbf16>,
    %c0_10 = arith.constant 0 : index
    %c0_11 = arith.constant 0 : index
    %c0_12 = arith.constant 0 : index
    %c112 = arith.constant 112 : index
    %27 = vector.load %arg2[%c0_10, %c0_11, %c0_12, %c112] : memref<1x1x16x512xbf16, #tpu.memory_space<vmem>>, vector<1x1x16x256xbf16>
    %28 = vector.shape_cast %27 : vector<1x1x16x256xbf16> to vector<16x256xbf16>
    %c-1_i32_13 = arith.constant -1 : i32
    %29 = vector.broadcast %c-1_i32_13 : i32 to vector<1x256xi32>
    %30 = arith.addi %3, %29 : vector<1x256xi32>
    %c0_i32_14 = arith.constant 0 : i32
    %31 = vector.broadcast %c0_i32_14 : i32 to vector<1x256xi32>
    %32 = arith.cmpi sge, %30, %31 : vector<1x256xi32>
    %c16_i32_15 = arith.constant 16 : i32
    %33 = vector.broadcast %c16_i32_15 : i32 to vector<1x256xi32>
    %34 = arith.cmpi slt, %30, %33 : vector<1x256xi32>
    %35 = arith.andi %32, %34 : vector<1x256xi1>
    %cst_16 = arith.constant 0.000000e+00 : bf16
    %36 = vector.broadcast %cst_16 : bf16 to vector<16x256xbf16>
    %37 = vector.shape_cast %35 : vector<1x256xi1> to vector<1x256xi1>
    %38 = vector.broadcast %37 : vector<1x256xi1> to vector<16x256xi1>
    %39 = arith.select %38, %28, %36 : vector<16x256xi1>, vector<16x256xbf16>
    %c16 = arith.constant 16 : index
    %c0_17 = arith.constant 0 : index
    %40 = vector.load %arg13[%c16, %c0_17] : memref<864x256xbf16, #tpu.memory_space<vmem>>, vector<16x256xbf16>
    tpu.vector_store %arg13[%c16, %c0_17], %39 {strides = array<i32>} : memref<864x256xbf16, #tpu.memory_space<vmem>>, vector<16x256xbf16>,
    %c0_18 = arith.constant 0 : index
    %c0_19 = arith.constant 0 : index
    %c0_20 = arith.constant 0 : index
    %c113 = arith.constant 113 : index
    %41 = vector.load %arg2[%c0_18, %c0_19, %c0_20, %c113] : memref<1x1x16x512xbf16, #tpu.memory_space<vmem>>, vector<1x1x16x256xbf16>
    %42 = vector.shape_cast %41 : vector<1x1x16x256xbf16> to vector<16x256xbf16>
    %c-1_i32_21 = arith.constant -1 : i32
    %43 = vector.broadcast %c-1_i32_21 : i32 to vector<1x256xi32>
    %44 = arith.addi %3, %43 : vector<1x256xi32>
    %c0_i32_22 = arith.constant 0 : i32
    %45 = vector.broadcast %c0_i32_22 : i32 to vector<1x256xi32>
    %46 = arith.cmpi sge, %44, %45 : vector<1x256xi32>
    %c16_i32_23 = arith.constant 16 : i32
    %47 = vector.broadcast %c16_i32_23 : i32 to vector<1x256xi32>
    %48 = arith.cmpi slt, %44, %47 : vector<1x256xi32>
    %49 = arith.andi %46, %48 : vector<1x256xi1>
    %c1_i32 = arith.constant 1 : i32
    %50 = vector.broadcast %c1_i32 : i32 to vector<1x256xi32>
    %51 = arith.addi %4, %50 : vector<1x256xi32>
    %c0_i32_24 = arith.constant 0 : i32
    %52 = vector.broadcast %c0_i32_24 : i32 to vector<1x256xi32>
    %53 = arith.cmpi sge, %51, %52 : vector<1x256xi32>
    %54 = arith.andi %49, %53 : vector<1x256xi1>
    %c16_i32_25 = arith.constant 16 : i32
    %55 = vector.broadcast %c16_i32_25 : i32 to vector<1x256xi32>
    %56 = arith.cmpi slt, %51, %55 : vector<1x256xi32>
    %57 = arith.andi %54, %56 : vector<1x256xi1>
    %cst_26 = arith.constant 0.000000e+00 : bf16
    %58 = vector.broadcast %cst_26 : bf16 to vector<16x256xbf16>
    %59 = vector.shape_cast %57 : vector<1x256xi1> to vector<1x256xi1>
    %60 = vector.broadcast %59 : vector<1x256xi1> to vector<16x256xi1>
    %61 = arith.select %60, %42, %58 : vector<16x256xi1>, vector<16x256xbf16>
    %c32 = arith.constant 32 : index
    %c0_27 = arith.constant 0 : index
    %62 = vector.load %arg13[%c32, %c0_27] : memref<864x256xbf16, #tpu.memory_space<vmem>>, vector<16x256xbf16>
    tpu.vector_store %arg13[%c32, %c0_27], %61 {strides = array<i32>} : memref<864x256xbf16, #tpu.memory_space<vmem>>, vector<16x256xbf16>,
    %c0_28 = arith.constant 0 : index
    %c0_29 = arith.constant 0 : index
    %c0_30 = arith.constant 0 : index
    %c127 = arith.constant 127 : index
    %63 = vector.load %arg2[%c0_28, %c0_29, %c0_30, %c127] : memref<1x1x16x512xbf16, #tpu.memory_space<vmem>>, vector<1x1x16x256xbf16>
    %64 = vector.shape_cast %63 : vector<1x1x16x256xbf16> to vector<16x256xbf16>
    %c-1_i32_31 = arith.constant -1 : i32
    %65 = vector.broadcast %c-1_i32_31 : i32 to vector<1x256xi32>
    %66 = arith.addi %4, %65 : vector<1x256xi32>
    %c0_i32_32 = arith.constant 0 : i32
    %67 = vector.broadcast %c0_i32_32 : i32 to vector<1x256xi32>
    %68 = arith.cmpi sge, %66, %67 : vector<1x256xi32>
    %c16_i32_33 = arith.constant 16 : i32
    %69 = vector.broadcast %c16_i32_33 : i32 to vector<1x256xi32>
    %70 = arith.cmpi slt, %66, %69 : vector<1x256xi32>
    %71 = arith.andi %68, %70 : vector<1x256xi1>
    %cst_34 = arith.constant 0.000000e+00 : bf16
    %72 = vector.broadcast %cst_34 : bf16 to vector<16x256xbf16>
    %73 = vector.shape_cast %71 : vector<1x256xi1> to vector<1x256xi1>
    %74 = vector.broadcast %73 : vector<1x256xi1> to vector<16x256xi1>
    %75 = arith.select %74, %64, %72 : vector<16x256xi1>, vector<16x256xbf16>
    %c48 = arith.constant 48 : index
    %c0_35 = arith.constant 0 : index
    %76 = vector.load %arg13[%c48, %c0_35] : memref<864x256xbf16, #tpu.memory_space<vmem>>, vector<16x256xbf16>
    tpu.vector_store %arg13[%c48, %c0_35], %75 {strides = array<i32>} : memref<864x256xbf16, #tpu.memory_space<vmem>>, vector<16x256xbf16>,
    %c0_36 = arith.constant 0 : index
    %c0_37 = arith.constant 0 : index
    %c0_38 = arith.constant 0 : index
    %c128 = arith.constant 128 : index
    %77 = vector.load %arg2[%c0_36, %c0_37, %c0_38, %c128] : memref<1x1x16x512xbf16, #tpu.memory_space<vmem>>, vector<1x1x16x256xbf16>
    %78 = vector.shape_cast %77 : vector<1x1x16x256xbf16> to vector<16x256xbf16>
    %c64 = arith.constant 64 : index
    %c0_39 = arith.constant 0 : index
    %79 = vector.load %arg13[%c64, %c0_39] : memref<864x256xbf16, #tpu.memory_space<vmem>>, vector<16x256xbf16>
    tpu.vector_store %arg13[%c64, %c0_39], %78 {strides = array<i32>} : memref<864x256xbf16, #tpu.memory_space<vmem>>, vector<16x256xbf16>,
    %c0_40 = arith.constant 0 : index
    %c0_41 = arith.constant 0 : index
    %c0_42 = arith.constant 0 : index
    %c129 = arith.constant 129 : index
    %80 = vector.load %arg2[%c0_40, %c0_41, %c0_42, %c129] : memref<1x1x16x512xbf16, #tpu.memory_space<vmem>>, vector<1x1x16x256xbf16>
    %81 = vector.shape_cast %80 : vector<1x1x16x256xbf16> to vector<16x256xbf16>
    %c1_i32_43 = arith.constant 1 : i32
    %82 = vector.broadcast %c1_i32_43 : i32 to vector<1x256xi32>
    %83 = arith.addi %4, %82 : vector<1x256xi32>
    %c0_i32_44 = arith.constant 0 : i32
    %84 = vector.broadcast %c0_i32_44 : i32 to vector<1x256xi32>
    %85 = arith.cmpi sge, %83, %84 : vector<1x256xi32>
    %c16_i32_45 = arith.constant 16 : i32
    %86 = vector.broadcast %c16_i32_45 : i32 to vector<1x256xi32>
    %87 = arith.cmpi slt, %83, %86 : vector<1x256xi32>
    %88 = arith.andi %85, %87 : vector<1x256xi1>
    %cst_46 = arith.constant 0.000000e+00 : bf16
    %89 = vector.broadcast %cst_46 : bf16 to vector<16x256xbf16>
    %90 = vector.shape_cast %88 : vector<1x256xi1> to vector<1x256xi1>
    %91 = vector.broadcast %90 : vector<1x256xi1> to vector<16x256xi1>
    %92 = arith.select %91, %81, %89 : vector<16x256xi1>, vector<16x256xbf16>
    %c80 = arith.constant 80 : index
    %c0_47 = arith.constant 0 : index
    %93 = vector.load %arg13[%c80, %c0_47] : memref<864x256xbf16, #tpu.memory_space<vmem>>, vector<16x256xbf16>
    tpu.vector_store %arg13[%c80, %c0_47], %92 {strides = array<i32>} : memref<864x256xbf16, #tpu.memory_space<vmem>>, vector<16x256xbf16>,
    %c0_48 = arith.constant 0 : index
    %c0_49 = arith.constant 0 : index
    %c0_50 = arith.constant 0 : index
    %c143 = arith.constant 143 : index
    %94 = vector.load %arg2[%c0_48, %c0_49, %c0_50, %c143] : memref<1x1x16x512xbf16, #tpu.memory_space<vmem>>, vector<1x1x16x256xbf16>
    %95 = vector.shape_cast %94 : vector<1x1x16x256xbf16> to vector<16x256xbf16>
    %c1_i32_51 = arith.constant 1 : i32
    %96 = vector.broadcast %c1_i32_51 : i32 to vector<1x256xi32>
    %97 = arith.addi %3, %96 : vector<1x256xi32>
    %c0_i32_52 = arith.constant 0 : i32
    %98 = vector.broadcast %c0_i32_52 : i32 to vector<1x256xi32>
    %99 = arith.cmpi sge, %97, %98 : vector<1x256xi32>
    %c16_i32_53 = arith.constant 16 : i32
    %100 = vector.broadcast %c16_i32_53 : i32 to vector<1x256xi32>
    %101 = arith.cmpi slt, %97, %100 : vector<1x256xi32>
    %102 = arith.andi %99, %101 : vector<1x256xi1>
    %c-1_i32_54 = arith.constant -1 : i32
    %103 = vector.broadcast %c-1_i32_54 : i32 to vector<1x256xi32>
    %104 = arith.addi %4, %103 : vector<1x256xi32>
    %c0_i32_55 = arith.constant 0 : i32
    %105 = vector.broadcast %c0_i32_55 : i32 to vector<1x256xi32>
    %106 = arith.cmpi sge, %104, %105 : vector<1x256xi32>
    %107 = arith.andi %102, %106 : vector<1x256xi1>
    %c16_i32_56 = arith.constant 16 : i32
    %108 = vector.broadcast %c16_i32_56 : i32 to vector<1x256xi32>
    %109 = arith.cmpi slt, %104, %108 : vector<1x256xi32>
    %110 = arith.andi %107, %109 : vector<1x256xi1>
    %cst_57 = arith.constant 0.000000e+00 : bf16
    %111 = vector.broadcast %cst_57 : bf16 to vector<16x256xbf16>
    %112 = vector.shape_cast %110 : vector<1x256xi1> to vector<1x256xi1>
    %113 = vector.broadcast %112 : vector<1x256xi1> to vector<16x256xi1>
    %114 = arith.select %113, %95, %111 : vector<16x256xi1>, vector<16x256xbf16>
    %c96 = arith.constant 96 : index
    %c0_58 = arith.constant 0 : index
    %115 = vector.load %arg13[%c96, %c0_58] : memref<864x256xbf16, #tpu.memory_space<vmem>>, vector<16x256xbf16>
    tpu.vector_store %arg13[%c96, %c0_58], %114 {strides = array<i32>} : memref<864x256xbf16, #tpu.memory_space<vmem>>, vector<16x256xbf16>,
    %c0_59 = arith.constant 0 : index
    %c0_60 = arith.constant 0 : index
    %c0_61 = arith.constant 0 : index
    %c144 = arith.constant 144 : index
    %116 = vector.load %arg2[%c0_59, %c0_60, %c0_61, %c144] : memref<1x1x16x512xbf16, #tpu.memory_space<vmem>>, vector<1x1x16x256xbf16>
    %117 = vector.shape_cast %116 : vector<1x1x16x256xbf16> to vector<16x256xbf16>
    %c1_i32_62 = arith.constant 1 : i32
    %118 = vector.broadcast %c1_i32_62 : i32 to vector<1x256xi32>
    %119 = arith.addi %3, %118 : vector<1x256xi32>
    %c0_i32_63 = arith.constant 0 : i32
    %120 = vector.broadcast %c0_i32_63 : i32 to vector<1x256xi32>
    %121 = arith.cmpi sge, %119, %120 : vector<1x256xi32>
    %c16_i32_64 = arith.constant 16 : i32
    %122 = vector.broadcast %c16_i32_64 : i32 to vector<1x256xi32>
    %123 = arith.cmpi slt, %119, %122 : vector<1x256xi32>
    %124 = arith.andi %121, %123 : vector<1x256xi1>
    %cst_65 = arith.constant 0.000000e+00 : bf16
    %125 = vector.broadcast %cst_65 : bf16 to vector<16x256xbf16>
    %126 = vector.shape_cast %124 : vector<1x256xi1> to vector<1x256xi1>
    %127 = vector.broadcast %126 : vector<1x256xi1> to vector<16x256xi1>
    %128 = arith.select %127, %117, %125 : vector<16x256xi1>, vector<16x256xbf16>
    %c112_66 = arith.constant 112 : index
    %c0_67 = arith.constant 0 : index
    %129 = vector.load %arg13[%c112_66, %c0_67] : memref<864x256xbf16, #tpu.memory_space<vmem>>, vector<16x256xbf16>
    tpu.vector_store %arg13[%c112_66, %c0_67], %128 {strides = array<i32>} : memref<864x256xbf16, #tpu.memory_space<vmem>>, vector<16x256xbf16>,
    %c0_68 = arith.constant 0 : index
    %c0_69 = arith.constant 0 : index
    %c0_70 = arith.constant 0 : index
    %c145 = arith.constant 145 : index
    %130 = vector.load %arg2[%c0_68, %c0_69, %c0_70, %c145] : memref<1x1x16x512xbf16, #tpu.memory_space<vmem>>, vector<1x1x16x256xbf16>
    %131 = vector.shape_cast %130 : vector<1x1x16x256xbf16> to vector<16x256xbf16>
    %c1_i32_71 = arith.constant 1 : i32
    %132 = vector.broadcast %c1_i32_71 : i32 to vector<1x256xi32>
    %133 = arith.addi %3, %132 : vector<1x256xi32>
    %c0_i32_72 = arith.constant 0 : i32
    %134 = vector.broadcast %c0_i32_72 : i32 to vector<1x256xi32>
    %135 = arith.cmpi sge, %133, %134 : vector<1x256xi32>
    %c16_i32_73 = arith.constant 16 : i32
    %136 = vector.broadcast %c16_i32_73 : i32 to vector<1x256xi32>
    %137 = arith.cmpi slt, %133, %136 : vector<1x256xi32>
    %138 = arith.andi %135, %137 : vector<1x256xi1>
    %c1_i32_74 = arith.constant 1 : i32
    %139 = vector.broadcast %c1_i32_74 : i32 to vector<1x256xi32>
    %140 = arith.addi %4, %139 : vector<1x256xi32>
    %c0_i32_75 = arith.constant 0 : i32
    %141 = vector.broadcast %c0_i32_75 : i32 to vector<1x256xi32>
    %142 = arith.cmpi sge, %140, %141 : vector<1x256xi32>
    %143 = arith.andi %138, %142 : vector<1x256xi1>
    %c16_i32_76 = arith.constant 16 : i32
    %144 = vector.broadcast %c16_i32_76 : i32 to vector<1x256xi32>
    %145 = arith.cmpi slt, %140, %144 : vector<1x256xi32>
    %146 = arith.andi %143, %145 : vector<1x256xi1>
    %cst_77 = arith.constant 0.000000e+00 : bf16
    %147 = vector.broadcast %cst_77 : bf16 to vector<16x256xbf16>
    %148 = vector.shape_cast %146 : vector<1x256xi1> to vector<1x256xi1>
    %149 = vector.broadcast %148 : vector<1x256xi1> to vector<16x256xi1>
    %150 = arith.select %149, %131, %147 : vector<16x256xi1>, vector<16x256xbf16>
    %c128_78 = arith.constant 128 : index
    %c0_79 = arith.constant 0 : index
    %151 = vector.load %arg13[%c128_78, %c0_79] : memref<864x256xbf16, #tpu.memory_space<vmem>>, vector<16x256xbf16>
    tpu.vector_store %arg13[%c128_78, %c0_79], %150 {strides = array<i32>} : memref<864x256xbf16, #tpu.memory_space<vmem>>, vector<16x256xbf16>,
    %c0_80 = arith.constant 0 : index
    %c0_81 = arith.constant 0 : index
    %152 = vector.load %arg4[%c0_80, %c0_81] : memref<96x144xbf16, #tpu.memory_space<vmem>>, vector<96x144xbf16>
    %c0_82 = arith.constant 0 : index
    %c0_83 = arith.constant 0 : index
    %153 = vector.load %arg13[%c0_82, %c0_83] : memref<864x256xbf16, #tpu.memory_space<vmem>>, vector<144x256xbf16>
    %cst_84 = arith.constant dense<0.000000e+00> : vector<96x256xf32>
    %154 = tpu.matmul %152, %153, %cst_84 {dimension_numbers = #tpu.dot_dimension_numbers<[1], [0], [0], [1], [0, 0, 1, 1], [], []>} : vector<96x144xbf16>, vector<144x256xbf16>, vector<96x256xf32> -> vector<96x256xf32>
    %c0_85 = arith.constant 0 : index
    %c0_86 = arith.constant 0 : index
    %155 = vector.load %arg5[%c0_85, %c0_86] : memref<96x1xf32, #tpu.memory_space<vmem>>, vector<96x1xf32>
    %156 = vector.broadcast %155 : vector<96x1xf32> to vector<96x256xf32>
    %157 = arith.addf %154, %156 : vector<96x256xf32>
    %cst_87 = arith.constant 0.000000e+00 : f32
    %158 = vector.broadcast %cst_87 : f32 to vector<96x256xf32>
    %159 = arith.cmpf ogt, %157, %158 : vector<96x256xf32>
    %cst_88 = arith.constant 2.000000e-01 : f32
    %160 = vector.broadcast %cst_88 : f32 to vector<96x256xf32>
    %161 = arith.mulf %160, %157 : vector<96x256xf32>
    %162 = arith.select %159, %157, %161 : vector<96x256xi1>, vector<96x256xf32>
    %163 = arith.truncf %162 : vector<96x256xf32> to vector<96x256xbf16>
    %c0_89 = arith.constant 0 : index
    %c128_90 = arith.constant 128 : index
    %164 = vector.load %arg14[%c0_89, %c128_90] : memref<96x512xbf16, #tpu.memory_space<vmem>>, vector<96x256xbf16>
    tpu.vector_store %arg14[%c0_89, %c128_90], %163 {strides = array<i32>} : memref<96x512xbf16, #tpu.memory_space<vmem>>, vector<96x256xbf16>,
    %c0_91 = arith.constant 0 : index
    %c111_92 = arith.constant 111 : index
    %165 = vector.load %arg14[%c0_91, %c111_92] : memref<96x512xbf16, #tpu.memory_space<vmem>>, vector<96x256xbf16>
    %c-1_i32_93 = arith.constant -1 : i32
    %166 = vector.broadcast %c-1_i32_93 : i32 to vector<1x256xi32>
    %167 = arith.addi %3, %166 : vector<1x256xi32>
    %c0_i32_94 = arith.constant 0 : i32
    %168 = vector.broadcast %c0_i32_94 : i32 to vector<1x256xi32>
    %169 = arith.cmpi sge, %167, %168 : vector<1x256xi32>
    %c16_i32_95 = arith.constant 16 : i32
    %170 = vector.broadcast %c16_i32_95 : i32 to vector<1x256xi32>
    %171 = arith.cmpi slt, %167, %170 : vector<1x256xi32>
    %172 = arith.andi %169, %171 : vector<1x256xi1>
    %c-1_i32_96 = arith.constant -1 : i32
    %173 = vector.broadcast %c-1_i32_96 : i32 to vector<1x256xi32>
    %174 = arith.addi %4, %173 : vector<1x256xi32>
    %c0_i32_97 = arith.constant 0 : i32
    %175 = vector.broadcast %c0_i32_97 : i32 to vector<1x256xi32>
    %176 = arith.cmpi sge, %174, %175 : vector<1x256xi32>
    %177 = arith.andi %172, %176 : vector<1x256xi1>
    %c16_i32_98 = arith.constant 16 : i32
    %178 = vector.broadcast %c16_i32_98 : i32 to vector<1x256xi32>
    %179 = arith.cmpi slt, %174, %178 : vector<1x256xi32>
    %180 = arith.andi %177, %179 : vector<1x256xi1>
    %cst_99 = arith.constant 0.000000e+00 : bf16
    %181 = vector.broadcast %cst_99 : bf16 to vector<96x256xbf16>
    %182 = vector.shape_cast %180 : vector<1x256xi1> to vector<1x256xi1>
    %183 = vector.broadcast %182 : vector<1x256xi1> to vector<96x256xi1>
    %184 = arith.select %183, %165, %181 : vector<96x256xi1>, vector<96x256xbf16>
    %c0_100 = arith.constant 0 : index
    %c0_101 = arith.constant 0 : index
    %185 = vector.load %arg13[%c0_100, %c0_101] : memref<864x256xbf16, #tpu.memory_space<vmem>>, vector<96x256xbf16>
    tpu.vector_store %arg13[%c0_100, %c0_101], %184 {strides = array<i32>} : memref<864x256xbf16, #tpu.memory_space<vmem>>, vector<96x256xbf16>,
    %c0_102 = arith.constant 0 : index
    %c112_103 = arith.constant 112 : index
    %186 = vector.load %arg14[%c0_102, %c112_103] : memref<96x512xbf16, #tpu.memory_space<vmem>>, vector<96x256xbf16>
    %c-1_i32_104 = arith.constant -1 : i32
    %187 = vector.broadcast %c-1_i32_104 : i32 to vector<1x256xi32>
    %188 = arith.addi %3, %187 : vector<1x256xi32>
    %c0_i32_105 = arith.constant 0 : i32
    %189 = vector.broadcast %c0_i32_105 : i32 to vector<1x256xi32>
    %190 = arith.cmpi sge, %188, %189 : vector<1x256xi32>
    %c16_i32_106 = arith.constant 16 : i32
    %191 = vector.broadcast %c16_i32_106 : i32 to vector<1x256xi32>
    %192 = arith.cmpi slt, %188, %191 : vector<1x256xi32>
    %193 = arith.andi %190, %192 : vector<1x256xi1>
    %cst_107 = arith.constant 0.000000e+00 : bf16
    %194 = vector.broadcast %cst_107 : bf16 to vector<96x256xbf16>
    %195 = vector.shape_cast %193 : vector<1x256xi1> to vector<1x256xi1>
    %196 = vector.broadcast %195 : vector<1x256xi1> to vector<96x256xi1>
    %197 = arith.select %196, %186, %194 : vector<96x256xi1>, vector<96x256xbf16>
    %c96_108 = arith.constant 96 : index
    %c0_109 = arith.constant 0 : index
    %198 = vector.load %arg13[%c96_108, %c0_109] : memref<864x256xbf16, #tpu.memory_space<vmem>>, vector<96x256xbf16>
    tpu.vector_store %arg13[%c96_108, %c0_109], %197 {strides = array<i32>} : memref<864x256xbf16, #tpu.memory_space<vmem>>, vector<96x256xbf16>,
    %c0_110 = arith.constant 0 : index
    %c113_111 = arith.constant 113 : index
    %199 = vector.load %arg14[%c0_110, %c113_111] : memref<96x512xbf16, #tpu.memory_space<vmem>>, vector<96x256xbf16>
    %c-1_i32_112 = arith.constant -1 : i32
    %200 = vector.broadcast %c-1_i32_112 : i32 to vector<1x256xi32>
    %201 = arith.addi %3, %200 : vector<1x256xi32>
    %c0_i32_113 = arith.constant 0 : i32
    %202 = vector.broadcast %c0_i32_113 : i32 to vector<1x256xi32>
    %203 = arith.cmpi sge, %201, %202 : vector<1x256xi32>
    %c16_i32_114 = arith.constant 16 : i32
    %204 = vector.broadcast %c16_i32_114 : i32 to vector<1x256xi32>
    %205 = arith.cmpi slt, %201, %204 : vector<1x256xi32>
    %206 = arith.andi %203, %205 : vector<1x256xi1>
    %c1_i32_115 = arith.constant 1 : i32
    %207 = vector.broadcast %c1_i32_115 : i32 to vector<1x256xi32>
    %208 = arith.addi %4, %207 : vector<1x256xi32>
    %c0_i32_116 = arith.constant 0 : i32
    %209 = vector.broadcast %c0_i32_116 : i32 to vector<1x256xi32>
    %210 = arith.cmpi sge, %208, %209 : vector<1x256xi32>
    %211 = arith.andi %206, %210 : vector<1x256xi1>
    %c16_i32_117 = arith.constant 16 : i32
    %212 = vector.broadcast %c16_i32_117 : i32 to vector<1x256xi32>
    %213 = arith.cmpi slt, %208, %212 : vector<1x256xi32>
    %214 = arith.andi %211, %213 : vector<1x256xi1>
    %cst_118 = arith.constant 0.000000e+00 : bf16
    %215 = vector.broadcast %cst_118 : bf16 to vector<96x256xbf16>
    %216 = vector.shape_cast %214 : vector<1x256xi1> to vector<1x256xi1>
    %217 = vector.broadcast %216 : vector<1x256xi1> to vector<96x256xi1>
    %218 = arith.select %217, %199, %215 : vector<96x256xi1>, vector<96x256xbf16>
    %c192 = arith.constant 192 : index
    %c0_119 = arith.constant 0 : index
    %219 = vector.load %arg13[%c192, %c0_119] : memref<864x256xbf16, #tpu.memory_space<vmem>>, vector<96x256xbf16>
    tpu.vector_store %arg13[%c192, %c0_119], %218 {strides = array<i32>} : memref<864x256xbf16, #tpu.memory_space<vmem>>, vector<96x256xbf16>,
    %c0_120 = arith.constant 0 : index
    %c127_121 = arith.constant 127 : index
    %220 = vector.load %arg14[%c0_120, %c127_121] : memref<96x512xbf16, #tpu.memory_space<vmem>>, vector<96x256xbf16>
    %c-1_i32_122 = arith.constant -1 : i32
    %221 = vector.broadcast %c-1_i32_122 : i32 to vector<1x256xi32>
    %222 = arith.addi %4, %221 : vector<1x256xi32>
    %c0_i32_123 = arith.constant 0 : i32
    %223 = vector.broadcast %c0_i32_123 : i32 to vector<1x256xi32>
    %224 = arith.cmpi sge, %222, %223 : vector<1x256xi32>
    %c16_i32_124 = arith.constant 16 : i32
    %225 = vector.broadcast %c16_i32_124 : i32 to vector<1x256xi32>
    %226 = arith.cmpi slt, %222, %225 : vector<1x256xi32>
    %227 = arith.andi %224, %226 : vector<1x256xi1>
    %cst_125 = arith.constant 0.000000e+00 : bf16
    %228 = vector.broadcast %cst_125 : bf16 to vector<96x256xbf16>
    %229 = vector.shape_cast %227 : vector<1x256xi1> to vector<1x256xi1>
    %230 = vector.broadcast %229 : vector<1x256xi1> to vector<96x256xi1>
    %231 = arith.select %230, %220, %228 : vector<96x256xi1>, vector<96x256xbf16>
    %c288 = arith.constant 288 : index
    %c0_126 = arith.constant 0 : index
    %232 = vector.load %arg13[%c288, %c0_126] : memref<864x256xbf16, #tpu.memory_space<vmem>>, vector<96x256xbf16>
    tpu.vector_store %arg13[%c288, %c0_126], %231 {strides = array<i32>} : memref<864x256xbf16, #tpu.memory_space<vmem>>, vector<96x256xbf16>,
    %c0_127 = arith.constant 0 : index
    %c128_128 = arith.constant 128 : index
    %233 = vector.load %arg14[%c0_127, %c128_128] : memref<96x512xbf16, #tpu.memory_space<vmem>>, vector<96x256xbf16>
    %c384 = arith.constant 384 : index
    %c0_129 = arith.constant 0 : index
    %234 = vector.load %arg13[%c384, %c0_129] : memref<864x256xbf16, #tpu.memory_space<vmem>>, vector<96x256xbf16>
    tpu.vector_store %arg13[%c384, %c0_129], %233 {strides = array<i32>} : memref<864x256xbf16, #tpu.memory_space<vmem>>, vector<96x256xbf16>,
    %c0_130 = arith.constant 0 : index
    %c129_131 = arith.constant 129 : index
    %235 = vector.load %arg14[%c0_130, %c129_131] : memref<96x512xbf16, #tpu.memory_space<vmem>>, vector<96x256xbf16>
    %c1_i32_132 = arith.constant 1 : i32
    %236 = vector.broadcast %c1_i32_132 : i32 to vector<1x256xi32>
    %237 = arith.addi %4, %236 : vector<1x256xi32>
    %c0_i32_133 = arith.constant 0 : i32
    %238 = vector.broadcast %c0_i32_133 : i32 to vector<1x256xi32>
    %239 = arith.cmpi sge, %237, %238 : vector<1x256xi32>
    %c16_i32_134 = arith.constant 16 : i32
    %240 = vector.broadcast %c16_i32_134 : i32 to vector<1x256xi32>
    %241 = arith.cmpi slt, %237, %240 : vector<1x256xi32>
    %242 = arith.andi %239, %241 : vector<1x256xi1>
    %cst_135 = arith.constant 0.000000e+00 : bf16
    %243 = vector.broadcast %cst_135 : bf16 to vector<96x256xbf16>
    %244 = vector.shape_cast %242 : vector<1x256xi1> to vector<1x256xi1>
    %245 = vector.broadcast %244 : vector<1x256xi1> to vector<96x256xi1>
    %246 = arith.select %245, %235, %243 : vector<96x256xi1>, vector<96x256xbf16>
    %c480 = arith.constant 480 : index
    %c0_136 = arith.constant 0 : index
    %247 = vector.load %arg13[%c480, %c0_136] : memref<864x256xbf16, #tpu.memory_space<vmem>>, vector<96x256xbf16>
    tpu.vector_store %arg13[%c480, %c0_136], %246 {strides = array<i32>} : memref<864x256xbf16, #tpu.memory_space<vmem>>, vector<96x256xbf16>,
    %c0_137 = arith.constant 0 : index
    %c143_138 = arith.constant 143 : index
    %248 = vector.load %arg14[%c0_137, %c143_138] : memref<96x512xbf16, #tpu.memory_space<vmem>>, vector<96x256xbf16>
    %c1_i32_139 = arith.constant 1 : i32
    %249 = vector.broadcast %c1_i32_139 : i32 to vector<1x256xi32>
    %250 = arith.addi %3, %249 : vector<1x256xi32>
    %c0_i32_140 = arith.constant 0 : i32
    %251 = vector.broadcast %c0_i32_140 : i32 to vector<1x256xi32>
    %252 = arith.cmpi sge, %250, %251 : vector<1x256xi32>
    %c16_i32_141 = arith.constant 16 : i32
    %253 = vector.broadcast %c16_i32_141 : i32 to vector<1x256xi32>
    %254 = arith.cmpi slt, %250, %253 : vector<1x256xi32>
    %255 = arith.andi %252, %254 : vector<1x256xi1>
    %c-1_i32_142 = arith.constant -1 : i32
    %256 = vector.broadcast %c-1_i32_142 : i32 to vector<1x256xi32>
    %257 = arith.addi %4, %256 : vector<1x256xi32>
    %c0_i32_143 = arith.constant 0 : i32
    %258 = vector.broadcast %c0_i32_143 : i32 to vector<1x256xi32>
    %259 = arith.cmpi sge, %257, %258 : vector<1x256xi32>
    %260 = arith.andi %255, %259 : vector<1x256xi1>
    %c16_i32_144 = arith.constant 16 : i32
    %261 = vector.broadcast %c16_i32_144 : i32 to vector<1x256xi32>
    %262 = arith.cmpi slt, %257, %261 : vector<1x256xi32>
    %263 = arith.andi %260, %262 : vector<1x256xi1>
    %cst_145 = arith.constant 0.000000e+00 : bf16
    %264 = vector.broadcast %cst_145 : bf16 to vector<96x256xbf16>
    %265 = vector.shape_cast %263 : vector<1x256xi1> to vector<1x256xi1>
    %266 = vector.broadcast %265 : vector<1x256xi1> to vector<96x256xi1>
    %267 = arith.select %266, %248, %264 : vector<96x256xi1>, vector<96x256xbf16>
    %c576 = arith.constant 576 : index
    %c0_146 = arith.constant 0 : index
    %268 = vector.load %arg13[%c576, %c0_146] : memref<864x256xbf16, #tpu.memory_space<vmem>>, vector<96x256xbf16>
    tpu.vector_store %arg13[%c576, %c0_146], %267 {strides = array<i32>} : memref<864x256xbf16, #tpu.memory_space<vmem>>, vector<96x256xbf16>,
    %c0_147 = arith.constant 0 : index
    %c144_148 = arith.constant 144 : index
    %269 = vector.load %arg14[%c0_147, %c144_148] : memref<96x512xbf16, #tpu.memory_space<vmem>>, vector<96x256xbf16>
    %c1_i32_149 = arith.constant 1 : i32
    %270 = vector.broadcast %c1_i32_149 : i32 to vector<1x256xi32>
    %271 = arith.addi %3, %270 : vector<1x256xi32>
    %c0_i32_150 = arith.constant 0 : i32
    %272 = vector.broadcast %c0_i32_150 : i32 to vector<1x256xi32>
    %273 = arith.cmpi sge, %271, %272 : vector<1x256xi32>
    %c16_i32_151 = arith.constant 16 : i32
    %274 = vector.broadcast %c16_i32_151 : i32 to vector<1x256xi32>
    %275 = arith.cmpi slt, %271, %274 : vector<1x256xi32>
    %276 = arith.andi %273, %275 : vector<1x256xi1>
    %cst_152 = arith.constant 0.000000e+00 : bf16
    %277 = vector.broadcast %cst_152 : bf16 to vector<96x256xbf16>
    %278 = vector.shape_cast %276 : vector<1x256xi1> to vector<1x256xi1>
    %279 = vector.broadcast %278 : vector<1x256xi1> to vector<96x256xi1>
    %280 = arith.select %279, %269, %277 : vector<96x256xi1>, vector<96x256xbf16>
    %c672 = arith.constant 672 : index
    %c0_153 = arith.constant 0 : index
    %281 = vector.load %arg13[%c672, %c0_153] : memref<864x256xbf16, #tpu.memory_space<vmem>>, vector<96x256xbf16>
    tpu.vector_store %arg13[%c672, %c0_153], %280 {strides = array<i32>} : memref<864x256xbf16, #tpu.memory_space<vmem>>, vector<96x256xbf16>,
    %c0_154 = arith.constant 0 : index
    %c145_155 = arith.constant 145 : index
    %282 = vector.load %arg14[%c0_154, %c145_155] : memref<96x512xbf16, #tpu.memory_space<vmem>>, vector<96x256xbf16>
    %c1_i32_156 = arith.constant 1 : i32
    %283 = vector.broadcast %c1_i32_156 : i32 to vector<1x256xi32>
    %284 = arith.addi %3, %283 : vector<1x256xi32>
    %c0_i32_157 = arith.constant 0 : i32
    %285 = vector.broadcast %c0_i32_157 : i32 to vector<1x256xi32>
    %286 = arith.cmpi sge, %284, %285 : vector<1x256xi32>
    %c16_i32_158 = arith.constant 16 : i32
    %287 = vector.broadcast %c16_i32_158 : i32 to vector<1x256xi32>
    %288 = arith.cmpi slt, %284, %287 : vector<1x256xi32>
    %289 = arith.andi %286, %288 : vector<1x256xi1>
    %c1_i32_159 = arith.constant 1 : i32
    %290 = vector.broadcast %c1_i32_159 : i32 to vector<1x256xi32>
    %291 = arith.addi %4, %290 : vector<1x256xi32>
    %c0_i32_160 = arith.constant 0 : i32
    %292 = vector.broadcast %c0_i32_160 : i32 to vector<1x256xi32>
    %293 = arith.cmpi sge, %291, %292 : vector<1x256xi32>
    %294 = arith.andi %289, %293 : vector<1x256xi1>
    %c16_i32_161 = arith.constant 16 : i32
    %295 = vector.broadcast %c16_i32_161 : i32 to vector<1x256xi32>
    %296 = arith.cmpi slt, %291, %295 : vector<1x256xi32>
    %297 = arith.andi %294, %296 : vector<1x256xi1>
    %cst_162 = arith.constant 0.000000e+00 : bf16
    %298 = vector.broadcast %cst_162 : bf16 to vector<96x256xbf16>
    %299 = vector.shape_cast %297 : vector<1x256xi1> to vector<1x256xi1>
    %300 = vector.broadcast %299 : vector<1x256xi1> to vector<96x256xi1>
    %301 = arith.select %300, %282, %298 : vector<96x256xi1>, vector<96x256xbf16>
    %c768 = arith.constant 768 : index
    %c0_163 = arith.constant 0 : index
    %302 = vector.load %arg13[%c768, %c0_163] : memref<864x256xbf16, #tpu.memory_space<vmem>>, vector<96x256xbf16>
    tpu.vector_store %arg13[%c768, %c0_163], %301 {strides = array<i32>} : memref<864x256xbf16, #tpu.memory_space<vmem>>, vector<96x256xbf16>,
    %c0_164 = arith.constant 0 : index
    %c0_165 = arith.constant 0 : index
    %303 = vector.load %arg6[%c0_164, %c0_165] : memref<64x864xbf16, #tpu.memory_space<vmem>>, vector<64x864xbf16>
    %c0_166 = arith.constant 0 : index
    %c0_167 = arith.constant 0 : index
    %304 = vector.load %arg13[%c0_166, %c0_167] : memref<864x256xbf16, #tpu.memory_space<vmem>>, vector<864x256xbf16>
    %cst_168 = arith.constant dense<0.000000e+00> : vector<64x256xf32>
    %305 = tpu.matmul %303, %304, %cst_168 {dimension_numbers = #tpu.dot_dimension_numbers<[1], [0], [0], [1], [0, 0, 1, 1], [], []>} : vector<64x864xbf16>, vector<864x256xbf16>, vector<64x256xf32> -> vector<64x256xf32>
    %c0_169 = arith.constant 0 : index
    %c0_170 = arith.constant 0 : index
    %306 = vector.load %arg7[%c0_169, %c0_170] : memref<64x1xf32, #tpu.memory_space<vmem>>, vector<64x1xf32>
    %307 = vector.broadcast %306 : vector<64x1xf32> to vector<64x256xf32>
    %308 = arith.addf %305, %307 : vector<64x256xf32>
    %cst_171 = arith.constant 0.000000e+00 : f32
    %309 = vector.broadcast %cst_171 : f32 to vector<64x256xf32>
    %310 = arith.cmpf ogt, %308, %309 : vector<64x256xf32>
    %cst_172 = arith.constant 2.000000e-01 : f32
    %311 = vector.broadcast %cst_172 : f32 to vector<64x256xf32>
    %312 = arith.mulf %311, %308 : vector<64x256xf32>
    %313 = arith.select %310, %308, %312 : vector<64x256xi1>, vector<64x256xf32>
    %314 = arith.truncf %313 : vector<64x256xf32> to vector<64x256xbf16>
    %c0_173 = arith.constant 0 : index
    %c128_174 = arith.constant 128 : index
    %315 = vector.load %arg15[%c0_173, %c128_174] : memref<64x512xbf16, #tpu.memory_space<vmem>>, vector<64x256xbf16>
    tpu.vector_store %arg15[%c0_173, %c128_174], %314 {strides = array<i32>} : memref<64x512xbf16, #tpu.memory_space<vmem>>, vector<64x256xbf16>,
    %c0_175 = arith.constant 0 : index
    %c111_176 = arith.constant 111 : index
    %316 = vector.load %arg15[%c0_175, %c111_176] : memref<64x512xbf16, #tpu.memory_space<vmem>>, vector<64x256xbf16>
    %c-1_i32_177 = arith.constant -1 : i32
    %317 = vector.broadcast %c-1_i32_177 : i32 to vector<1x256xi32>
    %318 = arith.addi %3, %317 : vector<1x256xi32>
    %c0_i32_178 = arith.constant 0 : i32
    %319 = vector.broadcast %c0_i32_178 : i32 to vector<1x256xi32>
    %320 = arith.cmpi sge, %318, %319 : vector<1x256xi32>
    %c16_i32_179 = arith.constant 16 : i32
    %321 = vector.broadcast %c16_i32_179 : i32 to vector<1x256xi32>
    %322 = arith.cmpi slt, %318, %321 : vector<1x256xi32>
    %323 = arith.andi %320, %322 : vector<1x256xi1>
    %c-1_i32_180 = arith.constant -1 : i32
    %324 = vector.broadcast %c-1_i32_180 : i32 to vector<1x256xi32>
    %325 = arith.addi %4, %324 : vector<1x256xi32>
    %c0_i32_181 = arith.constant 0 : i32
    %326 = vector.broadcast %c0_i32_181 : i32 to vector<1x256xi32>
    %327 = arith.cmpi sge, %325, %326 : vector<1x256xi32>
    %328 = arith.andi %323, %327 : vector<1x256xi1>
    %c16_i32_182 = arith.constant 16 : i32
    %329 = vector.broadcast %c16_i32_182 : i32 to vector<1x256xi32>
    %330 = arith.cmpi slt, %325, %329 : vector<1x256xi32>
    %331 = arith.andi %328, %330 : vector<1x256xi1>
    %cst_183 = arith.constant 0.000000e+00 : bf16
    %332 = vector.broadcast %cst_183 : bf16 to vector<64x256xbf16>
    %333 = vector.shape_cast %331 : vector<1x256xi1> to vector<1x256xi1>
    %334 = vector.broadcast %333 : vector<1x256xi1> to vector<64x256xi1>
    %335 = arith.select %334, %316, %332 : vector<64x256xi1>, vector<64x256xbf16>
    %c0_184 = arith.constant 0 : index
    %c0_185 = arith.constant 0 : index
    %336 = vector.load %arg13[%c0_184, %c0_185] : memref<864x256xbf16, #tpu.memory_space<vmem>>, vector<64x256xbf16>
    tpu.vector_store %arg13[%c0_184, %c0_185], %335 {strides = array<i32>} : memref<864x256xbf16, #tpu.memory_space<vmem>>, vector<64x256xbf16>,
    %c0_186 = arith.constant 0 : index
    %c112_187 = arith.constant 112 : index
    %337 = vector.load %arg15[%c0_186, %c112_187] : memref<64x512xbf16, #tpu.memory_space<vmem>>, vector<64x256xbf16>
    %c-1_i32_188 = arith.constant -1 : i32
    %338 = vector.broadcast %c-1_i32_188 : i32 to vector<1x256xi32>
    %339 = arith.addi %3, %338 : vector<1x256xi32>
    %c0_i32_189 = arith.constant 0 : i32
    %340 = vector.broadcast %c0_i32_189 : i32 to vector<1x256xi32>
    %341 = arith.cmpi sge, %339, %340 : vector<1x256xi32>
    %c16_i32_190 = arith.constant 16 : i32
    %342 = vector.broadcast %c16_i32_190 : i32 to vector<1x256xi32>
    %343 = arith.cmpi slt, %339, %342 : vector<1x256xi32>
    %344 = arith.andi %341, %343 : vector<1x256xi1>
    %cst_191 = arith.constant 0.000000e+00 : bf16
    %345 = vector.broadcast %cst_191 : bf16 to vector<64x256xbf16>
    %346 = vector.shape_cast %344 : vector<1x256xi1> to vector<1x256xi1>
    %347 = vector.broadcast %346 : vector<1x256xi1> to vector<64x256xi1>
    %348 = arith.select %347, %337, %345 : vector<64x256xi1>, vector<64x256xbf16>
    %c64_192 = arith.constant 64 : index
    %c0_193 = arith.constant 0 : index
    %349 = vector.load %arg13[%c64_192, %c0_193] : memref<864x256xbf16, #tpu.memory_space<vmem>>, vector<64x256xbf16>
    tpu.vector_store %arg13[%c64_192, %c0_193], %348 {strides = array<i32>} : memref<864x256xbf16, #tpu.memory_space<vmem>>, vector<64x256xbf16>,
    %c0_194 = arith.constant 0 : index
    %c113_195 = arith.constant 113 : index
    %350 = vector.load %arg15[%c0_194, %c113_195] : memref<64x512xbf16, #tpu.memory_space<vmem>>, vector<64x256xbf16>
    %c-1_i32_196 = arith.constant -1 : i32
    %351 = vector.broadcast %c-1_i32_196 : i32 to vector<1x256xi32>
    %352 = arith.addi %3, %351 : vector<1x256xi32>
    %c0_i32_197 = arith.constant 0 : i32
    %353 = vector.broadcast %c0_i32_197 : i32 to vector<1x256xi32>
    %354 = arith.cmpi sge, %352, %353 : vector<1x256xi32>
    %c16_i32_198 = arith.constant 16 : i32
    %355 = vector.broadcast %c16_i32_198 : i32 to vector<1x256xi32>
    %356 = arith.cmpi slt, %352, %355 : vector<1x256xi32>
    %357 = arith.andi %354, %356 : vector<1x256xi1>
    %c1_i32_199 = arith.constant 1 : i32
    %358 = vector.broadcast %c1_i32_199 : i32 to vector<1x256xi32>
    %359 = arith.addi %4, %358 : vector<1x256xi32>
    %c0_i32_200 = arith.constant 0 : i32
    %360 = vector.broadcast %c0_i32_200 : i32 to vector<1x256xi32>
    %361 = arith.cmpi sge, %359, %360 : vector<1x256xi32>
    %362 = arith.andi %357, %361 : vector<1x256xi1>
    %c16_i32_201 = arith.constant 16 : i32
    %363 = vector.broadcast %c16_i32_201 : i32 to vector<1x256xi32>
    %364 = arith.cmpi slt, %359, %363 : vector<1x256xi32>
    %365 = arith.andi %362, %364 : vector<1x256xi1>
    %cst_202 = arith.constant 0.000000e+00 : bf16
    %366 = vector.broadcast %cst_202 : bf16 to vector<64x256xbf16>
    %367 = vector.shape_cast %365 : vector<1x256xi1> to vector<1x256xi1>
    %368 = vector.broadcast %367 : vector<1x256xi1> to vector<64x256xi1>
    %369 = arith.select %368, %350, %366 : vector<64x256xi1>, vector<64x256xbf16>
    %c128_203 = arith.constant 128 : index
    %c0_204 = arith.constant 0 : index
    %370 = vector.load %arg13[%c128_203, %c0_204] : memref<864x256xbf16, #tpu.memory_space<vmem>>, vector<64x256xbf16>
    tpu.vector_store %arg13[%c128_203, %c0_204], %369 {strides = array<i32>} : memref<864x256xbf16, #tpu.memory_space<vmem>>, vector<64x256xbf16>,
    %c0_205 = arith.constant 0 : index
    %c127_206 = arith.constant 127 : index
    %371 = vector.load %arg15[%c0_205, %c127_206] : memref<64x512xbf16, #tpu.memory_space<vmem>>, vector<64x256xbf16>
    %c-1_i32_207 = arith.constant -1 : i32
    %372 = vector.broadcast %c-1_i32_207 : i32 to vector<1x256xi32>
    %373 = arith.addi %4, %372 : vector<1x256xi32>
    %c0_i32_208 = arith.constant 0 : i32
    %374 = vector.broadcast %c0_i32_208 : i32 to vector<1x256xi32>
    %375 = arith.cmpi sge, %373, %374 : vector<1x256xi32>
    %c16_i32_209 = arith.constant 16 : i32
    %376 = vector.broadcast %c16_i32_209 : i32 to vector<1x256xi32>
    %377 = arith.cmpi slt, %373, %376 : vector<1x256xi32>
    %378 = arith.andi %375, %377 : vector<1x256xi1>
    %cst_210 = arith.constant 0.000000e+00 : bf16
    %379 = vector.broadcast %cst_210 : bf16 to vector<64x256xbf16>
    %380 = vector.shape_cast %378 : vector<1x256xi1> to vector<1x256xi1>
    %381 = vector.broadcast %380 : vector<1x256xi1> to vector<64x256xi1>
    %382 = arith.select %381, %371, %379 : vector<64x256xi1>, vector<64x256xbf16>
    %c192_211 = arith.constant 192 : index
    %c0_212 = arith.constant 0 : index
    %383 = vector.load %arg13[%c192_211, %c0_212] : memref<864x256xbf16, #tpu.memory_space<vmem>>, vector<64x256xbf16>
    tpu.vector_store %arg13[%c192_211, %c0_212], %382 {strides = array<i32>} : memref<864x256xbf16, #tpu.memory_space<vmem>>, vector<64x256xbf16>,
    %c0_213 = arith.constant 0 : index
    %c128_214 = arith.constant 128 : index
    %384 = vector.load %arg15[%c0_213, %c128_214] : memref<64x512xbf16, #tpu.memory_space<vmem>>, vector<64x256xbf16>
    %c256 = arith.constant 256 : index
    %c0_215 = arith.constant 0 : index
    %385 = vector.load %arg13[%c256, %c0_215] : memref<864x256xbf16, #tpu.memory_space<vmem>>, vector<64x256xbf16>
    tpu.vector_store %arg13[%c256, %c0_215], %384 {strides = array<i32>} : memref<864x256xbf16, #tpu.memory_space<vmem>>, vector<64x256xbf16>,
    %c0_216 = arith.constant 0 : index
    %c129_217 = arith.constant 129 : index
    %386 = vector.load %arg15[%c0_216, %c129_217] : memref<64x512xbf16, #tpu.memory_space<vmem>>, vector<64x256xbf16>
    %c1_i32_218 = arith.constant 1 : i32
    %387 = vector.broadcast %c1_i32_218 : i32 to vector<1x256xi32>
    %388 = arith.addi %4, %387 : vector<1x256xi32>
    %c0_i32_219 = arith.constant 0 : i32
    %389 = vector.broadcast %c0_i32_219 : i32 to vector<1x256xi32>
    %390 = arith.cmpi sge, %388, %389 : vector<1x256xi32>
    %c16_i32_220 = arith.constant 16 : i32
    %391 = vector.broadcast %c16_i32_220 : i32 to vector<1x256xi32>
    %392 = arith.cmpi slt, %388, %391 : vector<1x256xi32>
    %393 = arith.andi %390, %392 : vector<1x256xi1>
    %cst_221 = arith.constant 0.000000e+00 : bf16
    %394 = vector.broadcast %cst_221 : bf16 to vector<64x256xbf16>
    %395 = vector.shape_cast %393 : vector<1x256xi1> to vector<1x256xi1>
    %396 = vector.broadcast %395 : vector<1x256xi1> to vector<64x256xi1>
    %397 = arith.select %396, %386, %394 : vector<64x256xi1>, vector<64x256xbf16>
    %c320 = arith.constant 320 : index
    %c0_222 = arith.constant 0 : index
    %398 = vector.load %arg13[%c320, %c0_222] : memref<864x256xbf16, #tpu.memory_space<vmem>>, vector<64x256xbf16>
    tpu.vector_store %arg13[%c320, %c0_222], %397 {strides = array<i32>} : memref<864x256xbf16, #tpu.memory_space<vmem>>, vector<64x256xbf16>,
    %c0_223 = arith.constant 0 : index
    %c143_224 = arith.constant 143 : index
    %399 = vector.load %arg15[%c0_223, %c143_224] : memref<64x512xbf16, #tpu.memory_space<vmem>>, vector<64x256xbf16>
    %c1_i32_225 = arith.constant 1 : i32
    %400 = vector.broadcast %c1_i32_225 : i32 to vector<1x256xi32>
    %401 = arith.addi %3, %400 : vector<1x256xi32>
    %c0_i32_226 = arith.constant 0 : i32
    %402 = vector.broadcast %c0_i32_226 : i32 to vector<1x256xi32>
    %403 = arith.cmpi sge, %401, %402 : vector<1x256xi32>
    %c16_i32_227 = arith.constant 16 : i32
    %404 = vector.broadcast %c16_i32_227 : i32 to vector<1x256xi32>
    %405 = arith.cmpi slt, %401, %404 : vector<1x256xi32>
    %406 = arith.andi %403, %405 : vector<1x256xi1>
    %c-1_i32_228 = arith.constant -1 : i32
    %407 = vector.broadcast %c-1_i32_228 : i32 to vector<1x256xi32>
    %408 = arith.addi %4, %407 : vector<1x256xi32>
    %c0_i32_229 = arith.constant 0 : i32
    %409 = vector.broadcast %c0_i32_229 : i32 to vector<1x256xi32>
    %410 = arith.cmpi sge, %408, %409 : vector<1x256xi32>
    %411 = arith.andi %406, %410 : vector<1x256xi1>
    %c16_i32_230 = arith.constant 16 : i32
    %412 = vector.broadcast %c16_i32_230 : i32 to vector<1x256xi32>
    %413 = arith.cmpi slt, %408, %412 : vector<1x256xi32>
    %414 = arith.andi %411, %413 : vector<1x256xi1>
    %cst_231 = arith.constant 0.000000e+00 : bf16
    %415 = vector.broadcast %cst_231 : bf16 to vector<64x256xbf16>
    %416 = vector.shape_cast %414 : vector<1x256xi1> to vector<1x256xi1>
    %417 = vector.broadcast %416 : vector<1x256xi1> to vector<64x256xi1>
    %418 = arith.select %417, %399, %415 : vector<64x256xi1>, vector<64x256xbf16>
    %c384_232 = arith.constant 384 : index
    %c0_233 = arith.constant 0 : index
    %419 = vector.load %arg13[%c384_232, %c0_233] : memref<864x256xbf16, #tpu.memory_space<vmem>>, vector<64x256xbf16>
    tpu.vector_store %arg13[%c384_232, %c0_233], %418 {strides = array<i32>} : memref<864x256xbf16, #tpu.memory_space<vmem>>, vector<64x256xbf16>,
    %c0_234 = arith.constant 0 : index
    %c144_235 = arith.constant 144 : index
    %420 = vector.load %arg15[%c0_234, %c144_235] : memref<64x512xbf16, #tpu.memory_space<vmem>>, vector<64x256xbf16>
    %c1_i32_236 = arith.constant 1 : i32
    %421 = vector.broadcast %c1_i32_236 : i32 to vector<1x256xi32>
    %422 = arith.addi %3, %421 : vector<1x256xi32>
    %c0_i32_237 = arith.constant 0 : i32
    %423 = vector.broadcast %c0_i32_237 : i32 to vector<1x256xi32>
    %424 = arith.cmpi sge, %422, %423 : vector<1x256xi32>
    %c16_i32_238 = arith.constant 16 : i32
    %425 = vector.broadcast %c16_i32_238 : i32 to vector<1x256xi32>
    %426 = arith.cmpi slt, %422, %425 : vector<1x256xi32>
    %427 = arith.andi %424, %426 : vector<1x256xi1>
    %cst_239 = arith.constant 0.000000e+00 : bf16
    %428 = vector.broadcast %cst_239 : bf16 to vector<64x256xbf16>
    %429 = vector.shape_cast %427 : vector<1x256xi1> to vector<1x256xi1>
    %430 = vector.broadcast %429 : vector<1x256xi1> to vector<64x256xi1>
    %431 = arith.select %430, %420, %428 : vector<64x256xi1>, vector<64x256xbf16>
    %c448 = arith.constant 448 : index
    %c0_240 = arith.constant 0 : index
    %432 = vector.load %arg13[%c448, %c0_240] : memref<864x256xbf16, #tpu.memory_space<vmem>>, vector<64x256xbf16>
    tpu.vector_store %arg13[%c448, %c0_240], %431 {strides = array<i32>} : memref<864x256xbf16, #tpu.memory_space<vmem>>, vector<64x256xbf16>,
    %c0_241 = arith.constant 0 : index
    %c145_242 = arith.constant 145 : index
    %433 = vector.load %arg15[%c0_241, %c145_242] : memref<64x512xbf16, #tpu.memory_space<vmem>>, vector<64x256xbf16>
    %c1_i32_243 = arith.constant 1 : i32
    %434 = vector.broadcast %c1_i32_243 : i32 to vector<1x256xi32>
    %435 = arith.addi %3, %434 : vector<1x256xi32>
    %c0_i32_244 = arith.constant 0 : i32
    %436 = vector.broadcast %c0_i32_244 : i32 to vector<1x256xi32>
    %437 = arith.cmpi sge, %435, %436 : vector<1x256xi32>
    %c16_i32_245 = arith.constant 16 : i32
    %438 = vector.broadcast %c16_i32_245 : i32 to vector<1x256xi32>
    %439 = arith.cmpi slt, %435, %438 : vector<1x256xi32>
    %440 = arith.andi %437, %439 : vector<1x256xi1>
    %c1_i32_246 = arith.constant 1 : i32
    %441 = vector.broadcast %c1_i32_246 : i32 to vector<1x256xi32>
    %442 = arith.addi %4, %441 : vector<1x256xi32>
    %c0_i32_247 = arith.constant 0 : i32
    %443 = vector.broadcast %c0_i32_247 : i32 to vector<1x256xi32>
    %444 = arith.cmpi sge, %442, %443 : vector<1x256xi32>
    %445 = arith.andi %440, %444 : vector<1x256xi1>
    %c16_i32_248 = arith.constant 16 : i32
    %446 = vector.broadcast %c16_i32_248 : i32 to vector<1x256xi32>
    %447 = arith.cmpi slt, %442, %446 : vector<1x256xi32>
    %448 = arith.andi %445, %447 : vector<1x256xi1>
    %cst_249 = arith.constant 0.000000e+00 : bf16
    %449 = vector.broadcast %cst_249 : bf16 to vector<64x256xbf16>
    %450 = vector.shape_cast %448 : vector<1x256xi1> to vector<1x256xi1>
    %451 = vector.broadcast %450 : vector<1x256xi1> to vector<64x256xi1>
    %452 = arith.select %451, %433, %449 : vector<64x256xi1>, vector<64x256xbf16>
    %c512 = arith.constant 512 : index
    %c0_250 = arith.constant 0 : index
    %453 = vector.load %arg13[%c512, %c0_250] : memref<864x256xbf16, #tpu.memory_space<vmem>>, vector<64x256xbf16>
    tpu.vector_store %arg13[%c512, %c0_250], %452 {strides = array<i32>} : memref<864x256xbf16, #tpu.memory_space<vmem>>, vector<64x256xbf16>,
    %c0_251 = arith.constant 0 : index
    %c0_252 = arith.constant 0 : index
    %454 = vector.load %arg8[%c0_251, %c0_252] : memref<32x576xbf16, #tpu.memory_space<vmem>>, vector<32x576xbf16>
    %c0_253 = arith.constant 0 : index
    %c0_254 = arith.constant 0 : index
    %455 = vector.load %arg13[%c0_253, %c0_254] : memref<864x256xbf16, #tpu.memory_space<vmem>>, vector<576x256xbf16>
    %cst_255 = arith.constant dense<0.000000e+00> : vector<32x256xf32>
    %456 = tpu.matmul %454, %455, %cst_255 {dimension_numbers = #tpu.dot_dimension_numbers<[1], [0], [0], [1], [0, 0, 1, 1], [], []>} : vector<32x576xbf16>, vector<576x256xbf16>, vector<32x256xf32> -> vector<32x256xf32>
    %c0_256 = arith.constant 0 : index
    %c0_257 = arith.constant 0 : index
    %457 = vector.load %arg9[%c0_256, %c0_257] : memref<32x1xf32, #tpu.memory_space<vmem>>, vector<32x1xf32>
    %458 = vector.broadcast %457 : vector<32x1xf32> to vector<32x256xf32>
    %459 = arith.addf %456, %458 : vector<32x256xf32>
    %cst_258 = arith.constant 0.000000e+00 : f32
    %460 = vector.broadcast %cst_258 : f32 to vector<32x256xf32>
    %461 = arith.cmpf ogt, %459, %460 : vector<32x256xf32>
    %cst_259 = arith.constant 2.000000e-01 : f32
    %462 = vector.broadcast %cst_259 : f32 to vector<32x256xf32>
    %463 = arith.mulf %462, %459 : vector<32x256xf32>
    %464 = arith.select %461, %459, %463 : vector<32x256xi1>, vector<32x256xf32>
    %465 = arith.truncf %464 : vector<32x256xf32> to vector<32x256xbf16>
    %c0_260 = arith.constant 0 : index
    %c128_261 = arith.constant 128 : index
    %466 = vector.load %arg14[%c0_260, %c128_261] : memref<96x512xbf16, #tpu.memory_space<vmem>>, vector<32x256xbf16>
    tpu.vector_store %arg14[%c0_260, %c128_261], %465 {strides = array<i32>} : memref<96x512xbf16, #tpu.memory_space<vmem>>, vector<32x256xbf16>,
    %c0_262 = arith.constant 0 : index
    %c111_263 = arith.constant 111 : index
    %467 = vector.load %arg14[%c0_262, %c111_263] : memref<96x512xbf16, #tpu.memory_space<vmem>>, vector<32x256xbf16>
    %c-1_i32_264 = arith.constant -1 : i32
    %468 = vector.broadcast %c-1_i32_264 : i32 to vector<1x256xi32>
    %469 = arith.addi %3, %468 : vector<1x256xi32>
    %c0_i32_265 = arith.constant 0 : i32
    %470 = vector.broadcast %c0_i32_265 : i32 to vector<1x256xi32>
    %471 = arith.cmpi sge, %469, %470 : vector<1x256xi32>
    %c16_i32_266 = arith.constant 16 : i32
    %472 = vector.broadcast %c16_i32_266 : i32 to vector<1x256xi32>
    %473 = arith.cmpi slt, %469, %472 : vector<1x256xi32>
    %474 = arith.andi %471, %473 : vector<1x256xi1>
    %c-1_i32_267 = arith.constant -1 : i32
    %475 = vector.broadcast %c-1_i32_267 : i32 to vector<1x256xi32>
    %476 = arith.addi %4, %475 : vector<1x256xi32>
    %c0_i32_268 = arith.constant 0 : i32
    %477 = vector.broadcast %c0_i32_268 : i32 to vector<1x256xi32>
    %478 = arith.cmpi sge, %476, %477 : vector<1x256xi32>
    %479 = arith.andi %474, %478 : vector<1x256xi1>
    %c16_i32_269 = arith.constant 16 : i32
    %480 = vector.broadcast %c16_i32_269 : i32 to vector<1x256xi32>
    %481 = arith.cmpi slt, %476, %480 : vector<1x256xi32>
    %482 = arith.andi %479, %481 : vector<1x256xi1>
    %cst_270 = arith.constant 0.000000e+00 : bf16
    %483 = vector.broadcast %cst_270 : bf16 to vector<32x256xbf16>
    %484 = vector.shape_cast %482 : vector<1x256xi1> to vector<1x256xi1>
    %485 = vector.broadcast %484 : vector<1x256xi1> to vector<32x256xi1>
    %486 = arith.select %485, %467, %483 : vector<32x256xi1>, vector<32x256xbf16>
    %c0_271 = arith.constant 0 : index
    %c0_272 = arith.constant 0 : index
    %487 = vector.load %arg13[%c0_271, %c0_272] : memref<864x256xbf16, #tpu.memory_space<vmem>>, vector<32x256xbf16>
    tpu.vector_store %arg13[%c0_271, %c0_272], %486 {strides = array<i32>} : memref<864x256xbf16, #tpu.memory_space<vmem>>, vector<32x256xbf16>,
    %c0_273 = arith.constant 0 : index
    %c112_274 = arith.constant 112 : index
    %488 = vector.load %arg14[%c0_273, %c112_274] : memref<96x512xbf16, #tpu.memory_space<vmem>>, vector<32x256xbf16>
    %c-1_i32_275 = arith.constant -1 : i32
    %489 = vector.broadcast %c-1_i32_275 : i32 to vector<1x256xi32>
    %490 = arith.addi %3, %489 : vector<1x256xi32>
    %c0_i32_276 = arith.constant 0 : i32
    %491 = vector.broadcast %c0_i32_276 : i32 to vector<1x256xi32>
    %492 = arith.cmpi sge, %490, %491 : vector<1x256xi32>
    %c16_i32_277 = arith.constant 16 : i32
    %493 = vector.broadcast %c16_i32_277 : i32 to vector<1x256xi32>
    %494 = arith.cmpi slt, %490, %493 : vector<1x256xi32>
    %495 = arith.andi %492, %494 : vector<1x256xi1>
    %cst_278 = arith.constant 0.000000e+00 : bf16
    %496 = vector.broadcast %cst_278 : bf16 to vector<32x256xbf16>
    %497 = vector.shape_cast %495 : vector<1x256xi1> to vector<1x256xi1>
    %498 = vector.broadcast %497 : vector<1x256xi1> to vector<32x256xi1>
    %499 = arith.select %498, %488, %496 : vector<32x256xi1>, vector<32x256xbf16>
    %c32_279 = arith.constant 32 : index
    %c0_280 = arith.constant 0 : index
    %500 = vector.load %arg13[%c32_279, %c0_280] : memref<864x256xbf16, #tpu.memory_space<vmem>>, vector<32x256xbf16>
    tpu.vector_store %arg13[%c32_279, %c0_280], %499 {strides = array<i32>} : memref<864x256xbf16, #tpu.memory_space<vmem>>, vector<32x256xbf16>,
    %c0_281 = arith.constant 0 : index
    %c113_282 = arith.constant 113 : index
    %501 = vector.load %arg14[%c0_281, %c113_282] : memref<96x512xbf16, #tpu.memory_space<vmem>>, vector<32x256xbf16>
    %c-1_i32_283 = arith.constant -1 : i32
    %502 = vector.broadcast %c-1_i32_283 : i32 to vector<1x256xi32>
    %503 = arith.addi %3, %502 : vector<1x256xi32>
    %c0_i32_284 = arith.constant 0 : i32
    %504 = vector.broadcast %c0_i32_284 : i32 to vector<1x256xi32>
    %505 = arith.cmpi sge, %503, %504 : vector<1x256xi32>
    %c16_i32_285 = arith.constant 16 : i32
    %506 = vector.broadcast %c16_i32_285 : i32 to vector<1x256xi32>
    %507 = arith.cmpi slt, %503, %506 : vector<1x256xi32>
    %508 = arith.andi %505, %507 : vector<1x256xi1>
    %c1_i32_286 = arith.constant 1 : i32
    %509 = vector.broadcast %c1_i32_286 : i32 to vector<1x256xi32>
    %510 = arith.addi %4, %509 : vector<1x256xi32>
    %c0_i32_287 = arith.constant 0 : i32
    %511 = vector.broadcast %c0_i32_287 : i32 to vector<1x256xi32>
    %512 = arith.cmpi sge, %510, %511 : vector<1x256xi32>
    %513 = arith.andi %508, %512 : vector<1x256xi1>
    %c16_i32_288 = arith.constant 16 : i32
    %514 = vector.broadcast %c16_i32_288 : i32 to vector<1x256xi32>
    %515 = arith.cmpi slt, %510, %514 : vector<1x256xi32>
    %516 = arith.andi %513, %515 : vector<1x256xi1>
    %cst_289 = arith.constant 0.000000e+00 : bf16
    %517 = vector.broadcast %cst_289 : bf16 to vector<32x256xbf16>
    %518 = vector.shape_cast %516 : vector<1x256xi1> to vector<1x256xi1>
    %519 = vector.broadcast %518 : vector<1x256xi1> to vector<32x256xi1>
    %520 = arith.select %519, %501, %517 : vector<32x256xi1>, vector<32x256xbf16>
    %c64_290 = arith.constant 64 : index
    %c0_291 = arith.constant 0 : index
    %521 = vector.load %arg13[%c64_290, %c0_291] : memref<864x256xbf16, #tpu.memory_space<vmem>>, vector<32x256xbf16>
    tpu.vector_store %arg13[%c64_290, %c0_291], %520 {strides = array<i32>} : memref<864x256xbf16, #tpu.memory_space<vmem>>, vector<32x256xbf16>,
    %c0_292 = arith.constant 0 : index
    %c127_293 = arith.constant 127 : index
    %522 = vector.load %arg14[%c0_292, %c127_293] : memref<96x512xbf16, #tpu.memory_space<vmem>>, vector<32x256xbf16>
    %c-1_i32_294 = arith.constant -1 : i32
    %523 = vector.broadcast %c-1_i32_294 : i32 to vector<1x256xi32>
    %524 = arith.addi %4, %523 : vector<1x256xi32>
    %c0_i32_295 = arith.constant 0 : i32
    %525 = vector.broadcast %c0_i32_295 : i32 to vector<1x256xi32>
    %526 = arith.cmpi sge, %524, %525 : vector<1x256xi32>
    %c16_i32_296 = arith.constant 16 : i32
    %527 = vector.broadcast %c16_i32_296 : i32 to vector<1x256xi32>
    %528 = arith.cmpi slt, %524, %527 : vector<1x256xi32>
    %529 = arith.andi %526, %528 : vector<1x256xi1>
    %cst_297 = arith.constant 0.000000e+00 : bf16
    %530 = vector.broadcast %cst_297 : bf16 to vector<32x256xbf16>
    %531 = vector.shape_cast %529 : vector<1x256xi1> to vector<1x256xi1>
    %532 = vector.broadcast %531 : vector<1x256xi1> to vector<32x256xi1>
    %533 = arith.select %532, %522, %530 : vector<32x256xi1>, vector<32x256xbf16>
    %c96_298 = arith.constant 96 : index
    %c0_299 = arith.constant 0 : index
    %534 = vector.load %arg13[%c96_298, %c0_299] : memref<864x256xbf16, #tpu.memory_space<vmem>>, vector<32x256xbf16>
    tpu.vector_store %arg13[%c96_298, %c0_299], %533 {strides = array<i32>} : memref<864x256xbf16, #tpu.memory_space<vmem>>, vector<32x256xbf16>,
    %c0_300 = arith.constant 0 : index
    %c128_301 = arith.constant 128 : index
    %535 = vector.load %arg14[%c0_300, %c128_301] : memref<96x512xbf16, #tpu.memory_space<vmem>>, vector<32x256xbf16>
    %c128_302 = arith.constant 128 : index
    %c0_303 = arith.constant 0 : index
    %536 = vector.load %arg13[%c128_302, %c0_303] : memref<864x256xbf16, #tpu.memory_space<vmem>>, vector<32x256xbf16>
    tpu.vector_store %arg13[%c128_302, %c0_303], %535 {strides = array<i32>} : memref<864x256xbf16, #tpu.memory_space<vmem>>, vector<32x256xbf16>,
    %c0_304 = arith.constant 0 : index
    %c129_305 = arith.constant 129 : index
    %537 = vector.load %arg14[%c0_304, %c129_305] : memref<96x512xbf16, #tpu.memory_space<vmem>>, vector<32x256xbf16>
    %c1_i32_306 = arith.constant 1 : i32
    %538 = vector.broadcast %c1_i32_306 : i32 to vector<1x256xi32>
    %539 = arith.addi %4, %538 : vector<1x256xi32>
    %c0_i32_307 = arith.constant 0 : i32
    %540 = vector.broadcast %c0_i32_307 : i32 to vector<1x256xi32>
    %541 = arith.cmpi sge, %539, %540 : vector<1x256xi32>
    %c16_i32_308 = arith.constant 16 : i32
    %542 = vector.broadcast %c16_i32_308 : i32 to vector<1x256xi32>
    %543 = arith.cmpi slt, %539, %542 : vector<1x256xi32>
    %544 = arith.andi %541, %543 : vector<1x256xi1>
    %cst_309 = arith.constant 0.000000e+00 : bf16
    %545 = vector.broadcast %cst_309 : bf16 to vector<32x256xbf16>
    %546 = vector.shape_cast %544 : vector<1x256xi1> to vector<1x256xi1>
    %547 = vector.broadcast %546 : vector<1x256xi1> to vector<32x256xi1>
    %548 = arith.select %547, %537, %545 : vector<32x256xi1>, vector<32x256xbf16>
    %c160 = arith.constant 160 : index
    %c0_310 = arith.constant 0 : index
    %549 = vector.load %arg13[%c160, %c0_310] : memref<864x256xbf16, #tpu.memory_space<vmem>>, vector<32x256xbf16>
    tpu.vector_store %arg13[%c160, %c0_310], %548 {strides = array<i32>} : memref<864x256xbf16, #tpu.memory_space<vmem>>, vector<32x256xbf16>,
    %c0_311 = arith.constant 0 : index
    %c143_312 = arith.constant 143 : index
    %550 = vector.load %arg14[%c0_311, %c143_312] : memref<96x512xbf16, #tpu.memory_space<vmem>>, vector<32x256xbf16>
    %c1_i32_313 = arith.constant 1 : i32
    %551 = vector.broadcast %c1_i32_313 : i32 to vector<1x256xi32>
    %552 = arith.addi %3, %551 : vector<1x256xi32>
    %c0_i32_314 = arith.constant 0 : i32
    %553 = vector.broadcast %c0_i32_314 : i32 to vector<1x256xi32>
    %554 = arith.cmpi sge, %552, %553 : vector<1x256xi32>
    %c16_i32_315 = arith.constant 16 : i32
    %555 = vector.broadcast %c16_i32_315 : i32 to vector<1x256xi32>
    %556 = arith.cmpi slt, %552, %555 : vector<1x256xi32>
    %557 = arith.andi %554, %556 : vector<1x256xi1>
    %c-1_i32_316 = arith.constant -1 : i32
    %558 = vector.broadcast %c-1_i32_316 : i32 to vector<1x256xi32>
    %559 = arith.addi %4, %558 : vector<1x256xi32>
    %c0_i32_317 = arith.constant 0 : i32
    %560 = vector.broadcast %c0_i32_317 : i32 to vector<1x256xi32>
    %561 = arith.cmpi sge, %559, %560 : vector<1x256xi32>
    %562 = arith.andi %557, %561 : vector<1x256xi1>
    %c16_i32_318 = arith.constant 16 : i32
    %563 = vector.broadcast %c16_i32_318 : i32 to vector<1x256xi32>
    %564 = arith.cmpi slt, %559, %563 : vector<1x256xi32>
    %565 = arith.andi %562, %564 : vector<1x256xi1>
    %cst_319 = arith.constant 0.000000e+00 : bf16
    %566 = vector.broadcast %cst_319 : bf16 to vector<32x256xbf16>
    %567 = vector.shape_cast %565 : vector<1x256xi1> to vector<1x256xi1>
    %568 = vector.broadcast %567 : vector<1x256xi1> to vector<32x256xi1>
    %569 = arith.select %568, %550, %566 : vector<32x256xi1>, vector<32x256xbf16>
    %c192_320 = arith.constant 192 : index
    %c0_321 = arith.constant 0 : index
    %570 = vector.load %arg13[%c192_320, %c0_321] : memref<864x256xbf16, #tpu.memory_space<vmem>>, vector<32x256xbf16>
    tpu.vector_store %arg13[%c192_320, %c0_321], %569 {strides = array<i32>} : memref<864x256xbf16, #tpu.memory_space<vmem>>, vector<32x256xbf16>,
    %c0_322 = arith.constant 0 : index
    %c144_323 = arith.constant 144 : index
    %571 = vector.load %arg14[%c0_322, %c144_323] : memref<96x512xbf16, #tpu.memory_space<vmem>>, vector<32x256xbf16>
    %c1_i32_324 = arith.constant 1 : i32
    %572 = vector.broadcast %c1_i32_324 : i32 to vector<1x256xi32>
    %573 = arith.addi %3, %572 : vector<1x256xi32>
    %c0_i32_325 = arith.constant 0 : i32
    %574 = vector.broadcast %c0_i32_325 : i32 to vector<1x256xi32>
    %575 = arith.cmpi sge, %573, %574 : vector<1x256xi32>
    %c16_i32_326 = arith.constant 16 : i32
    %576 = vector.broadcast %c16_i32_326 : i32 to vector<1x256xi32>
    %577 = arith.cmpi slt, %573, %576 : vector<1x256xi32>
    %578 = arith.andi %575, %577 : vector<1x256xi1>
    %cst_327 = arith.constant 0.000000e+00 : bf16
    %579 = vector.broadcast %cst_327 : bf16 to vector<32x256xbf16>
    %580 = vector.shape_cast %578 : vector<1x256xi1> to vector<1x256xi1>
    %581 = vector.broadcast %580 : vector<1x256xi1> to vector<32x256xi1>
    %582 = arith.select %581, %571, %579 : vector<32x256xi1>, vector<32x256xbf16>
    %c224 = arith.constant 224 : index
    %c0_328 = arith.constant 0 : index
    %583 = vector.load %arg13[%c224, %c0_328] : memref<864x256xbf16, #tpu.memory_space<vmem>>, vector<32x256xbf16>
    tpu.vector_store %arg13[%c224, %c0_328], %582 {strides = array<i32>} : memref<864x256xbf16, #tpu.memory_space<vmem>>, vector<32x256xbf16>,
    %c0_329 = arith.constant 0 : index
    %c145_330 = arith.constant 145 : index
    %584 = vector.load %arg14[%c0_329, %c145_330] : memref<96x512xbf16, #tpu.memory_space<vmem>>, vector<32x256xbf16>
    %c1_i32_331 = arith.constant 1 : i32
    %585 = vector.broadcast %c1_i32_331 : i32 to vector<1x256xi32>
    %586 = arith.addi %3, %585 : vector<1x256xi32>
    %c0_i32_332 = arith.constant 0 : i32
    %587 = vector.broadcast %c0_i32_332 : i32 to vector<1x256xi32>
    %588 = arith.cmpi sge, %586, %587 : vector<1x256xi32>
    %c16_i32_333 = arith.constant 16 : i32
    %589 = vector.broadcast %c16_i32_333 : i32 to vector<1x256xi32>
    %590 = arith.cmpi slt, %586, %589 : vector<1x256xi32>
    %591 = arith.andi %588, %590 : vector<1x256xi1>
    %c1_i32_334 = arith.constant 1 : i32
    %592 = vector.broadcast %c1_i32_334 : i32 to vector<1x256xi32>
    %593 = arith.addi %4, %592 : vector<1x256xi32>
    %c0_i32_335 = arith.constant 0 : i32
    %594 = vector.broadcast %c0_i32_335 : i32 to vector<1x256xi32>
    %595 = arith.cmpi sge, %593, %594 : vector<1x256xi32>
    %596 = arith.andi %591, %595 : vector<1x256xi1>
    %c16_i32_336 = arith.constant 16 : i32
    %597 = vector.broadcast %c16_i32_336 : i32 to vector<1x256xi32>
    %598 = arith.cmpi slt, %593, %597 : vector<1x256xi32>
    %599 = arith.andi %596, %598 : vector<1x256xi1>
    %cst_337 = arith.constant 0.000000e+00 : bf16
    %600 = vector.broadcast %cst_337 : bf16 to vector<32x256xbf16>
    %601 = vector.shape_cast %599 : vector<1x256xi1> to vector<1x256xi1>
    %602 = vector.broadcast %601 : vector<1x256xi1> to vector<32x256xi1>
    %603 = arith.select %602, %584, %600 : vector<32x256xi1>, vector<32x256xbf16>
    %c256_338 = arith.constant 256 : index
    %c0_339 = arith.constant 0 : index
    %604 = vector.load %arg13[%c256_338, %c0_339] : memref<864x256xbf16, #tpu.memory_space<vmem>>, vector<32x256xbf16>
    tpu.vector_store %arg13[%c256_338, %c0_339], %603 {strides = array<i32>} : memref<864x256xbf16, #tpu.memory_space<vmem>>, vector<32x256xbf16>,
    %c0_340 = arith.constant 0 : index
    %c0_341 = arith.constant 0 : index
    %605 = vector.load %arg10[%c0_340, %c0_341] : memref<8x288xbf16, #tpu.memory_space<vmem>>, vector<8x288xbf16>
    %c0_342 = arith.constant 0 : index
    %c0_343 = arith.constant 0 : index
    %606 = vector.load %arg13[%c0_342, %c0_343] : memref<864x256xbf16, #tpu.memory_space<vmem>>, vector<288x256xbf16>
    %cst_344 = arith.constant dense<0.000000e+00> : vector<8x256xf32>
    %607 = tpu.matmul %605, %606, %cst_344 {dimension_numbers = #tpu.dot_dimension_numbers<[1], [0], [0], [1], [0, 0, 1, 1], [], []>} : vector<8x288xbf16>, vector<288x256xbf16>, vector<8x256xf32> -> vector<8x256xf32>
    %c0_345 = arith.constant 0 : index
    %c0_346 = arith.constant 0 : index
    %608 = vector.load %arg11[%c0_345, %c0_346] : memref<8x1xf32, #tpu.memory_space<vmem>>, vector<8x1xf32>
    %609 = vector.broadcast %608 : vector<8x1xf32> to vector<8x256xf32>
    %610 = arith.addf %607, %609 : vector<8x256xf32>
    %611 = vector.extract_strided_slice %610 {offsets = [0, 64], sizes = [8, 128], strides = [1, 1]} : vector<8x256xf32> to vector<8x128xf32>
    %c0_347 = arith.constant 0 : index
    %c0_348 = arith.constant 0 : index
    %c0_349 = arith.constant 0 : index
    %c0_350 = arith.constant 0 : index
    %612 = vector.load %arg12[%c0_347, %c0_348, %c0_349, %c0_350] : memref<1x1x8x128xf32, #tpu.memory_space<vmem>>, vector<1x1x8x128xf32>
    %613 = vector.shape_cast %612 : vector<1x1x8x128xf32> to vector<8x128xf32>
    %614 = vector.shape_cast %611 : vector<8x128xf32> to vector<1x1x8x128xf32>
    tpu.vector_store %arg12[%c0_347, %c0_348, %c0_349, %c0_350], %614 {strides = array<i32>} : memref<1x1x8x128xf32, #tpu.memory_space<vmem>>, vector<1x1x8x128xf32>,
    return
  }
  func.func @transform_0(%arg0: i32, %arg1: i32) -> (i32, i32, i32, i32) {
    %c0_i32 = arith.constant 0 : i32
    %c0_i32_0 = arith.constant 0 : i32
    %c0_i32_1 = arith.constant 0 : i32
    return %arg0, %arg1, %c0_i32, %c0_i32_0 : i32, i32, i32, i32
  }
  func.func @transform_1(%arg0: i32, %arg1: i32) -> (i32, i32) {
    %c0_i32 = arith.constant 0 : i32
    %c0_i32_0 = arith.constant 0 : i32
    %c0_i32_1 = arith.constant 0 : i32
    return %c0_i32, %c0_i32_0 : i32, i32
  }
  func.func @transform_2(%arg0: i32, %arg1: i32) -> (i32, i32) {
    %c0_i32 = arith.constant 0 : i32
    %c0_i32_0 = arith.constant 0 : i32
    %c0_i32_1 = arith.constant 0 : i32
    return %c0_i32, %c0_i32_0 : i32, i32
  }
  func.func @transform_3(%arg0: i32, %arg1: i32) -> (i32, i32) {
    %c0_i32 = arith.constant 0 : i32
    %c0_i32_0 = arith.constant 0 : i32
    %c0_i32_1 = arith.constant 0 : i32
    return %c0_i32, %c0_i32_0 : i32, i32
  }
  func.func @transform_4(%arg0: i32, %arg1: i32) -> (i32, i32) {
    %c0_i32 = arith.constant 0 : i32
    %c0_i32_0 = arith.constant 0 : i32
    %c0_i32_1 = arith.constant 0 : i32
    return %c0_i32, %c0_i32_0 : i32, i32
  }
  func.func @transform_5(%arg0: i32, %arg1: i32) -> (i32, i32) {
    %c0_i32 = arith.constant 0 : i32
    %c0_i32_0 = arith.constant 0 : i32
    %c0_i32_1 = arith.constant 0 : i32
    return %c0_i32, %c0_i32_0 : i32, i32
  }
  func.func @transform_6(%arg0: i32, %arg1: i32) -> (i32, i32) {
    %c0_i32 = arith.constant 0 : i32
    %c0_i32_0 = arith.constant 0 : i32
    %c0_i32_1 = arith.constant 0 : i32
    return %c0_i32, %c0_i32_0 : i32, i32
  }
  func.func @transform_7(%arg0: i32, %arg1: i32) -> (i32, i32) {
    %c0_i32 = arith.constant 0 : i32
    %c0_i32_0 = arith.constant 0 : i32
    %c0_i32_1 = arith.constant 0 : i32
    return %c0_i32, %c0_i32_0 : i32, i32
  }
  func.func @transform_8(%arg0: i32, %arg1: i32) -> (i32, i32) {
    %c0_i32 = arith.constant 0 : i32
    %c0_i32_0 = arith.constant 0 : i32
    %c0_i32_1 = arith.constant 0 : i32
    return %c0_i32, %c0_i32_0 : i32, i32
  }
  func.func @transform_9(%arg0: i32, %arg1: i32) -> (i32, i32) {
    %c0_i32 = arith.constant 0 : i32
    %c0_i32_0 = arith.constant 0 : i32
    %c0_i32_1 = arith.constant 0 : i32
    return %c0_i32, %c0_i32_0 : i32, i32
  }
  func.func @transform_10(%arg0: i32, %arg1: i32) -> (i32, i32, i32, i32) {
    %c0_i32 = arith.constant 0 : i32
    %c0_i32_0 = arith.constant 0 : i32
    %c0_i32_1 = arith.constant 0 : i32
    return %arg0, %arg1, %c0_i32, %c0_i32_0 : i32, i32, i32, i32
  }
}

</mosaic_0001>

<bundles_post_ra>
// kernel: tpu_custom_call.1
= control target key start
LH: loop header
LB: loop body
LE: loop exit
PB: predicated region body
PF: predicated region fallthrough
CT: control target
= control target key end

     0   :  { %s8119_s0 = inlined_call_operand.hbm [shape: bf16[2,2,16,512], index: 0, kind: input, shape index: {}]   ;;  %s8120_s1 = inlined_call_operand.hbm [shape: s32[2,256], index: 1, kind: input, shape index: {}]   ;;  %s8121_s2 = inlined_call_operand.vmem [shape: bf16[96,144], index: 2, kind: input, shape index: {}]   ;;  %s8122_s3 = inlined_call_operand.vmem [shape: f32[96,1], index: 3, kind: input, shape index: {}]   ;;  %s8123_s4 = inlined_call_operand.vmem [shape: bf16[64,864], index: 4, kind: input, shape index: {}]   ;;  %s8124_s5 = inlined_call_operand.vmem [shape: f32[64,1], index: 5, kind: input, shape index: {}]   ;;  %s8125_s6 = inlined_call_operand.vmem [shape: bf16[32,576], index: 6, kind: input, shape index: {}]   ;;  %s8126_s7 = inlined_call_operand.vmem [shape: f32[32,1], index: 7, kind: input, shape index: {}]   ;;  %s8127_s8 = inlined_call_operand.vmem [shape: bf16[8,288], index: 8, kind: input, shape index: {}]   ;;  %s8128_s9 = inlined_call_operand.vmem [shape: f32[8,1], index: 9, kind: input, shape index: {}]   ;;  %s8129_s10 = inlined_call_operand.hbm [shape: f32[2,2,8,128], index: 10, kind: output, shape index: {}]  }
   0x1   :  { %8195 = sst [smem:[#allocation31_spill]] %s8120_s1 }
   0x2   :  { %8196 = sst [smem:[#allocation32_spill]] %s8126_s7 }
   0x3   :  { %8197 = sst [smem:[#allocation33_spill]] %s8127_s8 }
   0x4   :  { %8198 = sst [smem:[#allocation34_spill]] %s8128_s9 }
   0x5   :  { %8199 = sst [smem:[#allocation35_spill]] %s8129_s10 }
   0x6   :  { %15 = vsyncpa [#allocation6], 0 }
   0x7   :  { %17 = vsyncpa [#allocation6 + $0x1], 0 }
   0x8   :  { %18 = vsyncpa [#allocation9], 0 }
   0x9   :  { %19 = vsyncpa [#allocation7], 0 }
   0xa   :  { %21 = vsyncpa [#allocation7 + $0x1], 0  ;;  %s5367_s13 = smov 0   ;;  %s5369_s14 = smov 0  }
   0xb   :  { %s5371_s15 = smov 0   ;;  %s5373_s16 = smov 0  }
   0xc   :  { %s5375_s17 = smov 0   ;;  %s5377_s18 = smov 0  }
   0xd   :  { %s5379_s19 = smov 0   ;;  %s5381_s20 = smov 0  }
   0xe LB: > { %8200 = sst [smem:[#allocation14_spill]] %s5267_s13  ;;  %s4750_s21 = sadd.s32 4294967295, %s5295_s20   ;;  %s5295_s20 = sphi %s5381_s20, %s27_s20   ;;  %s5291_s19 = sphi %s5379_s19, %s8498_s19   ;;  %s5287_s18 = sphi %s5377_s18, %s8497_s18   ;;  %s5283_s17 = sphi %s5375_s17, %s8496_s17   ;;  %s5279_s16 = sphi %s5373_s16, %s8491_s16   ;;  %s5275_s15 = sphi %s5371_s15, %s8495_s15   ;;  %s5271_s14 = sphi %s5369_s14, %s8494_s14   ;;  %s5267_s13 = sphi %s5367_s13, %s8493_s13  }
   0xf   : > { %8201 = sst [smem:[#allocation15_spill]] %s5283_s17  ;;  %s4751_s22 = sadd.s32 4294967294, %s5295_s20  }
  0x10   : > { %8202 = sst [smem:[#allocation16_spill]] %s5287_s18  ;;  %p55_p0 = scmp.ne.s32.totalorder %s5275_s15, %s5271_s14 }
  0x11   : > { %8203 = sst [smem:[#allocation17_spill]] %s5295_s20  ;;  %p56_p1 = scmp.eq.s32.totalorder %s5295_s20, 0 }
  0x12   : > { %p61_p2 = scmp.ne.s32.totalorder %s5271_s14, %s5267_s13  ;;  %p5415_p3 = scmp.eq.s32.totalorder %s4750_s21, 0 }
  0x13   : > { %p276_p4 = scmp.eq.s32.totalorder %s4750_s21, 3  ;;  %p5419_p5 = por %p56_p1, %p55_p0 }
  0x14   : > { %s8204_s24 = scalar_select %p5415_p3, 1, 0 }
  0x15   : > { %p282_p6 = scmp.eq.s32.totalorder %s4751_s22, 3  ;;  %p5425_p7 = por %p5415_p3, %p61_p2 }
  0x16   : > { %p5429_p8 = por %p276_p4, %p55_p0  ;;  %p4752_p10 = scmp.ge.s32.totalorder %s5295_s20, 1 }
  0x17   : > { %s8206_s26 = scalar_select %p5425_p7, 1, 0 }
  0x18   : > { %s8207_s27 = scalar_select %p5429_p8, 1, 0 }
  0x19   : > { %p5433_p9 = por %p282_p6, %p61_p2  ;;  %p289_p11 = scmp.lt.s32.totalorder %s5295_s20, 5 }
  0x1a   : > { %8208 = sst [smem:[#allocation18_spill]] %s8207_s27  ;;  %s5297_s30 = smov [#allocation8]  }
  0x1b   : > { %s8209_s28 = scalar_select %p5433_p9, 1, 0 }
  0x1c   : > { %p5439_p12 = pnand %p4752_p10, %p289_p11  ;;  %s302_s11 = sshll.u32 %s5297_s30, 4  ;;  %s303_s11 = int_to_ptr.vmem [resolvable:$true] %s302_s11 }
  0x1d   : > { %8210 = sst [smem:[#allocation19_spill]] %s8209_s28  ;;  %p4976_p13 = scmp.lt.s32.totalorder %s5295_s20, 4 }
  0x1e   : > { %s8211_s29 = scalar_select %p5439_p12, 1, 0 }
  0x1f   : > { %p4963_p0 = pneg %p5439_p12  ;;  %p5448_p1 = pnand %p4976_p13, %p5419_p5 }
  0x20   : > { %s36_s22 = sadd.s32 1, %s5287_s18  ;;  %s8214_s1 = sld [smem:[#allocation31_spill]] }
  0x21   : > { %s8212_s12 = scalar_select %p5448_p1, 1, 0 }
  0x22   : > { %p5454_p2 = pnand %p4963_p0, %p5415_p3 }
  0x24   : > { %p5137_p5 = pneg %p5454_p2 }
  0x26   : > { %s5135_s30 = scalar_lea.hbm %s8214_s1, 64 }
  0x27   : > { %p5136_p4 = scmp.ne.s32.totalorder %s8214_s1, %s5135_s30  ;;  %p5142_p11 = scmp.lt.u32.totalorder %s5135_s30, %s8214_s1 }
  0x29   : > { %p5138_p6 = pnand %p5137_p5, %p5136_p4 }
  0x2b   : > { %p5139_p10 = pneg %p5138_p6 }
  0x2d   : > { %p5144_p13 = pnand %p5142_p11, %p5139_p10 }
  0x2f   : > { %5147 = shalt.err (!%p5144_p13)
}
  0x30   : > { %s5148_s27 = scalar_lea.vmem %s303_s11, 64  ;;  %p5156_p3 = scmp.lt.s32.totalorder %s303_s11, %s303_s11 }
  0x31   : > { %p5149_p0 = scmp.ne.s32.totalorder %s303_s11, %s5148_s27  ;;  %p5157_p7 = scmp.lt.s32.totalorder %s5148_s27, %s5148_s27 }
  0x33   : > { %p5151_p9 = pnand %p5149_p0, %p5137_p5  ;;  %p5158_p12 = por %p5157_p7, %p5156_p3 }
  0x35   : > { %p5152_p8 = pneg %p5151_p9 }
  0x37   : > { %p5159_p1 = pnand %p5158_p12, %p5152_p8 }
  0x39   : > { %5162 = shalt.err (!%p5159_p1)
}
  0x3a   : > { %4966 = dma.hbm_to_vmem [thread:$0]  (!%p5454_p2), %s8214_s1, 64, %s303_s11, [#allocation9]  }
  0x3b   : > { %p37_p4 = scmp.ge.s32.totalorder %s36_s22, 2  ;;  %s39_s10 = sadd.s32 1, %s5291_s19 }
  0x3c   : > { %s337_s23 = sand.u32 1, %s5275_s15   ;;  %s4756_s27 = sshll.u32 %s5287_s18, 3 }
  0x3d   : > { %s8500_s22 = smov (%p37_p4, %s36_s22), 0  ;;  %s8502_s10 = smov (!%p37_p4, %s39_s10), %s5291_s19 }
  0x3e   : > { %8215 = sst [smem:[#allocation20_spill]] %s8500_s22  ;;  %s44_s28 = ssub.s32 %s5287_s18, %s8500_s22 }
  0x3f   : > { %p41_p3 = scmp.ge.s32.totalorder %s8502_s10, 2  ;;  %s4755_s21 = sshll.u32 %s337_s23, 5 }
  0x40   : > { %s4757_s30 = sshll.u32 %s5291_s19, 4  ;;  %s341_s25 = scalar_lea.vmem [#allocation5], %s4755_s21 }
  0x41   : > { %s8504_s10 = smov (%p41_p3, %s8502_s10), 0  ;;  %s347_s11 = sadd.s32 %s4757_s30, %s4756_s27 }
  0x42   : > { %s350_s13 = sshll.u32 %s341_s25, 4  ;;  %s43_s20 = ssub.s32 %s5291_s19, %s8504_s10  ;;  %s5493_s13 = int_to_ptr.vmem [resolvable:$true] %s350_s13 }
  0x43   : > { %s4758_s1 = sshll.u32 %s347_s11, 6  ;;  %s45_s17 = sor.u32 %s44_s28, %s43_s20 }
  0x44   : > { %s5491_s7 = scalar_lea.hbm %s8119_s0, %s4758_s1  ;;  %p46_p7 = scmp.eq.s32.totalorder %s45_s17, 0 }
  0x45   : > { %s8216_s22 = sadd.s32 1, %s5275_s15  ;;  %s5500_s27 = scalar_lea.sflag [#allocation6], %s337_s23 }
  0x46   : > { %s5498_s18 = scalar_select %p46_p7, %s5275_s15, %s8216_s22  }
  0x47   : > { %s5163_s21 = scalar_lea.hbm %s5491_s7, 512  ;;  %p8217_p9 = scmp.ne.s32.totalorder %s8212_s12, 0 }
  0x48   : > { %p5164_p8 = scmp.ne.s32.totalorder %s5491_s7, %s5163_s21  ;;  %s5168_s9 = scalar_lea.hbm %s8119_s0, 2048 }
  0x49   : > { %p5165_p12 = pneg %p8217_p9  ;;  %p5169_p5 = scmp.lt.u32.totalorder %s5491_s7, %s8119_s0 }
  0x4a   : > { %p5170_p6 = scmp.lt.u32.totalorder %s5168_s9, %s5163_s21  ;;  %p5172_p11 = scmp.lt.u32.totalorder %s5163_s21, %s5491_s7 }
  0x4b   : > { %p5166_p1 = pnand %p5165_p12, %p5164_p8 }
  0x4c   : > { %p5171_p10 = por %p5170_p6, %p5169_p5 }
  0x4d   : > { %p5167_p2 = pneg %p5166_p1 }
  0x4e   : > { %p5173_p13 = por %p5172_p11, %p5171_p10 }
  0x50   : > { %p5174_p0 = pnand %p5173_p13, %p5167_p2 }
  0x52   : > { %5177 = shalt.err (!%p5174_p0)
}
  0x53   : > { %s5178_s22 = scalar_lea.vmem %s5493_s13, 512  ;;  %s5298_s23 = smov [#allocation5]  }
  0x54   : > { %p5179_p4 = scmp.ne.s32.totalorder %s5493_s13, %s5178_s22  ;;  %s5183_s30 = sshll.u32 %s5298_s23, 4  ;;  %s5184_s30 = int_to_ptr.vmem [resolvable:$false] %s5183_s30 }
  0x55   : > { %s5185_s11 = scalar_lea.vmem %s5184_s30, 1024  ;;  %p5186_p8 = scmp.lt.s32.totalorder %s5493_s13, %s5184_s30 }
  0x56   : > { %p5181_p3 = pnand %p5179_p4, %p5165_p12  ;;  %p5187_p1 = scmp.lt.s32.totalorder %s5185_s11, %s5178_s22 }
  0x58   : > { %p5182_p7 = pneg %p5181_p3  ;;  %p5188_p5 = por %p5187_p1, %p5186_p8 }
  0x5a   : > { %p5189_p6 = pnand %p5188_p5, %p5182_p7 }
  0x5c   : > { %5192 = shalt.err (!%p5189_p6)
}
  0x5d   : > { %s5299_s25 = smov 256   ;;  %s5300_s20 = smov 16  }
  0x5e   : > { %4970 = dma.hbm_to_vmem [thread:$0]  (!%p8217_p9), %s5491_s7, 512, %s5493_s13, %s5500_s27, %s5299_s25, %s5299_s25, %s5300_s20  }
  0x5f   : > { %p8218_p12 = scmp.ne.s32.totalorder %s8211_s29, 0 }
  0x61   : > { %362 = sbr.rel (%p8218_p12) target bundleno = 2355 (0x933), region = 60 }
  0x68   : > { %s5531_s21 = sand.u32 1, %s5271_s14   ;;  %p8219_p2 = scmp.ne.s32.totalorder %s8206_s26, 0 }
  0x69   : > { %s4760_s1 = sshll.u32 %s5531_s21, 5  ;;  %s365_s8 = scalar_lea.sflag [#allocation6], %s5531_s21 }
  0x6a   : > { %s5535_s9 = scalar_lea.vmem [#allocation5], %s4760_s1 }
  0x6b   : > { %5254 = dma.done.wait (%p8219_p2), %s365_s8, 512  }
  0x6c   : > { %5256 = vsyncadd (%p8219_p2), %s365_s8, 4294966784  ;;  %p8220_p9 = scmp.ne.s32.totalorder %s8204_s24, 0 }
  0x6e   : > { %5258 = dma.done.wait (%p8220_p9), [#allocation9], 64  }
  0x6f   : > { %5260 = vsyncadd (%p8220_p9), [#allocation9], 4294967232  ;;  %v8158_v0 = vmov 0   ;;  %s4763_s7 = sshll.u32 %s5279_s16, 3  ;;  %v432_v1 = vlaneseq  ;;  %s5302_s24 = smov 111   ;;  %v418_v60 = vld [vmem:[%s5535_s9] sm:$0xff] }
  0x70   : > { %5057 = vset.pattern.permute.xlu1 %v8158_v0  ;;  %5056 = vset.pattern.permute.xlu0 %v8158_v0  ;;  %v414_v2 = vstv %s4763_s7  ;;  %v412_v4 = vld [vmem:[#allocation8] ss:$2 sm:$0x3]  ;;  %v417_v5 = vld [vmem:[#allocation8 + $0x1] ss:$2 sm:$0x3] }
  0x71   : > { %v5548_v3 = vshrl.u32 %v432_v1, 7  ;;  %v415_v6 = vadd.s32 %v414_v2, %v412_v4  ;;  %v5550_v7 = vadd.s32 4294967295, %v417_v5  ;;  %v5552_v8 = vadd.s32 1, %v417_v5  ;;  %s5303_s26 = smov 113   ;;  %s5304_s29 = smov 112   ;;  %v420_v63 = vld [vmem:[%s5535_s9 + $0x10] sm:$0xff] }
  0x72   : > { %s5305_s12 = smov 127   ;;  %s5306_s13 = smov 1   ;;  %v482_v57 = vld [vmem:[%s5535_s9 + $0x8] sm:$0xf]  ;;  %v484_v59 = vld [vmem:[%s5535_s9 + $0x18] sm:$0xf] }
  0x73   : > { %v422_v9 = vadd.s32 4294967295, %v415_v6  ;;  %vm8150_vm0 = vcmp.ge.s32.totalorder %v5550_v7, 0  ;;  %vm8149_vm1 = vcmp.lt.s32.totalorder %v5550_v7, 16  ;;  %v5557_v10 = vsub.s32 0, %v5548_v3  ;;  %s5307_s27 = smov 15   ;;  %s5308_s17 = smov 16  }
  0x74   : > { %v5560_v11 = vsub.s32 1, %v5548_v3  ;;  %vm8148_vm2 = vcmp.ge.s32.totalorder %v5552_v8, 0  ;;  %vm8147_vm3 = vcmp.lt.s32.totalorder %v5552_v8, 16  ;;  %vm598_vm4 = vmand %vm8150_vm0, %vm8149_vm1  ;;  %v720_v24 = vadd.s32 1, %v415_v6  ;;  %s5309_s28 = smov 17   ;;  %v916_v1 = vld [vmem:[%s8122_s3 + $0x30] sm:$0xff] }
  0x75   : > { %vm423_vm5 = vcmp.ge.s32.totalorder %v422_v9, 0  ;;  %vm424_vm6 = vcmp.lt.s32.totalorder %v422_v9, 16  ;;  %v599_v12 = vsel %vm598_vm4, 1, %v8158_v0  ;;  %vm667_vm7 = vmand %vm8148_vm2, %vm8147_vm3  ;;  %v595_v62 = vld [vmem:[%s5535_s9 + $0x8] sm:$0xf]  ;;  %s8370_s25 = sld [smem:[#allocation32_spill]] }
  0x76   : > { %vm425_vm8 = vmand %vm423_vm5, %vm424_vm6  ;;  %v603_v13 = vrot.slane %v599_v12, %v5557_v10  ;;  %v607_v14 = vrot.slane %v599_v12, %v5560_v11  ;;  %v668_v15 = vsel %vm667_vm7, 1, %v8158_v0  ;;  %v597_v4 = vld [vmem:[%s5535_s9 + $0x18] sm:$0xf]  ;;  %s8483_s23 = sld [smem:[#allocation15_spill]]  ;;  %s5310_s30 = smov 64  }
  0x77   : > { %vm428_vm9 = vmand %vm425_vm8, %vm8150_vm0  ;;  %v485_v16 = vsel %vm425_vm8, 1, %v8158_v0  ;;  %v672_v17 = vrot.slane %v668_v15, %v5557_v10  ;;  %v676_v18 = vrot.slane %v668_v15, %v5560_v11  ;;  %s8484_s11 = sld [smem:[#allocation18_spill]]  ;;  %s4762_s20 = sshll.u32 %s5531_s21, 3 }
  0x78   : > { %vm430_vm10 = vmand %vm428_vm9, %vm8149_vm1  ;;  %v489_v19 = vrot.slane %v485_v16, %v5557_v10  ;;  %v493_v20 = vrot.slane %v485_v16, %v5560_v11  ;;  %vm5588_vm12 = vcmp.eq.s32.totalorder %v603_v13, 1  ;;  %vm5592_vm13 = vcmp.eq.s32.totalorder %v607_v14, 1  ;;  %v419_v16 = vld [vmem:[%s5535_s9 + $0x8] sm:$0xf]  ;;  %s408_s7 = scalar_lea.vmem [#allocation10], %s4762_s20 }
  0x79   : > { %v431_v21 = vsel %vm430_vm10, 1, %v8158_v0  ;;  %vm541_vm11 = vmand %vm425_vm8, %vm8148_vm2  ;;  %vm5613_vm6 = vcmp.eq.s32.totalorder %v672_v17, 1  ;;  %vm5617_vm7 = vcmp.eq.s32.totalorder %v676_v18, 1  ;;  %v421_v17 = vld [vmem:[%s5535_s9 + $0x18] sm:$0xf]  ;;  %s4654_s22 = sshll.u32 %s408_s7, 4  ;;  %s8066_s22 = int_to_ptr.vmem [resolvable:$true] %s4654_s22 }
  0x7a   : > { %v435_v25 = vrot.slane %v431_v21, %v5557_v10  ;;  %v439_v26 = vrot.slane %v431_v21, %v5560_v11  ;;  %vm543_vm14 = vmand %vm541_vm11, %vm8147_vm3  ;;  %vm5600_vm15 = vcmp.eq.s32.totalorder %v489_v19, 1  ;;  %vm5604_vm4 = vcmp.eq.s32.totalorder %v493_v20, 1 }
  0x7b   : > { %v544_v29 = vsel %vm543_vm14, 1, %v8158_v0  ;;  %vm610_vm10 = vmpackc.low %vm5592_vm13, %vm5588_vm12  ;;  %vm721_vm14 = vcmp.ge.s32.totalorder %v720_v24, 0  ;;  %vm722_vm3 = vcmp.lt.s32.totalorder %v720_v24, 16  ;;  %vm8236_vm12 = vcmp.ge.s32.totalorder %v5552_v8, 0 }
  0x7c   : > { %vm440_vm8 = vcmp.eq.s32.totalorder %v435_v25, 1  ;;  %vm441_vm9 = vcmp.eq.s32.totalorder %v439_v26, 1  ;;  %v548_v32 = vrot.slane %v544_v29, %v5557_v10  ;;  %v552_v33 = vrot.slane %v544_v29, %v5560_v11  ;;  %vm679_vm0 = vmpackc.low %vm5617_vm7, %vm5613_vm6  ;;  %s4857_s1 = sshll.u32 %s8483_s23, 1 }
  0x7d   : > { %vm442_vm11 = vmpackc.low %vm441_vm9, %vm440_vm8  ;;  %v5658_v38 = vsel %vm610_vm10, 65537, %v8158_v0  ;;  %v5672_v41 = vsel %vm679_vm0, 65537, %v8158_v0  ;;  %vm8237_vm10 = vcmp.lt.s32.totalorder %v5552_v8, 16  ;;  %s4650_s8 = sadd.s32 %s5279_s16, %s4857_s1  ;;  %s5193_s16 = scalar_lea.vmem %s8066_s22, 128 }
  0x7e   : > { %v5628_v34 = vsel %vm442_vm11, 65537, %v8158_v0  ;;  %vm553_vm2 = vcmp.eq.s32.totalorder %v548_v32, 1  ;;  %vm554_vm1 = vcmp.eq.s32.totalorder %v552_v33, 1  ;;  %vm8233_vm8 = vmpackc.low %vm5604_vm4, %vm5600_vm15  ;;  %v536_v32 = vld [vmem:[%s5535_s9 + $0x8] sm:$0xf]  ;;  %p5194_p10 = scmp.ne.s32.totalorder %s8066_s22, %s5193_s16  ;;  %p8486_p11 = scmp.ne.s32.totalorder %s8484_s11, 0 }
  0x7f   : > { %444 = vrot.lane.b32.xlu0 %v5628_v34, %s5302_s24  ;;  %vm555_vm5 = vmpackc.low %vm554_vm1, %vm553_vm2  ;;  %v5645_v36 = vsel %vm8233_vm8, 65537, %v8158_v0  ;;  %vm8234_vm1 = vcmp.ge.s32.totalorder %v5550_v7, 0  ;;  %v538_v33 = vld [vmem:[%s5535_s9 + $0x18] sm:$0xf] }
  0x80   : > { %v5637_v35 = vsel %vm555_vm5, 65537, %v8158_v0  ;;  %vm723_vm9 = vmand %vm721_vm14, %vm722_vm3  ;;  %vm8235_vm3 = vcmp.lt.s32.totalorder %v5550_v7, 16  ;;  %p5195_p13 = pnand %p5194_p10, %p8486_p11 }
  0x81   : > { %557 = vrot.lane.b32.xlu1 %v5637_v35, %s5303_s26  ;;  %v778_v37 = vsel %vm723_vm9, 1, %v8158_v0  ;;  %vm724_vm2 = vmand %vm723_vm9, %vm8234_vm1 }
  0x82   : > { %v782_v39 = vrot.slane %v778_v37, %v5557_v10  ;;  %v786_v40 = vrot.slane %v778_v37, %v5560_v11  ;;  %vm725_vm15 = vmand %vm724_vm2, %vm8235_vm3  ;;  %vm8153_vm2 = vcmask 916480   ;;  %vm8152_vm3 = vcmask 908288   ;;  %p5196_p0 = pneg %p5195_p13 }
  0x83   : > { %498 = vrot.lane.b32.xlu0 %v5645_v36, %s5304_s29  ;;  %v726_v42 = vsel %vm725_vm15, 1, %v8158_v0  ;;  %vm830_vm13 = vmand %vm723_vm9, %vm8236_vm12 }
  0x84   : > { %vm787_vm4 = vcmp.eq.s32.totalorder %v782_v39, 1  ;;  %vm788_vm5 = vcmp.eq.s32.totalorder %v786_v40, 1  ;;  %v730_v43 = vrot.slane %v726_v42, %v5557_v10  ;;  %v734_v44 = vrot.slane %v726_v42, %v5560_v11  ;;  %vm831_vm11 = vmand %vm830_vm13, %vm8237_vm10 }
  0x85   : > { %612 = vrot.lane.b32.xlu1 %v5658_v38, %s5305_s12  ;;  %vm789_vm0 = vmpackc.low %vm788_vm5, %vm787_vm4  ;;  %v832_v45 = vsel %vm831_vm11, 1, %v8158_v0  ;;  %vm8193_vm4 = vcmask 1039360   ;;  %vm8155_vm11 = vcmask 924672  }
  0x86   : > { %vm735_vm6 = vcmp.eq.s32.totalorder %v730_v43, 1  ;;  %vm736_vm7 = vcmp.eq.s32.totalorder %v734_v44, 1  ;;  %v836_v46 = vrot.slane %v832_v45, %v5557_v10  ;;  %v5688_v47 = vsel %vm789_vm0, 65537, %v8158_v0 }
  0x87   : > { %681 = vrot.lane.b32.xlu0 %v5672_v41, %s5306_s13  ;;  %vm737_vm14 = vmpackc.low %vm736_vm7, %vm735_vm6  ;;  %v840_v48 = vrot.slane %v832_v45, %v5560_v11 }
  0x88   : > { %v5692_v49 = vsel %vm737_vm14, 65537, %v8158_v0  ;;  %vm841_vm8 = vcmp.eq.s32.totalorder %v836_v46, 1  ;;  %vm8186_vm14 = vcmask 7168   ;;  %v5750_v46 = vld [vmem:[%s5535_s9 + $0x4] sm:$0xff] }
  0x89   : > { %739 = vrot.lane.b32.xlu1 %v5692_v49, %s5307_s27  ;;  %vm842_vm9 = vcmp.eq.s32.totalorder %v840_v48, 1  ;;  %v5753_v48 = vld [vmem:[%s5535_s9 + $0x14] sm:$0xff] }
  0x8a   : > { %vm843_vm1 = vmpackc.low %vm842_vm9, %vm841_vm8 }
  0x8b   : > { %791 = vrot.lane.b32.xlu0 %v5688_v47, %s5308_s17  ;;  %v5699_v50 = vsel %vm843_vm1, 65537, %v8158_v0  ;;  %v6522_v0 = vld [vmem:[#allocation3 + $0x98] sm:$0xff] }
  0x8d   : > { %845 = vrot.lane.b32.xlu1 %v5699_v50, %s5309_s28 }
  0xf1   : > { %v445_v51 = vpop.permute.xlu0 %444 }
  0xf2   : > { %v446_v54 = vrot.slane %v445_v51, 4 }
  0xf3   : > { %v558_v52 = vpop.permute.xlu1 %557 }
  0xf4   : > { %v448_v5 = vsel %vm8152_vm3, %v446_v54, %v445_v51  ;;  %vm5719_vm10 = vcmp.ne.s16.totalorder %v446_v54, 0  ;;  %v559_v18 = vrot.slane %v558_v52, 4 }
  0xf5   : > { %v499_v53 = vpop.permute.xlu0 %498  ;;  %vm449_vm5 = vcmp.ne.s16.totalorder %v448_v5, 0  ;;  %v452_v23 = vsel %vm5719_vm10, %v419_v16, 0  ;;  %v454_v24 = vsel %vm5719_vm10, %v421_v17, 0  ;;  %v777_v5 = vld [vmem:[%s5535_s9 + $0x1c] sm:$0xf]  ;;  %vm8194_vm10 = vcmask 138240  }
  0xf6   : > { %v500_v55 = vrot.slane %v499_v53, 4  ;;  %v451_v21 = vsel %vm449_vm5, %v418_v60, 0  ;;  %v453_v22 = vsel %vm449_vm5, %v420_v63, 0  ;;  %v561_v25 = vsel %vm8155_vm11, %v559_v18, %v558_v52 }
  0xf7   : > { %v613_v56 = vpop.permute.xlu1 %612  ;;  %v4765_v26 = vcombine.high %v451_v21, %v453_v22  ;;  %v4766_v27 = vcombine.low %v452_v23, %v454_v24  ;;  %vm562_vm6 = vcmp.ne.s16.totalorder %v561_v25, 0  ;;  %vm5735_vm7 = vcmp.ne.s16.totalorder %v559_v18, 0  ;;  %v717_v18 = vld [vmem:[%s5535_s9 + $0xc] sm:$0xf] }
  0xf8   : > { %v614_v58 = vrot.slane %v613_v56, 4  ;;  %v502_v61 = vsel %vm8153_vm2, %v500_v55, %v499_v53  ;;  %vm504_vm15 = vcmp.ne.s16.totalorder %v500_v55, 0  ;;  %v4764_v39 = vcombine.low %v451_v21, %v453_v22 }
  0xf9   : > { %vm503_vm12 = vcmp.ne.s16.totalorder %v502_v61, 0  ;;  %v506_v2 = vsel %vm504_vm15, %v482_v57, 0  ;;  %v508_v8 = vsel %vm504_vm15, %v484_v59, 0  ;;  %v682_v28 = vpop.permute.xlu0 %681  ;;  %v564_v42 = vsel %vm562_vm6, %v418_v60, 0  ;;  %v666_v61 = vld [vmem:[%s5535_s9 + $0x1c] sm:$0xf] }
  0xfa   : > { %vm5709_vm13 = vcmp.ne.s16.totalorder %v614_v58, 0  ;;  %v505_v6 = vsel %vm503_vm12, %v418_v60, 0  ;;  %v507_v7 = vsel %vm503_vm12, %v420_v63, 0  ;;  %v4769_v9 = vcombine.low %v506_v2, %v508_v8  ;;  %v910_v59 = vld [vmem:[%s8122_s3] sm:$0xff] }
  0xfb   : > { %v4768_v11 = vcombine.high %v505_v6, %v507_v7  ;;  %v620_v12 = vsel %vm5709_vm13, %v595_v62, 0  ;;  %v622_v13 = vsel %vm5709_vm13, %v597_v4, 0  ;;  %v616_v19 = vsel %vm8193_vm4, %v614_v58, %v613_v56  ;;  %v740_v55 = vpop.permute.xlu1 %739  ;;  %v664_v58 = vld [vmem:[%s5535_s9 + $0xc] sm:$0xf] }
  0xfc   : > { %526 = vrot.lane.b32.xlu0 %v4769_v9, %s5308_s17  ;;  %v4775_v15 = vcombine.low %v620_v12, %v622_v13  ;;  %v4767_v20 = vcombine.low %v505_v6, %v507_v7  ;;  %vm617_vm0 = vcmp.ne.s16.totalorder %v616_v19, 0  ;;  %v683_v37 = vrot.slane %v682_v28, 4  ;;  %v775_v4 = vld [vmem:[%s5535_s9 + $0xc] sm:$0xf]  ;;  %v719_v19 = vld [vmem:[%s5535_s9 + $0x1c] sm:$0xf] }
  0xfd   : > { %524 = vrot.lane.b32.xlu1 %v4768_v11, %s5308_s17  ;;  %v619_v29 = vsel %vm617_vm0, %v418_v60, 0  ;;  %v621_v30 = vsel %vm617_vm0, %v420_v63, 0  ;;  %v566_v43 = vsel %vm562_vm6, %v420_v63, 0  ;;  %v565_v44 = vsel %vm5735_vm7, %v536_v32, 0  ;;  %v792_v52 = vpop.permute.xlu0 %791 }
  0xfe   : > { %v4774_v40 = vcombine.high %v619_v29, %v621_v30  ;;  %v567_v45 = vsel %vm5735_vm7, %v538_v33, 0  ;;  %v684_v51 = vsel %vm8186_vm14, %v683_v37, %v682_v28  ;;  %v4771_v53 = vcombine.high %v564_v42, %v566_v43  ;;  %v5062_v33 = vld [vmem:[%s8121_s2 + $0x4] ss:$8 sps:$4 sm:$0xff]  }
  0xff   : > { %v4772_v54 = vcombine.low %v565_v44, %v567_v45  ;;  %v4777_v56 = vcombine.high %v5750_v46, %v5753_v48  ;;  %v4776_v57 = vcombine.low %v5750_v46, %v5753_v48  ;;  %vm685_vm8 = vcmp.ne.s16.totalorder %v684_v51, 0  ;;  %v846_v17 = vpop.permute.xlu1 %845  ;;  %v829_v44 = vld [vmem:[%s5535_s9 + $0x1c] sm:$0xf] }
 0x100   : > { %640 = vrot.lane.b32.xlu0 %v4775_v15, %s5306_s13  ;;  %vm5761_vm9 = vcmp.ne.s16.totalorder %v683_v37, 0  ;;  %v793_v60 = vrot.slane %v792_v52, 4  ;;  %v741_v62 = vrot.slane %v740_v55, 4  ;;  %v4770_v63 = vcombine.low %v564_v42, %v566_v43  ;;  %v827_v43 = vld [vmem:[%s5535_s9 + $0xc] sm:$0xf]  ;;  %s4858_s9 = sshll.u32 %s4650_s8, 7 }
 0x101   : > { %522 = vrot.lane.b32.xlu1 %v4767_v20, %s5308_s17  ;;  %v4773_v2 = vcombine.low %v619_v29, %v621_v30  ;;  %vm8183_vm15 = vcmask 121856   ;;  %v687_v6 = vsel %vm685_vm8, %v5750_v46, 0  ;;  %v689_v7 = vsel %vm685_vm8, %v5753_v48, 0 }
 0x102   : > { %vm5768_vm1 = vcmp.ne.s16.totalorder %v793_v60, 0  ;;  %v688_v8 = vsel %vm5761_vm9, %v664_v58, 0  ;;  %v690_v9 = vsel %vm5761_vm9, %v666_v61, 0  ;;  %v742_v11 = vsel %vm8183_vm15, %v741_v62, %v740_v55  ;;  %v911_v58 = vld [vmem:[%s8122_s3 + $0x8] sm:$0xff]  ;;  %v913_v61 = vld [vmem:[%s8122_s3 + $0x18] sm:$0xff] }
 0x103   : > { %v798_v12 = vsel %vm5768_vm1, %v775_v4, 0  ;;  %v800_v13 = vsel %vm5768_vm1, %v777_v5, 0  ;;  %vm8184_vm12 = vcmask 130048   ;;  %vm5787_vm13 = vcmp.ne.s16.totalorder %v741_v62, 0  ;;  %v914_v62 = vld [vmem:[%s8122_s3 + $0x20] sm:$0xff]  ;;  %v919_v5 = vld [vmem:[%s8122_s3 + $0x48] sm:$0xff] }
 0x104   : > { %470 = vrot.lane.b32.xlu0 %v4765_v26, %s5309_s28  ;;  %v4779_v15 = vcombine.high %v687_v6, %v689_v7  ;;  %v4780_v16 = vcombine.low %v688_v8, %v690_v9  ;;  %vm743_vm5 = vcmp.ne.s16.totalorder %v742_v11, 0  ;;  %v4786_v20 = vcombine.low %v798_v12, %v800_v13  ;;  %4802 = vmatprep.mubr.msk.bf16.mxu0 %vm8184_vm12, %v5062_v33  ;;  %v918_v4 = vld [vmem:[%s8122_s3 + $0x40] sm:$0xff] }
 0x105   : > { %472 = vrot.lane.b32.xlu1 %v4766_v27, %s5309_s28  ;;  %v794_v21 = vsel %vm8184_vm12, %v793_v60, %v792_v52  ;;  %v847_v22 = vrot.slane %v846_v17, 4  ;;  %v746_v23 = vsel %vm5787_vm13, %v717_v18, 0  ;;  %v748_v24 = vsel %vm5787_vm13, %v719_v19, 0  ;;  %v912_v60 = vld [vmem:[%s8122_s3 + $0x10] sm:$0xff] }
 0x106   : > { %v4778_v25 = vcombine.low %v687_v6, %v689_v7  ;;  %v745_v26 = vsel %vm743_vm5, %v5750_v46, 0  ;;  %v747_v27 = vsel %vm743_vm5, %v5753_v48, 0  ;;  %vm795_vm0 = vcmp.ne.s16.totalorder %v794_v21, 0  ;;  %v920_v6 = vld [vmem:[%s8122_s3 + $0x50] sm:$0xff]  ;;  %v921_v7 = vld [vmem:[%s8122_s3 + $0x58] sm:$0xff] }
 0x107   : > { %v4783_v28 = vcombine.low %v746_v23, %v748_v24  ;;  %v848_v29 = vsel %vm8194_vm10, %v847_v22, %v846_v17  ;;  %v4782_v30 = vcombine.high %v745_v26, %v747_v27  ;;  %v797_v31 = vsel %vm795_vm0, %v5750_v46, 0 }
 0x108   : > { %468 = vrot.lane.b32.xlu0 %v4764_v39, %s5309_s28  ;;  %v799_v32 = vsel %vm795_vm0, %v5753_v48, 0  ;;  %vm849_vm6 = vcmp.ne.s16.totalorder %v848_v29, 0  ;;  %v4781_v39 = vcombine.low %v745_v26, %v747_v27  ;;  %vm850_vm7 = vcmp.ne.s16.totalorder %v847_v22, 0 }
 0x109   : > { %638 = vrot.lane.b32.xlu1 %v4774_v40, %s5306_s13  ;;  %v4785_v37 = vcombine.high %v797_v31, %v799_v32  ;;  %v851_v40 = vsel %vm849_vm6, %v5750_v46, 0  ;;  %v853_v42 = vsel %vm849_vm6, %v5753_v48, 0  ;;  %v4784_v45 = vcombine.low %v797_v31, %v799_v32 }
 0x10a   : > { %v4788_v51 = vcombine.high %v851_v40, %v853_v42  ;;  %v852_v52 = vsel %vm850_vm7, %v827_v43, 0  ;;  %v4787_v55 = vcombine.low %v851_v40, %v853_v42  ;;  %v1265_v8 = vrot.slane %v5628_v34, %v5557_v10 }
 0x10b   : > { %v5862_v9 = vsub.s32 4, %v5548_v3  ;;  %v1407_v11 = vrot.slane %v5645_v36, %v5557_v10  ;;  %v1549_v12 = vrot.slane %v5637_v35, %v5557_v10 }
 0x10c   : > { %583 = vrot.lane.b32.xlu0 %v4771_v53, %s5307_s27  ;;  %v854_v53 = vsel %vm850_vm7, %v829_v44, 0 }
 0x10d   : > { %585 = vrot.lane.b32.xlu1 %v4772_v54, %s5307_s27  ;;  %v4789_v54 = vcombine.low %v852_v52, %v854_v53  ;;  %v1269_v13 = vrot.slane %v5628_v34, %v5862_v9  ;;  %v1411_v14 = vrot.slane %v5645_v36, %v5862_v9  ;;  %v1553_v3 = vrot.slane %v5637_v35, %v5862_v9 }
 0x110   : > { %581 = vrot.lane.b32.xlu0 %v4770_v63, %s5307_s27  ;;  %v915_v63 = vld [vmem:[%s8122_s3 + $0x28] sm:$0xff] }
 0x111   : > { %636 = vrot.lane.b32.xlu1 %v4773_v2, %s5306_s13  ;;  %v917_v2 = vld [vmem:[%s8122_s3 + $0x38] sm:$0xff] }
 0x114   : > { %706 = vrot.lane.b32.xlu0 %v4779_v15, %s5305_s12 }
 0x115   : > { %708 = vrot.lane.b32.xlu1 %v4780_v16, %s5305_s12 }
 0x118   : > { %704 = vrot.lane.b32.xlu0 %v4778_v25, %s5305_s12 }
 0x119   : > { %818 = vrot.lane.b32.xlu1 %v4786_v20, %s5304_s29 }
 0x11c   : > { %766 = vrot.lane.b32.xlu0 %v4783_v28, %s5303_s26 }
 0x11d   : > { %764 = vrot.lane.b32.xlu1 %v4782_v30, %s5303_s26 }
 0x120   : > { %816 = vrot.lane.b32.xlu0 %v4785_v37, %s5304_s29 }
 0x121   : > { %762 = vrot.lane.b32.xlu1 %v4781_v39, %s5303_s26 }
 0x124   : > { %814 = vrot.lane.b32.xlu0 %v4784_v45, %s5304_s29 }
 0x125   : > { %870 = vrot.lane.b32.xlu1 %v4788_v51, %s5302_s24 }
 0x128   : > { %872 = vrot.lane.b32.xlu0 %v4789_v54, %s5302_s24 }
 0x129   : > { %868 = vrot.lane.b32.xlu1 %v4787_v55, %s5302_s24 }
 0x12c   : > { %924 = vperm.xlu0 %5056, %v910_v59  }
 0x12d   : > { %929 = vperm.xlu1 %5057, %v911_v58  }
 0x130   : > { %939 = vperm.xlu0 %5056, %v913_v61   ;;  %v5063_v61 = vld [vmem:[%s8121_s2 + $0x14] ss:$8 sps:$4 sm:$0xff]  }
 0x131   : > { %934 = vperm.xlu1 %5057, %v912_v60   ;;  %v5060_v60 = vld [vmem:[%s8121_s2] ss:$8 sps:$4 sm:$0xff]  }
 0x134   : > { %949 = vperm.xlu0 %5056, %v915_v63   ;;  %v5066_v63 = vld [vmem:[%s8121_s2 + $0x24] ss:$8 sps:$4 sm:$0xff]  }
 0x135   : > { %944 = vperm.xlu1 %5057, %v914_v62   ;;  %v5065_v62 = vld [vmem:[%s8121_s2 + $0x10] ss:$8 sps:$4 sm:$0xff]  }
 0x138   : > { %959 = vperm.xlu0 %5056, %v917_v2   ;;  %v5068_v2 = vld [vmem:[%s8121_s2 + $0x20] ss:$8 sps:$4 sm:$0xff]  }
 0x139   : > { %954 = vperm.xlu1 %5057, %v916_v1  }
 0x13c   : > { %969 = vperm.xlu0 %5056, %v919_v5  }
 0x13d   : > { %964 = vperm.xlu1 %5057, %v918_v4   ;;  %v5069_v4 = vld [vmem:[%s8121_s2 + $0x34] ss:$8 sps:$4 sm:$0xff]  }
 0x140   : > { %979 = vperm.xlu0 %5056, %v921_v7   ;;  %v5071_v7 = vld [vmem:[%s8121_s2 + $0x30] ss:$8 sps:$4 sm:$0xff]  }
 0x141   : > { %974 = vperm.xlu1 %5057, %v920_v6  }
 0x144   : > { %1272 = vrot.lane.b32.xlu0 %v1269_v13, %s5302_s24  ;;  %v5074_v13 = vld [vmem:[%s8121_s2 + $0x40] ss:$8 sps:$4 sm:$0xff]  }
 0x145   : > { %1270 = vrot.lane.b32.xlu1 %v1265_v8, %s5302_s24  ;;  %v5072_v8 = vld [vmem:[%s8121_s2 + $0x44] ss:$8 sps:$4 sm:$0xff]  }
 0x148   : > { %1414 = vrot.lane.b32.xlu0 %v1411_v14, %s5304_s29  ;;  %v5075_v14 = vld [vmem:[%s8121_s2 + $0x54] ss:$8 sps:$4 sm:$0xff]  }
 0x149   : > { %1412 = vrot.lane.b32.xlu1 %v1407_v11, %s5304_s29 }
 0x14c   : > { %1556 = vrot.lane.b32.xlu0 %v1553_v3, %s5303_s26 }
 0x14d   : > { %1554 = vrot.lane.b32.xlu1 %v1549_v12, %s5303_s26 }
 0x16e   : > { %v527_v15 = vpop.permute.xlu0 %526 }
 0x16f   : > { %v525_v16 = vpop.permute.xlu1 %524 }
 0x170   : > { %v530_v23 = vsel %vm8184_vm12, %v525_v16, %v527_v15  ;;  %v5949_v15 = vld [vmem:[#allocation3] sm:$0xff] }
 0x172   : > { %v641_v17 = vpop.permute.xlu0 %640 }
 0x173   : > { %v523_v18 = vpop.permute.xlu1 %522 }
 0x174   : > { %v529_v25 = vsel %vm8184_vm12, %v523_v18, %v525_v16  ;;  %v5951_v16 = vld [vmem:[#allocation3 + $0x20] sm:$0xff]  ;;  %v5077_v18 = vld [vmem:[%s8121_s2 + $0x50] ss:$8 sps:$4 sm:$0xff]  }
 0x176   : > { %v471_v19 = vpop.permute.xlu0 %470 }
 0x177   : > { %v473_v34 = vpop.permute.xlu1 %472 }
 0x178   : > { %v476_v20 = vsel %vm8194_vm10, %v471_v19, %v473_v34 }
 0x179   : > { %1055 = vmatprep.subr.bf16.mxu0 %v476_v20 }
 0x17a   : > { %v469_v21 = vpop.permute.xlu0 %468 }
 0x17b   : > { %v639_v36 = vpop.permute.xlu1 %638  ;;  %v475_v22 = vsel %vm8194_vm10, %v469_v21, %v471_v19  ;;  %v5959_v19 = vld [vmem:[#allocation3 + $0x40] sm:$0xff]  ;;  %v1691_v21 = vrot.slane %v5658_v38, %v5557_v10 }
 0x17c   : > { %1056 = vmatpush1.bf16.msra.mxu0 %v475_v22  ;;  %v644_v30 = vsel %vm8186_vm14, %v639_v36, %v641_v17  ;;  %v5974_v22 = vld [vmem:[#allocation3 + $0x60] sm:$0xff] }
 0x17d   : > { %1057 = vmatprep.subr.bf16.mxu0 %v530_v23  ;;  %v1695_v23 = vrot.slane %v5658_v38, %v5862_v9 }
 0x17e   : > { %v584_v35 = vpop.permute.xlu0 %583 }
 0x17f   : > { %v586_v24 = vpop.permute.xlu1 %585 }
 0x180   : > { %v589_v26 = vsel %vm8183_vm15, %v584_v35, %v586_v24  ;;  %1058 = vmatpush1.bf16.msra.mxu0 %v529_v25  ;;  %v5983_v24 = vld [vmem:[#allocation3 + $0x80] sm:$0xff] }
 0x181   : > { %1059 = vmatprep.subr.bf16.mxu0 %v589_v26  ;;  %v5985_v25 = vld [vmem:[#allocation3 + $0xa0] sm:$0xff] }
 0x182   : > { %v582_v27 = vpop.permute.xlu0 %581 }
 0x183   : > { %v637_v28 = vpop.permute.xlu1 %636  ;;  %v588_v29 = vsel %vm8183_vm15, %v582_v27, %v584_v35 }
 0x184   : > { %1060 = vmatpush1.bf16.msra.mxu0 %v588_v29  ;;  %v643_v33 = vsel %vm8186_vm14, %v637_v28, %v639_v36 }
 0x185   : > { %1061 = vmatprep.subr.bf16.mxu0 %v644_v30 }
 0x186   : > { %v707_v31 = vpop.permute.xlu0 %706 }
 0x187   : > { %v709_v32 = vpop.permute.xlu1 %708 }
 0x188   : > { %1062 = vmatpush1.bf16.msra.mxu0 %v643_v33  ;;  %v711_v40 = vsel %vm8193_vm4, %v707_v31, %v709_v32 }
 0x189   : > { %1063 = vmatprep.subr.bf16.mxu0 %v4777_v56 }
 0x18a   : > { %v705_v37 = vpop.permute.xlu0 %704 }
 0x18b   : > { %v819_v39 = vpop.permute.xlu1 %818  ;;  %v710_v44 = vsel %vm8193_vm4, %v705_v37, %v707_v31 }
 0x18c   : > { %1064 = vmatpush1.bf16.msra.mxu0 %v4776_v57 }
 0x18d   : > { %1065 = vmatprep.subr.bf16.mxu0 %v711_v40 }
 0x18e   : > { %v767_v42 = vpop.permute.xlu0 %766 }
 0x18f   : > { %v765_v43 = vpop.permute.xlu1 %764 }
 0x190   : > { %v769_v45 = vsel %vm8155_vm11, %v765_v43, %v767_v42  ;;  %1066 = vmatpush1.bf16.msra.mxu0 %v710_v44  ;;  %v1857_v42 = vrot.slane %v5672_v41, %v5557_v10  ;;  %v1861_v44 = vrot.slane %v5672_v41, %v5862_v9 }
 0x191   : > { %1067 = vmatprep.subr.bf16.mxu0 %v769_v45 }
 0x192   : > { %v817_v51 = vpop.permute.xlu0 %816 }
 0x193   : > { %v763_v52 = vpop.permute.xlu1 %762  ;;  %v821_v53 = vsel %vm8153_vm2, %v817_v51, %v819_v39 }
 0x194   : > { %v768_v56 = vsel %vm8155_vm11, %v763_v52, %v765_v43 }
 0x195   : > { %1068 = vmatpush1.bf16.msra.mxu0 %v768_v56 }
 0x196   : > { %1069 = vmatprep.subr.bf16.mxu0 %v821_v53  ;;  %v815_v46 = vpop.permute.xlu0 %814 }
 0x197   : > { %v871_v48 = vpop.permute.xlu1 %870  ;;  %v820_v57 = vsel %vm8153_vm2, %v815_v46, %v817_v51 }
 0x199   : > { %1070 = vmatpush1.bf16.msra.mxu0 %v820_v57 }
 0x19a   : > { %v873_v54 = vpop.permute.xlu0 %872 }
 0x19b   : > { %v869_v55 = vpop.permute.xlu1 %868  ;;  %v875_v58 = vsel %vm8152_vm3, %v871_v48, %v873_v54 }
 0x19c   : > { %v874_v59 = vsel %vm8152_vm3, %v869_v55, %v871_v48  ;;  %1071 = vmatprep.subr.bf16.mxu0 %v875_v58 }
 0x19d   : > { %1072 = vmatpush1.bf16.msra.mxu0 %v874_v59 }
 0x1a0   : > { %1088 = vmatmul.mubr.bf16.vlgmr.msra.gmra.mrb[0].mxu0 %v5060_v60 }
 0x1a1   : > { %4803 = vmatprep.mubr.msk.bf16.mxu0 %vm8184_vm12, %v5063_v61 }
 0x1a8   : > { %1098 = vmatmul.mubr.bf16.gmra.mrb[4].mxu0 %v5065_v62 }
 0x1a9   : > { %4804 = vmatprep.mubr.msk.bf16.mxu0 %vm8184_vm12, %v5066_v63 }
 0x1ab   : > { %v925_v52 = vpop.permute.xlu0 %924 }
 0x1ac   : > { %v5916_v1 = vpop.permute.xlu1 %929 }
 0x1af   : > { %v940_v56 = vpop.permute.xlu0 %939 }
 0x1b0   : > { %v5924_v5 = vpop.permute.xlu1 %934  ;;  %1108 = vmatmul.mubr.bf16.gmra.mrb[8].mxu0 %v5068_v2 }
 0x1b1   : > { %4805 = vmatprep.mubr.msk.bf16.mxu0 %vm8184_vm12, %v5069_v4 }
 0x1b3   : > { %v6053_v53 = vpop.permute.xlu0 %949 }
 0x1b4   : > { %v5927_v6 = vpop.permute.xlu1 %944 }
 0x1b7   : > { %v6055_v46 = vpop.permute.xlu0 %959 }
 0x1b8   : > { %v5935_v11 = vpop.permute.xlu1 %954  ;;  %1118 = vmatmul.mubr.bf16.gmra.mrb[12].mxu0 %v5071_v7 }
 0x1b9   : > { %4806 = vmatprep.mubr.msk.bf16.mxu0 %vm8184_vm12, %v5072_v8 }
 0x1bb   : > { %v6057_v41 = vpop.permute.xlu0 %969 }
 0x1bc   : > { %v5938_v12 = vpop.permute.xlu1 %964 }
 0x1bf   : > { %v6059_v48 = vpop.permute.xlu0 %979 }
 0x1c0   : > { %v5946_v3 = vpop.permute.xlu1 %974  ;;  %1128 = vmatmul.mubr.bf16.gmra.mrb[16].mxu0 %v5074_v13 }
 0x1c1   : > { %4807 = vmatprep.mubr.msk.bf16.mxu0 %vm8184_vm12, %v5075_v14 }
 0x1c3   : > { %v6061_v60 = vpop.permute.xlu0 %1272 }
 0x1c4   : > { %v5953_v17 = vpop.permute.xlu1 %1270  ;;  %8250 = vst [vmem:[#allocation21_spill] sm:$0xff] %v6061_v60  ;;  %vm1277_vm7 = vcmp.ne.s16.totalorder %v6061_v60, 0 }
 0x1c5   : > { %vm8154_vm8 = vcmp.ne.s16.totalorder %v5953_v17, 0  ;;  %v6068_v8 = vsel %vm8152_vm3, %v5953_v17, %v6061_v60 }
 0x1c6   : > { %v1278_v34 = vsel %vm8154_vm8, %v5949_v15, 0  ;;  %v1281_v20 = vsel %vm8154_vm8, %v5951_v16, 0  ;;  %v1284_v36 = vsel %vm8154_vm8, %v5959_v19, 0  ;;  %v1287_v35 = vsel %vm8154_vm8, %v5974_v22, 0 }
 0x1c7   : > { %1314 = vrot.lane.b32.xlu1 %v1278_v34, %s5309_s28  ;;  %1320 = vrot.lane.b32.xlu0 %v1281_v20, %s5309_s28  ;;  %v1290_v27 = vsel %vm8154_vm8, %v5983_v24, 0  ;;  %v1293_v38 = vsel %vm8154_vm8, %v5985_v25, 0  ;;  %v6070_v14 = vpop.permute.xlu0 %1414 }
 0x1c8   : > { %1138 = vmatmul.mubr.bf16.gmra.mrb[20].mxu0 %v5077_v18  ;;  %v5987_v26 = vpop.permute.xlu1 %1412  ;;  %8251 = vst [vmem:[#allocation22_spill] sm:$0xff] %v6070_v14 }
 0x1c9   : > { %vm8151_vm9 = vcmp.ne.s16.totalorder %v5987_v26, 0 }
 0x1ca   : > { %v1420_v28 = vsel %vm8151_vm9, %v5949_v15, 0  ;;  %v1423_v29 = vsel %vm8151_vm9, %v5951_v16, 0  ;;  %v1426_v30 = vsel %vm8151_vm9, %v5959_v19, 0  ;;  %v1429_v31 = vsel %vm8151_vm9, %v5974_v22, 0 }
 0x1cb   : > { %1326 = vrot.lane.b32.xlu1 %v1284_v36, %s5309_s28  ;;  %1696 = vrot.lane.b32.xlu0 %v1691_v21, %s5305_s12  ;;  %v1432_v33 = vsel %vm8151_vm9, %v5983_v24, 0  ;;  %v1435_v37 = vsel %vm8151_vm9, %v5985_v25, 0  ;;  %vm1276_vm9 = vcmp.ne.s16.totalorder %v6068_v8, 0 }
 0x1cc   : > { %v6014_v32 = vpop.permute.xlu1 %1554 }
 0x1cd   : > { %vm1559_vm1 = vcmp.ne.s16.totalorder %v6014_v32, 0 }
 0x1ce   : > { %v1562_v39 = vsel %vm1559_vm1, %v5949_v15, 0  ;;  %v1565_v40 = vsel %vm1559_vm1, %v5951_v16, 0  ;;  %v1568_v43 = vsel %vm1559_vm1, %v5959_v19, 0  ;;  %v1571_v45 = vsel %vm1559_vm1, %v5974_v22, 0 }
 0x1cf   : > { %1698 = vrot.lane.b32.xlu1 %v1695_v23, %s5305_s12  ;;  %1332 = vrot.lane.b32.xlu0 %v1287_v35, %s5309_s28  ;;  %v1574_v51 = vsel %vm1559_vm1, %v5983_v24, 0 }
 0x1d3   : > { %1338 = vrot.lane.b32.xlu1 %v1290_v27, %s5309_s28  ;;  %1344 = vrot.lane.b32.xlu0 %v1293_v38, %s5309_s28  ;;  %v6082_v38 = vsel %vm8153_vm2, %v5987_v26, %v6070_v14 }
 0x1d4   : > { %8252 = vst [vmem:[#allocation23_spill] sm:$0xff] %v6082_v38 }
 0x1d7   : > { %1456 = vrot.lane.b32.xlu1 %v1420_v28, %s5308_s17  ;;  %1462 = vrot.lane.b32.xlu0 %v1423_v29, %s5308_s17 }
 0x1db   : > { %1468 = vrot.lane.b32.xlu1 %v1426_v30, %s5308_s17  ;;  %1474 = vrot.lane.b32.xlu0 %v1429_v31, %s5308_s17 }
 0x1df   : > { %1480 = vrot.lane.b32.xlu1 %v1432_v33, %s5308_s17  ;;  %1486 = vrot.lane.b32.xlu0 %v1435_v37, %s5308_s17 }
 0x1e3   : > { %1598 = vrot.lane.b32.xlu1 %v1562_v39, %s5307_s27  ;;  %1604 = vrot.lane.b32.xlu0 %v1565_v40, %s5307_s27 }
 0x1e7   : > { %1610 = vrot.lane.b32.xlu1 %v1568_v43, %s5307_s27  ;;  %1862 = vrot.lane.b32.xlu0 %v1857_v42, %s5306_s13  ;;  %v6097_v42 = vpop.permute.xlu0 %1556 }
 0x1e8   : > { %8253 = vst [vmem:[#allocation24_spill] sm:$0xff] %v6097_v42  ;;  %vm8156_vm8 = vcmp.ne.s16.totalorder %v6097_v42, 0 }
 0x1eb   : > { %1864 = vrot.lane.b32.xlu1 %v1861_v44, %s5306_s13  ;;  %1616 = vrot.lane.b32.xlu0 %v1571_v45, %s5307_s27  ;;  %v6102_v44 = vsel %vm8155_vm11, %v6014_v32, %v6097_v42 }
 0x1ec   : > { %8254 = vst [vmem:[#allocation25_spill] sm:$0xff] %v6102_v44  ;;  %vm1560_vm11 = vcmp.ne.s16.totalorder %v6102_v44, 0 }
 0x1ef   : > { %1622 = vrot.lane.b32.xlu1 %v1574_v51, %s5307_s27 }
 0x273   : > { %v1089_v57 = vpop.f32.mrb[0].mxu0 }
 0x274   : > { %v1090_v54 = vadd.f32 %v1089_v57, %v925_v52  ;;  %v1091_v55 = vpop.f32.mrb[1].mxu0 }
 0x275   : > { %v1092_v58 = vadd.f32 %v1091_v55, %v925_v52  ;;  %v1093_v59 = vpop.f32.mrb[2].mxu0 }
 0x276   : > { %v1172_v61 = vmul.f32 0.2, %v1090_v54  ;;  %v1094_v62 = vadd.f32 %v1093_v59, %v5916_v1  ;;  %v1095_v63 = vpop.f32.mrb[3].mxu0  ;;  %vm1148_vm13 = vcmp.gt.f32.partialorder %v1090_v54, 0.0 }
 0x277   : > { %v1173_v2 = vmul.f32 0.2, %v1092_v58  ;;  %v1096_v4 = vadd.f32 %v1095_v63, %v5916_v1  ;;  %vm1149_vm5 = vcmp.gt.f32.partialorder %v1092_v58, 0.0 }
 0x278   : > { %vm1150_vm0 = vcmp.gt.f32.partialorder %v1094_v62, 0.0  ;;  %v1174_v7 = vmul.f32 0.2, %v1094_v62  ;;  %v1196_v18 = vsel %vm1148_vm13, %v1090_v54, %v1172_v61  ;;  %vm1419_vm13 = vcmp.ne.s16.totalorder %v6070_v14, 0 }
 0x279   : > { %vm1151_vm6 = vcmp.gt.f32.partialorder %v1096_v4, 0.0  ;;  %v1175_v13 = vmul.f32 0.2, %v1096_v4  ;;  %v1197_v20 = vsel %vm1149_vm5, %v1092_v58, %v1173_v2 }
 0x27a   : > { %v1198_v34 = vsel %vm1150_vm0, %v1094_v62, %v1174_v7  ;;  %vm1418_vm0 = vcmp.ne.s16.totalorder %v6082_v38, 0 }
 0x27b   : > { %v6073_v21 = vpack.c.bf16 %v1198_v34, %v1196_v18  ;;  %v1199_v1 = vsel %vm1151_vm6, %v1096_v4, %v1175_v13  ;;  %v1099_v36 = vpop.f32.mrb[4].mxu0 }
 0x27c   : > { %v6076_v23 = vpack.c.bf16 %v1199_v1, %v1197_v20  ;;  %v1100_v35 = vadd.f32 %v1099_v36, %v5924_v5  ;;  %v1101_v27 = vpop.f32.mrb[5].mxu0 }
 0x27d   : > { %1232 = vst [vmem:[#allocation3 + $0x8] sm:$0xff] %v6073_v21  ;;  %v1102_v28 = vadd.f32 %v1101_v27, %v5924_v5  ;;  %v1103_v29 = vpop.f32.mrb[6].mxu0  ;;  %v1279_v30 = vsel %vm1276_vm9, %v6073_v21, 0  ;;  %v1421_v51 = vsel %vm1418_vm0, %v6073_v21, 0  ;;  %v1563_v7 = vsel %vm1560_vm11, %v6073_v21, 0 }
 0x27e   : > { %1233 = vst [vmem:[#allocation3 + $0x10] sm:$0xff] %v6076_v23  ;;  %v1176_v31 = vmul.f32 0.2, %v1100_v35  ;;  %v1104_v33 = vadd.f32 %v1103_v29, %v940_v56  ;;  %v1105_v37 = vpop.f32.mrb[7].mxu0  ;;  %1316 = vrot.lane.b32.xlu1 %v1279_v30, %s5309_s28  ;;  %v1280_v39 = vsel %vm1277_vm7, %v6076_v23, 0  ;;  %vm1152_vm5 = vcmp.gt.f32.partialorder %v1100_v35, 0.0 }
 0x27f   : > { %v1177_v5 = vmul.f32 0.2, %v1102_v28  ;;  %v1106_v40 = vadd.f32 %v1105_v37, %v940_v56  ;;  %1318 = vrot.lane.b32.xlu0 %v1280_v39, %s5309_s28  ;;  %vm1153_vm6 = vcmp.gt.f32.partialorder %v1102_v28, 0.0  ;;  %v1422_v57 = vsel %vm1419_vm13, %v6076_v23, 0 }
 0x280   : > { %vm1154_vm3 = vcmp.gt.f32.partialorder %v1104_v33, 0.0  ;;  %v1178_v43 = vmul.f32 0.2, %v1104_v33  ;;  %v1200_v52 = vsel %vm1152_vm5, %v1100_v35, %v1176_v31  ;;  %v1564_v20 = vsel %vm8156_vm8, %v6076_v23, 0 }
 0x281   : > { %vm1155_vm2 = vcmp.gt.f32.partialorder %v1106_v40, 0.0  ;;  %v1179_v45 = vmul.f32 0.2, %v1106_v40  ;;  %v1201_v54 = vsel %vm1153_vm6, %v1102_v28, %v1177_v5 }
 0x282   : > { %v1202_v56 = vsel %vm1154_vm3, %v1104_v33, %v1178_v43  ;;  %1458 = vrot.lane.b32.xlu1 %v1421_v51, %s5308_s17 }
 0x283   : > { %v6112_v55 = vpack.c.bf16 %v1202_v56, %v1200_v52  ;;  %v1203_v58 = vsel %vm1155_vm2, %v1106_v40, %v1179_v45  ;;  %v1109_v59 = vpop.f32.mrb[8].mxu0  ;;  %1460 = vrot.lane.b32.xlu0 %v1422_v57, %s5308_s17 }
 0x284   : > { %v6116_v61 = vpack.c.bf16 %v1203_v58, %v1201_v54  ;;  %v1110_v62 = vadd.f32 %v1109_v59, %v5927_v6  ;;  %v1111_v63 = vpop.f32.mrb[9].mxu0 }
 0x285   : > { %1234 = vst [vmem:[#allocation3 + $0x28] sm:$0xff] %v6112_v55  ;;  %v1112_v2 = vadd.f32 %v1111_v63, %v5927_v6  ;;  %v1113_v4 = vpop.f32.mrb[10].mxu0  ;;  %v1282_v30 = vsel %vm1276_vm9, %v6112_v55, 0  ;;  %v1424_v54 = vsel %vm1418_vm0, %v6112_v55, 0 }
 0x286   : > { %1235 = vst [vmem:[#allocation3 + $0x30] sm:$0xff] %v6116_v61  ;;  %v1180_v13 = vmul.f32 0.2, %v1110_v62  ;;  %v1114_v18 = vadd.f32 %v1113_v4, %v6053_v53  ;;  %v1115_v34 = vpop.f32.mrb[11].mxu0  ;;  %1600 = vrot.lane.b32.xlu1 %v1563_v7, %s5307_s27  ;;  %vm1156_vm2 = vcmp.gt.f32.partialorder %v1110_v62, 0.0  ;;  %v1283_v27 = vsel %vm1277_vm7, %v6116_v61, 0 }
 0x287   : > { %v1181_v1 = vmul.f32 0.2, %v1112_v2  ;;  %v1116_v6 = vadd.f32 %v1115_v34, %v6053_v53  ;;  %1602 = vrot.lane.b32.xlu0 %v1564_v20, %s5307_s27  ;;  %vm1157_vm3 = vcmp.gt.f32.partialorder %v1112_v2, 0.0  ;;  %v1425_v51 = vsel %vm1419_vm13, %v6116_v61, 0 }
 0x288   : > { %vm1158_vm5 = vcmp.gt.f32.partialorder %v1114_v18, 0.0  ;;  %v1182_v36 = vmul.f32 0.2, %v1114_v18  ;;  %v1204_v28 = vsel %vm1156_vm2, %v1110_v62, %v1180_v13  ;;  %v1567_v63 = vsel %vm8156_vm8, %v6116_v61, 0 }
 0x289   : > { %vm1159_vm6 = vcmp.gt.f32.partialorder %v1116_v6, 0.0  ;;  %v1183_v35 = vmul.f32 0.2, %v1116_v6  ;;  %v1205_v53 = vsel %vm1157_vm3, %v1112_v2, %v1181_v1  ;;  %v1566_v7 = vsel %vm1560_vm11, %v6112_v55, 0 }
 0x28a   : > { %v1206_v29 = vsel %vm1158_vm5, %v1114_v18, %v1182_v36  ;;  %1324 = vrot.lane.b32.xlu1 %v1283_v27, %s5309_s28 }
 0x28b   : > { %v6139_v31 = vpack.c.bf16 %v1206_v29, %v1204_v28  ;;  %v1207_v33 = vsel %vm1159_vm6, %v1116_v6, %v1183_v35  ;;  %v1119_v37 = vpop.f32.mrb[12].mxu0  ;;  %1322 = vrot.lane.b32.xlu0 %v1282_v30, %s5309_s28 }
 0x28c   : > { %v6142_v39 = vpack.c.bf16 %v1207_v33, %v1205_v53  ;;  %v1120_v5 = vadd.f32 %v1119_v37, %v5935_v11  ;;  %v1121_v40 = vpop.f32.mrb[13].mxu0 }
 0x28d   : > { %1236 = vst [vmem:[#allocation3 + $0x48] sm:$0xff] %v6139_v31  ;;  %v1122_v43 = vadd.f32 %v1121_v40, %v5935_v11  ;;  %v1123_v45 = vpop.f32.mrb[14].mxu0  ;;  %v1285_v27 = vsel %vm1276_vm9, %v6139_v31, 0  ;;  %v1427_v40 = vsel %vm1418_vm0, %v6139_v31, 0 }
 0x28e   : > { %1237 = vst [vmem:[#allocation3 + $0x50] sm:$0xff] %v6142_v39  ;;  %v1184_v52 = vmul.f32 0.2, %v1120_v5  ;;  %v1124_v56 = vadd.f32 %v1123_v45, %v6055_v46  ;;  %v1125_v57 = vpop.f32.mrb[15].mxu0  ;;  %1466 = vrot.lane.b32.xlu1 %v1425_v51, %s5308_s17  ;;  %vm1160_vm2 = vcmp.gt.f32.partialorder %v1120_v5, 0.0  ;;  %v1286_v53 = vsel %vm1277_vm7, %v6142_v39, 0 }
 0x28f   : > { %v1185_v58 = vmul.f32 0.2, %v1122_v43  ;;  %v1126_v11 = vadd.f32 %v1125_v57, %v6055_v46  ;;  %1464 = vrot.lane.b32.xlu0 %v1424_v54, %s5308_s17  ;;  %vm1161_vm3 = vcmp.gt.f32.partialorder %v1122_v43, 0.0  ;;  %v1428_v51 = vsel %vm1419_vm13, %v6142_v39, 0 }
 0x290   : > { %vm1162_vm5 = vcmp.gt.f32.partialorder %v1124_v56, 0.0  ;;  %v1186_v59 = vmul.f32 0.2, %v1124_v56  ;;  %v1208_v2 = vsel %vm1160_vm2, %v1120_v5, %v1184_v52 }
 0x291   : > { %vm1163_vm6 = vcmp.gt.f32.partialorder %v1126_v11, 0.0  ;;  %v1187_v62 = vmul.f32 0.2, %v1126_v11  ;;  %v1209_v46 = vsel %vm1161_vm3, %v1122_v43, %v1185_v58 }
 0x292   : > { %v1210_v4 = vsel %vm1162_vm5, %v1124_v56, %v1186_v59  ;;  %1608 = vrot.lane.b32.xlu1 %v1567_v63, %s5307_s27  ;;  %v1569_v63 = vsel %vm1560_vm11, %v6139_v31, 0 }
 0x293   : > { %v6165_v13 = vpack.c.bf16 %v1210_v4, %v1208_v2  ;;  %v1211_v18 = vsel %vm1163_vm6, %v1126_v11, %v1187_v62  ;;  %v1129_v34 = vpop.f32.mrb[16].mxu0  ;;  %1606 = vrot.lane.b32.xlu0 %v1566_v7, %s5307_s27 }
 0x294   : > { %v6168_v20 = vpack.c.bf16 %v1211_v18, %v1209_v46  ;;  %v1130_v1 = vadd.f32 %v1129_v34, %v5938_v12  ;;  %v1131_v6 = vpop.f32.mrb[17].mxu0  ;;  %v1570_v46 = vsel %vm8156_vm8, %v6142_v39, 0 }
 0x295   : > { %1238 = vst [vmem:[#allocation3 + $0x68] sm:$0xff] %v6165_v13  ;;  %v1132_v36 = vadd.f32 %v1131_v6, %v5938_v12  ;;  %v1133_v35 = vpop.f32.mrb[18].mxu0 }
 0x296   : > { %1239 = vst [vmem:[#allocation3 + $0x70] sm:$0xff] %v6168_v20  ;;  %v1188_v28 = vmul.f32 0.2, %v1130_v1  ;;  %v1134_v29 = vadd.f32 %v1133_v35, %v6057_v41  ;;  %v1135_v30 = vpop.f32.mrb[19].mxu0  ;;  %1328 = vrot.lane.b32.xlu1 %v1285_v27, %s5309_s28  ;;  %vm1164_vm2 = vcmp.gt.f32.partialorder %v1130_v1, 0.0  ;;  %v1289_v6 = vsel %vm1277_vm7, %v6168_v20, 0 }
 0x297   : > { %v1189_v33 = vmul.f32 0.2, %v1132_v36  ;;  %v1136_v12 = vadd.f32 %v1135_v30, %v6057_v41  ;;  %1330 = vrot.lane.b32.xlu0 %v1286_v53, %s5309_s28  ;;  %vm1165_vm3 = vcmp.gt.f32.partialorder %v1132_v36, 0.0  ;;  %v1288_v27 = vsel %vm1276_vm9, %v6165_v13, 0 }
 0x298   : > { %vm1166_vm5 = vcmp.gt.f32.partialorder %v1134_v29, 0.0  ;;  %v1190_v37 = vmul.f32 0.2, %v1134_v29  ;;  %v1212_v43 = vsel %vm1164_vm2, %v1130_v1, %v1188_v28  ;;  %v1431_v53 = vsel %vm1419_vm13, %v6168_v20, 0 }
 0x299   : > { %vm1167_vm6 = vcmp.gt.f32.partialorder %v1136_v12, 0.0  ;;  %v1191_v5 = vmul.f32 0.2, %v1136_v12  ;;  %v1213_v41 = vsel %vm1165_vm3, %v1132_v36, %v1189_v33  ;;  %v1430_v33 = vsel %vm1418_vm0, %v6165_v13, 0 }
 0x29a   : > { %v1214_v45 = vsel %vm1166_vm5, %v1134_v29, %v1190_v37  ;;  %1470 = vrot.lane.b32.xlu1 %v1427_v40, %s5308_s17  ;;  %v6235_v37 = vpop.permute.xlu1 %1314 }
 0x29b   : > { %v6191_v52 = vpack.c.bf16 %v1214_v45, %v1212_v43  ;;  %v1215_v56 = vsel %vm1167_vm6, %v1136_v12, %v1191_v5  ;;  %v1139_v57 = vpop.f32.mrb[20].mxu0  ;;  %1472 = vrot.lane.b32.xlu0 %v1428_v51, %s5308_s17  ;;  %v1573_v12 = vsel %vm8156_vm8, %v6168_v20, 0  ;;  %v1572_v5 = vsel %vm1560_vm11, %v6165_v13, 0  ;;  %v6250_v45 = vpop.permute.xlu0 %1320 }
 0x29c   : > { %v6194_v54 = vpack.c.bf16 %v1215_v56, %v1213_v41  ;;  %v1140_v58 = vadd.f32 %v1139_v57, %v5946_v3  ;;  %v1141_v11 = vpop.f32.mrb[21].mxu0 }
 0x29d   : > { %1240 = vst [vmem:[#allocation3 + $0x88] sm:$0xff] %v6191_v52  ;;  %v1142_v59 = vadd.f32 %v1141_v11, %v5946_v3  ;;  %v1143_v62 = vpop.f32.mrb[22].mxu0  ;;  %v1291_v40 = vsel %vm1276_vm9, %v6191_v52, 0  ;;  %v1433_v41 = vsel %vm1418_vm0, %v6191_v52, 0  ;;  %v1575_v57 = vsel %vm1560_vm11, %v6191_v52, 0 }
 0x29e   : > { %1241 = vst [vmem:[#allocation3 + $0x90] sm:$0xff] %v6194_v54  ;;  %v1192_v2 = vmul.f32 0.2, %v1140_v58  ;;  %v1144_v4 = vadd.f32 %v1143_v62, %v6059_v48  ;;  %v1145_v7 = vpop.f32.mrb[23].mxu0  ;;  %1612 = vrot.lane.b32.xlu1 %v1569_v63, %s5307_s27  ;;  %vm1168_vm2 = vcmp.gt.f32.partialorder %v1140_v58, 0.0  ;;  %v1292_v43 = vsel %vm1277_vm7, %v6194_v54, 0  ;;  %v6252_v51 = vpop.permute.xlu1 %1326 }
 0x29f   : > { %v1193_v18 = vmul.f32 0.2, %v1142_v59  ;;  %v1146_v3 = vadd.f32 %v1145_v7, %v6059_v48  ;;  %1614 = vrot.lane.b32.xlu0 %v1570_v46, %s5307_s27  ;;  %vm1169_vm3 = vcmp.gt.f32.partialorder %v1142_v59, 0.0  ;;  %v1434_v56 = vsel %vm1419_vm13, %v6194_v54, 0 }
 0x2a0   : > { %vm1170_vm5 = vcmp.gt.f32.partialorder %v1144_v4, 0.0  ;;  %v1194_v34 = vmul.f32 0.2, %v1144_v4  ;;  %v1216_v36 = vsel %vm1168_vm2, %v1140_v58, %v1192_v2  ;;  %v6265_v58 = vpop.permute.xlu0 %1696  ;;  %v1577_v7 = vsel %vm1559_vm1, %v5985_v25, 0 }
 0x2a1   : > { %vm1171_vm6 = vcmp.gt.f32.partialorder %v1146_v3, 0.0  ;;  %v1195_v1 = vmul.f32 0.2, %v1146_v3  ;;  %v1217_v48 = vsel %vm1169_vm3, %v1142_v59, %v1193_v18  ;;  %8255 = vst [vmem:[#allocation26_spill] sm:$0xff] %v6265_v58  ;;  %v1576_v59 = vsel %vm8156_vm8, %v6194_v54, 0 }
 0x2a2   : > { %v1218_v35 = vsel %vm1170_vm5, %v1144_v4, %v1194_v34  ;;  %1336 = vrot.lane.b32.xlu1 %v1289_v6, %s5309_s28  ;;  %v6267_v11 = vpop.permute.xlu1 %1698  ;;  %vm1701_vm3 = vcmp.ne.s16.totalorder %v6265_v58, 0 }
 0x2a3   : > { %v6217_v28 = vpack.c.bf16 %v1218_v35, %v1216_v36  ;;  %v1219_v29 = vsel %vm1171_vm6, %v1146_v3, %v1195_v1  ;;  %1334 = vrot.lane.b32.xlu0 %v1288_v27, %s5309_s28  ;;  %8256 = vst [vmem:[#allocation27_spill] sm:$0xff] %v6267_v11  ;;  %v6276_v62 = vsel %vm8193_vm4, %v6265_v58, %v6267_v11  ;;  %v1704_v3 = vsel %vm1701_vm3, %v5949_v15, 0 }
 0x2a4   : > { %v6220_v30 = vpack.c.bf16 %v1219_v29, %v1217_v48  ;;  %8257 = vst [vmem:[#allocation28_spill] sm:$0xff] %v6276_v62  ;;  %vm8157_vm2 = vcmp.ne.s16.totalorder %v6276_v62, 0  ;;  %v6297_v46 = vpop.permute.xlu0 %1332  ;;  %vm8182_vm5 = vcmp.ne.s16.totalorder %v6267_v11, 0  ;;  %v2287_v62 = vrot.slane %v5699_v50, %v5862_v9 }
 0x2a5   : > { %1242 = vst [vmem:[#allocation3 + $0xa8] sm:$0xff] %v6217_v28  ;;  %v1294_v2 = vsel %vm1276_vm9, %v6217_v28, 0  ;;  %v1705_v4 = vsel %vm8157_vm2, %v6073_v21, 0  ;;  %v1436_v34 = vsel %vm1418_vm0, %v6217_v28, 0  ;;  %v1709_v1 = vsel %vm8182_vm5, %v6116_v61, 0 }
 0x2a6   : > { %1243 = vst [vmem:[#allocation3 + $0xb0] sm:$0xff] %v6220_v30  ;;  %1478 = vrot.lane.b32.xlu1 %v1431_v53, %s5308_s17  ;;  %v1295_v63 = vsel %vm1277_vm7, %v6220_v30, 0  ;;  %v6299_v18 = vpop.permute.xlu1 %1338  ;;  %v1578_v15 = vsel %vm1560_vm11, %v6217_v28, 0  ;;  %v1711_v35 = vsel %vm8157_vm2, %v6139_v31, 0  ;;  %v1706_v27 = vsel %vm8182_vm5, %v6076_v23, 0 }
 0x2a7   : > { %1476 = vrot.lane.b32.xlu0 %v1430_v33, %s5308_s17  ;;  %v1710_v53 = vsel %vm1701_vm3, %v5959_v19, 0  ;;  %v1708_v33 = vsel %vm8157_vm2, %v6112_v55, 0  ;;  %v1707_v19 = vsel %vm1701_vm3, %v5951_v16, 0  ;;  %v1715_v16 = vsel %vm8182_vm5, %v6168_v20, 0 }
 0x2a8   : > { %v6313_v6 = vpop.permute.xlu0 %1344 }
 0x2aa   : > { %1620 = vrot.lane.b32.xlu1 %v1573_v12, %s5307_s27  ;;  %v6315_v36 = vpop.permute.xlu1 %1456  ;;  %v1437_v12 = vsel %vm1419_vm13, %v6220_v30, 0 }
 0x2ab   : > { %1618 = vrot.lane.b32.xlu0 %v1572_v5, %s5307_s27  ;;  %v2003_v5 = vrot.slane %v5692_v49, %v5862_v9 }
 0x2ac   : > { %v6330_v48 = vpop.permute.xlu0 %1462 }
 0x2ae   : > { %1340 = vrot.lane.b32.xlu1 %v1291_v40, %s5309_s28  ;;  %v6332_v29 = vpop.permute.xlu1 %1468 }
 0x2af   : > { %1342 = vrot.lane.b32.xlu0 %v1292_v43, %s5309_s28 }
 0x2b0   : > { %v6347_v40 = vpop.permute.xlu0 %1474 }
 0x2b2   : > { %1482 = vrot.lane.b32.xlu1 %v1433_v41, %s5308_s17  ;;  %v6349_v43 = vpop.permute.xlu1 %1480  ;;  %v1712_v41 = vsel %vm8182_vm5, %v6142_v39, 0 }
 0x2b3   : > { %1484 = vrot.lane.b32.xlu0 %v1434_v56, %s5308_s17  ;;  %v1999_v56 = vrot.slane %v5692_v49, %v5557_v10  ;;  %v1717_v49 = vsel %vm8157_vm2, %v6191_v52, 0 }
 0x2b6   : > { %1624 = vrot.lane.b32.xlu1 %v1575_v57, %s5307_s27  ;;  %v6363_v57 = vpop.permute.xlu0 %1486 }
 0x2b7   : > { %1626 = vrot.lane.b32.xlu0 %v1576_v59, %s5307_s27  ;;  %v6365_v59 = vpop.permute.xlu1 %1598 }
 0x2ba   : > { %1348 = vrot.lane.b32.xlu1 %v1295_v63, %s5309_s28  ;;  %v5080_v63 = vld [vmem:[%s8123_s4 + $0x4] ss:$28 sps:$4 sm:$0xff]  }
 0x2bb   : > { %1346 = vrot.lane.b32.xlu0 %v1294_v2, %s5309_s28  ;;  %2777 = vmatprep.mubr.bf16.mxu1 %v5080_v63  ;;  %v6378_v2 = vpop.permute.xlu0 %1604 }
 0x2be   : > { %1742 = vrot.lane.b32.xlu1 %v1705_v4, %s5306_s13  ;;  %v6380_v4 = vpop.permute.xlu1 %1610 }
 0x2bf   : > { %1628 = vrot.lane.b32.xlu0 %v1577_v7, %s5307_s27  ;;  %v1714_v7 = vsel %vm8157_vm2, %v6165_v13, 0 }
 0x2c2   : > { %1740 = vrot.lane.b32.xlu1 %v1704_v3, %s5306_s13  ;;  %v1716_v3 = vsel %vm1701_vm3, %v5983_v24, 0  ;;  %v1718_v24 = vsel %vm8182_vm5, %v6194_v54, 0 }
 0x2c3   : > { %1488 = vrot.lane.b32.xlu0 %v1436_v34, %s5308_s17  ;;  %v2141_v34 = vrot.slane %v5688_v47, %v5557_v10 }
 0x2c6   : > { %1750 = vrot.lane.b32.xlu1 %v1709_v1, %s5306_s13  ;;  %v1713_v1 = vsel %vm1701_vm3, %v5974_v22, 0  ;;  %v1579_v22 = vsel %vm8156_vm8, %v6220_v30, 0 }
 0x2c7   : > { %1630 = vrot.lane.b32.xlu0 %v1578_v15, %s5307_s27  ;;  %v6397_v15 = vpop.permute.xlu0 %1862 }
 0x2c8   : > { %8258 = vst [vmem:[#allocation29_spill] sm:$0xff] %v6397_v15  ;;  %vm8181_vm8 = vcmp.ne.s16.totalorder %v6397_v15, 0 }
 0x2c9   : > { %v1870_v63 = vsel %vm8181_vm8, %v6073_v21, 0 }
 0x2ca   : > { %1754 = vrot.lane.b32.xlu1 %v1711_v35, %s5306_s13  ;;  %v6399_v35 = vpop.permute.xlu1 %1864 }
 0x2cb   : > { %1744 = vrot.lane.b32.xlu0 %v1706_v27, %s5306_s13  ;;  %8259 = vst [vmem:[#allocation30_spill] sm:$0xff] %v6399_v35  ;;  %v6408_v27 = vsel %vm8186_vm14, %v6397_v15, %v6399_v35 }
 0x2cc   : > { %vm1868_vm6 = vcmp.ne.s16.totalorder %v6408_v27, 0 }
 0x2ce   : > { %1752 = vrot.lane.b32.xlu1 %v1710_v53, %s5306_s13  ;;  %v1720_v53 = vsel %vm8157_vm2, %v6217_v28, 0  ;;  %vm8180_vm2 = vcmp.ne.s16.totalorder %v6399_v35, 0 }
 0x2cf   : > { %1748 = vrot.lane.b32.xlu0 %v1708_v33, %s5306_s13  ;;  %v6420_v33 = vpop.permute.xlu1 %1622 }
 0x2d2   : > { %1490 = vrot.lane.b32.xlu1 %v1437_v12, %s5308_s17  ;;  %v6422_v12 = vpop.permute.xlu0 %1616 }
 0x2d3   : > { %1746 = vrot.lane.b32.xlu0 %v1707_v19, %s5306_s13  ;;  %v1719_v19 = vsel %vm1701_vm3, %v5985_v25, 0  ;;  %v6446_v25 = vld [vmem:[#allocation3 + $0x18] sm:$0xff] }
 0x2d6   : > { %2006 = vrot.lane.b32.xlu1 %v2003_v5, %s5307_s27  ;;  %v1871_v5 = vsel %vm1868_vm6, %v6076_v23, 0 }
 0x2d7   : > { %1756 = vrot.lane.b32.xlu0 %v1712_v41, %s5306_s13  ;;  %v2145_v41 = vrot.slane %v5688_v47, %v5862_v9 }
 0x2da   : > { %1762 = vrot.lane.b32.xlu1 %v1715_v16, %s5306_s13 }
 0x2db   : > { %2004 = vrot.lane.b32.xlu0 %v1999_v56, %s5307_s27 }
 0x2de   : > { %1766 = vrot.lane.b32.xlu1 %v1717_v49, %s5306_s13 }
 0x2df   : > { %1760 = vrot.lane.b32.xlu0 %v1714_v7, %s5306_s13  ;;  %v6441_v7 = vld [vmem:[#allocation3 + $0x38] sm:$0xff] }
 0x2e2   : > { %1764 = vrot.lane.b32.xlu1 %v1716_v3, %s5306_s13 }
 0x2e3   : > { %1758 = vrot.lane.b32.xlu0 %v1713_v1, %s5306_s13  ;;  %v1875_v1 = vsel %vm8180_vm2, %v6441_v7, 0 }
 0x2e6   : > { %2146 = vrot.lane.b32.xlu1 %v2141_v34, %s5308_s17 }
 0x2e7   : > { %1768 = vrot.lane.b32.xlu0 %v1718_v24, %s5306_s13  ;;  %v1872_v24 = vsel %vm8180_vm2, %v6446_v25, 0 }
 0x2ea   : > { %1632 = vrot.lane.b32.xlu1 %v1579_v22, %s5307_s27 }
 0x2eb   : > { %1772 = vrot.lane.b32.xlu0 %v1720_v53, %s5306_s13  ;;  %v1877_v53 = vsel %vm1868_vm6, %v6142_v39, 0 }
 0x2ee   : > { %1908 = vrot.lane.b32.xlu1 %v1871_v5, %s5305_s12  ;;  %v1874_v5 = vsel %vm1868_vm6, %v6116_v61, 0 }
 0x2ef   : > { %1770 = vrot.lane.b32.xlu0 %v1719_v19, %s5306_s13 }
 0x2f0   : > { %v1317_v56 = vpop.permute.xlu1 %1316 }
 0x2f1   : > { %v1319_v16 = vpop.permute.xlu0 %1318  ;;  %v1350_v47 = vsel %vm8194_vm10, %v6235_v37, %v1317_v56 }
 0x2f2   : > { %1906 = vrot.lane.b32.xlu1 %v1870_v63, %s5305_s12  ;;  %v1351_v49 = vsel %vm8194_vm10, %v1317_v56, %v1319_v16  ;;  %v1876_v56 = vsel %vm8181_vm8, %v6139_v31, 0  ;;  %v1873_v16 = vsel %vm8181_vm8, %v6112_v55, 0 }
 0x2f3   : > { %2148 = vrot.lane.b32.xlu0 %v2145_v41, %s5308_s17  ;;  %2745 = vmatprep.subr.bf16.mxu1 %v1351_v49 }
 0x2f4   : > { %2746 = vmatpush1.bf16.msra.mxu1 %v1350_v47  ;;  %v6448_v3 = vpop.permute.xlu1 %1458  ;;  %v6483_v47 = vld [vmem:[#allocation3 + $0x58] sm:$0xff] }
 0x2f5   : > { %v6450_v34 = vpop.permute.xlu0 %1460 }
 0x2f6   : > { %1916 = vrot.lane.b32.xlu1 %v1875_v1, %s5305_s12 }
 0x2f7   : > { %1910 = vrot.lane.b32.xlu0 %v1872_v24, %s5305_s12 }
 0x2f8   : > { %v6460_v37 = vpop.permute.xlu1 %1600 }
 0x2f9   : > { %v6462_v22 = vpop.permute.xlu0 %1602 }
 0x2fa   : > { %1920 = vrot.lane.b32.xlu1 %v1877_v53, %s5305_s12  ;;  %v1721_v53 = vsel %vm8182_vm5, %v6220_v30, 0 }
 0x2fb   : > { %1914 = vrot.lane.b32.xlu0 %v1874_v5, %s5305_s12  ;;  %v6496_v5 = vld [vmem:[#allocation3 + $0x78] sm:$0xff] }
 0x2fc   : > { %v1325_v19 = vpop.permute.xlu1 %1324 }
 0x2fd   : > { %v1323_v41 = vpop.permute.xlu0 %1322 }
 0x2fe   : > { %1918 = vrot.lane.b32.xlu1 %v1876_v56, %s5305_s12  ;;  %v1353_v63 = vsel %vm8194_vm10, %v1323_v41, %v1325_v19  ;;  %v1352_v49 = vsel %vm8194_vm10, %v6250_v45, %v1323_v41  ;;  %v1878_v45 = vsel %vm8180_vm2, %v6483_v47, 0  ;;  %v1881_v56 = vsel %vm8180_vm2, %v6496_v5, 0 }
 0x2ff   : > { %1912 = vrot.lane.b32.xlu0 %v1873_v16, %s5305_s12  ;;  %2747 = vmatprep.subr.bf16.mxu1 %v1353_v63  ;;  %v1880_v16 = vsel %vm1868_vm6, %v6168_v20, 0 }
 0x300   : > { %2748 = vmatpush1.bf16.msra.mxu1 %v1352_v49  ;;  %v6485_v1 = vpop.permute.xlu1 %1466 }
 0x301   : > { %v6487_v24 = vpop.permute.xlu0 %1464 }
 0x302   : > { %1774 = vrot.lane.b32.xlu1 %v1721_v53, %s5306_s13  ;;  %v1883_v53 = vsel %vm1868_vm6, %v6194_v54, 0 }
 0x303   : > { %1922 = vrot.lane.b32.xlu0 %v1878_v45, %s5305_s12  ;;  %v1879_v45 = vsel %vm8181_vm8, %v6165_v13, 0 }
 0x304   : > { %v6499_v19 = vpop.permute.xlu1 %1608 }
 0x305   : > { %v6501_v41 = vpop.permute.xlu0 %1606 }
 0x306   : > { %1928 = vrot.lane.b32.xlu1 %v1881_v56, %s5305_s12 }
 0x307   : > { %1926 = vrot.lane.b32.xlu0 %v1880_v16, %s5305_s12 }
 0x308   : > { %v1329_v63 = vpop.permute.xlu1 %1328 }
 0x309   : > { %v1331_v49 = vpop.permute.xlu0 %1330  ;;  %v1354_v16 = vsel %vm8194_vm10, %v6252_v51, %v1329_v63  ;;  %v2283_v51 = vrot.slane %v5699_v50, %v5557_v10  ;;  %v1885_v10 = vsel %vm8181_vm8, %v6217_v28, 0 }
 0x30a   : > { %1932 = vrot.lane.b32.xlu1 %v1883_v53, %s5305_s12  ;;  %v1355_v56 = vsel %vm8194_vm10, %v1329_v63, %v1331_v49  ;;  %v1882_v53 = vsel %vm8181_vm8, %v6191_v52, 0  ;;  %v1884_v49 = vsel %vm8180_vm2, %v6522_v0, 0 }
 0x30b   : > { %1924 = vrot.lane.b32.xlu0 %v1879_v45, %s5305_s12  ;;  %2749 = vmatprep.subr.bf16.mxu1 %v1355_v56  ;;  %v6541_v56 = vld [vmem:[#allocation3 + $0xb8] sm:$0xff] }
 0x30c   : > { %2750 = vmatpush1.bf16.msra.mxu1 %v1354_v16  ;;  %v1471_v11 = vpop.permute.xlu1 %1470 }
 0x30d   : > { %v1473_v58 = vpop.permute.xlu0 %1472 }
 0x30e   : > { %1930 = vrot.lane.b32.xlu1 %v1882_v53, %s5305_s12  ;;  %v1887_v53 = vsel %vm8180_vm2, %v6541_v56, 0 }
 0x30f   : > { %1934 = vrot.lane.b32.xlu0 %v1884_v49, %s5305_s12 }
 0x310   : > { %v6536_v63 = vpop.permute.xlu1 %1612 }
 0x311   : > { %v6538_v45 = vpop.permute.xlu0 %1614 }
 0x312   : > { %2290 = vrot.lane.b32.xlu1 %v2287_v62, %s5309_s28 }
 0x313   : > { %2288 = vrot.lane.b32.xlu0 %v2283_v51, %s5309_s28 }
 0x314   : > { %v1337_v9 = vpop.permute.xlu1 %1336 }
 0x315   : > { %v1335_v16 = vpop.permute.xlu0 %1334 }
 0x316   : > { %1940 = vrot.lane.b32.xlu1 %v1887_v53, %s5305_s12  ;;  %v1357_v50 = vsel %vm8194_vm10, %v1335_v16, %v1337_v9  ;;  %v1356_v62 = vsel %vm8194_vm10, %v6297_v46, %v1335_v16 }
 0x317   : > { %1936 = vrot.lane.b32.xlu0 %v1885_v10, %s5305_s12  ;;  %2751 = vmatprep.subr.bf16.mxu1 %v1357_v50 }
 0x318   : > { %2752 = vmatpush1.bf16.msra.mxu1 %v1356_v62  ;;  %v1479_v49 = vpop.permute.xlu1 %1478 }
 0x319   : > { %v1477_v51 = vpop.permute.xlu0 %1476 }
 0x31c   : > { %v6555_v42 = vpop.permute.xlu1 %1620 }
 0x31d   : > { %v6557_v35 = vpop.permute.xlu0 %1618 }
 0x320   : > { %v1341_v53 = vpop.permute.xlu1 %1340 }
 0x321   : > { %v1343_v44 = vpop.permute.xlu0 %1342  ;;  %v1358_v9 = vsel %vm8194_vm10, %v6299_v18, %v1341_v53  ;;  %v1493_v18 = vsel %vm8184_vm12, %v6448_v3, %v6450_v34  ;;  %v1497_v34 = vsel %vm8184_vm12, %v1471_v11, %v1473_v58 }
 0x322   : > { %v1359_v15 = vsel %vm8194_vm10, %v1341_v53, %v1343_v44  ;;  %v1492_v53 = vsel %vm8184_vm12, %v6315_v36, %v6448_v3  ;;  %v1496_v36 = vsel %vm8184_vm12, %v6332_v29, %v1471_v11 }
 0x323   : > { %2753 = vmatprep.subr.bf16.mxu1 %v1359_v15 }
 0x324   : > { %2754 = vmatpush1.bf16.msra.mxu1 %v1358_v9  ;;  %v1483_v46 = vpop.permute.xlu1 %1482 }
 0x325   : > { %v1485_v16 = vpop.permute.xlu0 %1484  ;;  %v1500_v11 = vsel %vm8184_vm12, %v6349_v43, %v1483_v46 }
 0x326   : > { %v1501_v58 = vsel %vm8184_vm12, %v1483_v46, %v1485_v16  ;;  %v1635_v16 = vsel %vm8183_vm15, %v6460_v37, %v6462_v22  ;;  %v1637_v22 = vsel %vm8183_vm15, %v6501_v41, %v6499_v19  ;;  %v1639_v19 = vsel %vm8183_vm15, %v6536_v63, %v6538_v45 }
 0x328   : > { %v6562_v10 = vpop.permute.xlu1 %1624 }
 0x329   : > { %v6564_v50 = vpop.permute.xlu0 %1626 }
 0x32c   : > { %v1349_v62 = vpop.permute.xlu1 %1348 }
 0x32d   : > { %v1347_v14 = vpop.permute.xlu0 %1346 }
 0x32e   : > { %v1361_v38 = vsel %vm8194_vm10, %v1347_v14, %v1349_v62  ;;  %v1360_v60 = vsel %vm8194_vm10, %v6313_v6, %v1347_v14 }
 0x32f   : > { %2755 = vmatprep.subr.bf16.mxu1 %v1361_v38  ;;  %v1494_v38 = vsel %vm8184_vm12, %v6330_v48, %v6487_v24  ;;  %v1498_v48 = vsel %vm8184_vm12, %v6347_v40, %v1477_v51 }
 0x330   : > { %2756 = vmatpush1.bf16.msra.mxu1 %v1360_v60  ;;  %v6569_v44 = vpop.permute.xlu1 %1742  ;;  %v1495_v60 = vsel %vm8184_vm12, %v6487_v24, %v6485_v1  ;;  %v1499_v1 = vsel %vm8184_vm12, %v1477_v51, %v1479_v49 }
 0x331   : > { %v6574_v15 = vpop.permute.xlu0 %1628  ;;  %2757 = vmatprep.subr.bf16.mxu1 %v1493_v18 }
 0x334   : > { %2758 = vmatpush1.bf16.msra.mxu1 %v1492_v53  ;;  %v6579_v9 = vpop.permute.xlu1 %1740 }
 0x335   : > { %v1489_v14 = vpop.permute.xlu0 %1488  ;;  %2759 = vmatprep.subr.bf16.mxu1 %v1495_v60 }
 0x336   : > { %v1502_v40 = vsel %vm8184_vm12, %v6363_v57, %v1489_v14  ;;  %v1634_v57 = vsel %vm8183_vm15, %v6365_v59, %v6460_v37  ;;  %v1636_v59 = vsel %vm8183_vm15, %v6378_v2, %v6501_v41  ;;  %v1638_v2 = vsel %vm8183_vm15, %v6380_v4, %v6536_v63 }
 0x337   : > { %v1640_v63 = vsel %vm8183_vm15, %v6422_v12, %v6557_v35 }
 0x338   : > { %2760 = vmatpush1.bf16.msra.mxu1 %v1494_v38  ;;  %v6587_v6 = vpop.permute.xlu1 %1750 }
 0x339   : > { %v6590_v62 = vpop.permute.xlu0 %1630  ;;  %2761 = vmatprep.subr.bf16.mxu1 %v1497_v34 }
 0x33c   : > { %2762 = vmatpush1.bf16.msra.mxu1 %v1496_v36  ;;  %v6594_v3 = vpop.permute.xlu1 %1754 }
 0x33d   : > { %v6597_v18 = vpop.permute.xlu0 %1744  ;;  %2763 = vmatprep.subr.bf16.mxu1 %v1499_v1 }
 0x340   : > { %2764 = vmatpush1.bf16.msra.mxu1 %v1498_v48  ;;  %v6601_v24 = vpop.permute.xlu1 %1752 }
 0x341   : > { %v6604_v53 = vpop.permute.xlu0 %1748  ;;  %2765 = vmatprep.subr.bf16.mxu1 %v1501_v58  ;;  %v1643_v58 = vsel %vm8183_vm15, %v6562_v10, %v6564_v50  ;;  %v1642_v50 = vsel %vm8183_vm15, %v6420_v33, %v6562_v10  ;;  %v1644_v33 = vsel %vm8183_vm15, %v6574_v15, %v6590_v62 }
 0x344   : > { %2766 = vmatpush1.bf16.msra.mxu1 %v1500_v11  ;;  %v1491_v29 = vpop.permute.xlu1 %1490  ;;  %v5081_v11 = vld [vmem:[%s8123_s4 + $0x3c] ss:$28 sps:$4 sm:$0xff]  }
 0x345   : > { %v6608_v49 = vpop.permute.xlu0 %1746  ;;  %v1503_v60 = vsel %vm8184_vm12, %v1489_v14, %v1491_v29 }
 0x346   : > { %2767 = vmatprep.subr.bf16.mxu1 %v1503_v60 }
 0x348   : > { %2768 = vmatpush1.bf16.msra.mxu1 %v1502_v40  ;;  %v6613_v51 = vpop.permute.xlu1 %2006 }
 0x349   : > { %vm2011_vm2 = vcmp.ne.s16.totalorder %v6613_v51, 0  ;;  %v6619_v43 = vpop.permute.xlu0 %1756  ;;  %2769 = vmatprep.subr.bf16.mxu1 %v1635_v16 }
 0x34a   : > { %v2014_v46 = vsel %vm2011_vm2, %v6446_v25, 0  ;;  %v2017_v12 = vsel %vm2011_vm2, %v6441_v7, 0 }
 0x34b   : > { %2052 = vrot.lane.b32.xlu0 %v2014_v46, %s5303_s26 }
 0x34c   : > { %2770 = vmatpush1.bf16.msra.mxu1 %v1634_v57  ;;  %v6628_v14 = vpop.permute.xlu1 %1762  ;;  %v1777_v57 = vsel %vm8186_vm14, %v6569_v44, %v6597_v18 }
 0x34d   : > { %v6633_v38 = vpop.permute.xlu0 %2004  ;;  %2771 = vmatprep.subr.bf16.mxu1 %v1637_v22  ;;  %v5084_v22 = vld [vmem:[%s8123_s4 + $0x74] ss:$28 sps:$4 sm:$0xff]  }
 0x34e   : > { %v6638_v34 = vsel %vm8183_vm15, %v6633_v38, %v6613_v51  ;;  %vm8185_vm5 = vcmp.ne.s16.totalorder %v6633_v38, 0 }
 0x34f   : > { %vm2010_vm8 = vcmp.ne.s16.totalorder %v6638_v34, 0  ;;  %v2012_v4 = vsel %vm8185_vm5, %v6073_v21, 0  ;;  %v2020_v21 = vsel %vm2011_vm2, %v6483_v47, 0 }
 0x350   : > { %2772 = vmatpush1.bf16.msra.mxu1 %v1636_v59  ;;  %v6644_v37 = vpop.permute.xlu1 %1766  ;;  %v2016_v36 = vsel %vm2010_vm8, %v6116_v61, 0  ;;  %v2013_v1 = vsel %vm2010_vm8, %v6076_v23, 0  ;;  %v1641_v23 = vsel %vm8183_vm15, %v6557_v35, %v6555_v42  ;;  %v2015_v61 = vsel %vm8185_vm5, %v6112_v55, 0  ;;  %v5078_v42 = vld [vmem:[%s8123_s4] ss:$28 sps:$4 sm:$0xff]  }
 0x351   : > { %v6656_v48 = vpop.permute.xlu0 %1760  ;;  %2773 = vmatprep.subr.bf16.mxu1 %v1639_v19  ;;  %2056 = vrot.lane.b32.xlu0 %v2016_v36, %s5303_s26  ;;  %v2022_v60 = vsel %vm2010_vm8, %v6168_v20, 0  ;;  %v2019_v16 = vsel %vm2010_vm8, %v6142_v39, 0  ;;  %v5083_v20 = vld [vmem:[%s8123_s4 + $0x38] ss:$28 sps:$4 sm:$0xff]   ;;  %v2021_v39 = vsel %vm8185_vm5, %v6165_v13, 0  ;;  %v1776_v13 = vsel %vm8186_vm14, %v6579_v9, %v6569_v44 }
 0x352   : > { %2050 = vrot.lane.b32.xlu1 %v2013_v1, %s5303_s26  ;;  %v1886_v59 = vsel %vm1868_vm6, %v6220_v30, 0  ;;  %v1779_v19 = vsel %vm8186_vm14, %v6604_v53, %v6587_v6  ;;  %v2023_v44 = vsel %vm2011_vm2, %v6496_v5, 0  ;;  %v1778_v9 = vsel %vm8186_vm14, %v6608_v49, %v6604_v53  ;;  %v5086_v6 = vld [vmem:[%s8123_s4 + $0x70] ss:$28 sps:$4 sm:$0xff]  }
 0x353   : > { %v2026_v1 = vsel %vm2011_vm2, %v6522_v0, 0  ;;  %v2025_v49 = vsel %vm2010_vm8, %v6194_v54, 0  ;;  %v1783_v54 = vsel %vm8186_vm14, %v6656_v48, %v6628_v14 }
 0x354   : > { %2774 = vmatpush1.bf16.msra.mxu1 %v1638_v2  ;;  %v6663_v41 = vpop.permute.xlu1 %1764  ;;  %v1781_v2 = vsel %vm8186_vm14, %v6594_v3, %v6619_v43 }
 0x355   : > { %v6671_v45 = vpop.permute.xlu0 %1758  ;;  %2775 = vmatprep.subr.bf16.mxu1 %v1641_v23  ;;  %2054 = vrot.lane.b32.xlu0 %v2015_v61, %s5303_s26  ;;  %v5087_v23 = vld [vmem:[%s8123_s4 + $0xac] ss:$28 sps:$4 sm:$0xff]   ;;  %v1780_v61 = vsel %vm8186_vm14, %v6601_v24, %v6594_v3  ;;  %v2024_v3 = vsel %vm8185_vm5, %v6191_v52, 0 }
 0x356   : > { %2048 = vrot.lane.b32.xlu1 %v2012_v4, %s5303_s26  ;;  %v2027_v4 = vsel %vm8185_vm5, %v6217_v28, 0  ;;  %v1782_v14 = vsel %vm8186_vm14, %v6671_v45, %v6656_v48  ;;  %v5089_v52 = vld [vmem:[%s8123_s4 + $0xa8] ss:$28 sps:$4 sm:$0xff]   ;;  %v2029_v48 = vsel %vm2011_vm2, %v6541_v56, 0 }
 0x358   : > { %2776 = vmatpush1.bf16.msra.mxu1 %v1640_v63  ;;  %v6684_v55 = vpop.permute.xlu1 %2146 }
 0x359   : > { %v6695_v35 = vpop.permute.xlu0 %1768  ;;  %2818 = vmatprep.subr.bf16.mxu1 %v1643_v58  ;;  %2064 = vrot.lane.b32.xlu0 %v2020_v21, %s5303_s26  ;;  %v5092_v21 = vld [vmem:[%s8123_s4 + $0xc] ss:$28 sps:$4 sm:$0xff]  }
 0x35a   : > { %2058 = vrot.lane.b32.xlu1 %v2017_v12, %s5303_s26  ;;  %v1785_v58 = vsel %vm8186_vm14, %v6644_v37, %v6695_v35  ;;  %v6835_v35 = vld [vmem:[#allocation3 + $0x30] sm:$0xff] }
 0x35b   : > { %2778 = vmatmul.mubr.bf16.vlgmr.msra.gmra.mrb[0].mxu1 %v5078_v42 }
 0x35c   : > { %2819 = vmatpush1.bf16.msra.mxu1 %v1642_v50  ;;  %v1633_v29 = vpop.permute.xlu1 %1632  ;;  %2787 = vmatprep.mubr.bf16.mxu1 %v5081_v11  ;;  %v1784_v11 = vsel %vm8186_vm14, %v6663_v41, %v6644_v37 }
 0x35d   : > { %v6708_v40 = vpop.permute.xlu0 %1772  ;;  %2068 = vrot.lane.b32.xlu0 %v2022_v60, %s5303_s26  ;;  %v1645_v46 = vsel %vm8183_vm15, %v6590_v62, %v1633_v29  ;;  %v2018_v62 = vsel %vm8185_vm5, %v6139_v31, 0  ;;  %v6840_v29 = vld [vmem:[#allocation3 + $0x10] sm:$0xff]  ;;  %vm8187_vm5 = vcmp.ne.s16.totalorder %v6684_v55, 0 }
 0x35e   : > { %2062 = vrot.lane.b32.xlu1 %v2019_v16, %s5303_s26  ;;  %2820 = vmatprep.subr.bf16.mxu1 %v1645_v46  ;;  %v6853_v16 = vld [vmem:[#allocation3 + $0x28] sm:$0xff] }
 0x360   : > { %2821 = vmatpush1.bf16.msra.mxu1 %v1644_v33  ;;  %v6723_v10 = vpop.permute.xlu1 %1908  ;;  %v2157_v33 = vsel %vm8187_vm5, %v6853_v16, 0 }
 0x361   : > { %v6734_v15 = vpop.permute.xlu0 %1770  ;;  %2066 = vrot.lane.b32.xlu0 %v2021_v39, %s5303_s26  ;;  %2822 = vmatprep.subr.bf16.mxu1 %v1777_v57 }
 0x362   : > { %2060 = vrot.lane.b32.xlu1 %v2018_v62, %s5303_s26  ;;  %v1786_v60 = vsel %vm8186_vm14, %v6734_v15, %v6708_v40  ;;  %v6886_v62 = vld [vmem:[#allocation3 + $0x50] sm:$0xff] }
 0x363   : > { %2788 = vmatmul.mubr.bf16.gmra.mrb[4].mxu1 %v5083_v20  ;;  %v6860_v20 = vld [vmem:[#allocation3 + $0x8] sm:$0xff] }
 0x364   : > { %2823 = vmatpush1.bf16.msra.mxu1 %v1776_v13  ;;  %v6744_v18 = vpop.permute.xlu1 %1906  ;;  %2797 = vmatprep.mubr.bf16.mxu1 %v5084_v22  ;;  %v2154_v39 = vsel %vm8187_vm5, %v6860_v20, 0 }
 0x365   : > { %v6752_v31 = vpop.permute.xlu0 %2148  ;;  %1938 = vrot.lane.b32.xlu0 %v1886_v59, %s5305_s12  ;;  %2824 = vmatprep.subr.bf16.mxu1 %v1779_v19  ;;  %v6894_v59 = vld [vmem:[#allocation3 + $0x48] sm:$0xff]  ;;  %v6896_v19 = vld [vmem:[#allocation3 + $0x70] sm:$0xff] }
 0x366   : > { %2070 = vrot.lane.b32.xlu1 %v2023_v44, %s5303_s26  ;;  %vm8188_vm15 = vcmp.ne.s16.totalorder %v6752_v31, 0  ;;  %v6804_v24 = vsel %vm8184_vm12, %v6684_v55, %v6752_v31 }
 0x367   : > { %v2156_v28 = vsel %vm8188_vm15, %v6446_v25, 0  ;;  %vm8192_vm12 = vcmp.ne.s16.totalorder %v6804_v24, 0  ;;  %v2159_v57 = vsel %vm8188_vm15, %v6441_v7, 0 }
 0x368   : > { %2825 = vmatpush1.bf16.msra.mxu1 %v1778_v9  ;;  %v6765_v36 = vpop.permute.xlu1 %1916  ;;  %v2158_v50 = vsel %vm8192_vm12, %v6835_v35, 0  ;;  %v2155_v37 = vsel %vm8192_vm12, %v6840_v29, 0  ;;  %v2161_v13 = vsel %vm8192_vm12, %v6886_v62, 0 }
 0x369   : > { %v6776_v53 = vpop.permute.xlu0 %1910  ;;  %2076 = vrot.lane.b32.xlu0 %v2026_v1, %s5303_s26  ;;  %2826 = vmatprep.subr.bf16.mxu1 %v1781_v2  ;;  %v2160_v1 = vsel %vm8187_vm5, %v6894_v59, 0  ;;  %v6912_v2 = vld [vmem:[#allocation3 + $0x68] sm:$0xff] }
 0x36a   : > { %2074 = vrot.lane.b32.xlu1 %v2025_v49, %s5303_s26  ;;  %v6918_v49 = vld [vmem:[#allocation3 + $0x90] sm:$0xff] }
 0x36b   : > { %2798 = vmatmul.mubr.bf16.gmra.mrb[8].mxu1 %v5086_v6  ;;  %v2164_v6 = vsel %vm8192_vm12, %v6896_v19, 0 }
 0x36c   : > { %2827 = vmatpush1.bf16.msra.mxu1 %v1780_v61  ;;  %v6787_v43 = vpop.permute.xlu1 %1920  ;;  %2807 = vmatprep.mubr.bf16.mxu1 %v5087_v23  ;;  %v2163_v23 = vsel %vm8187_vm5, %v6912_v2, 0  ;;  %v2165_v61 = vsel %vm8188_vm15, %v6496_v5, 0 }
 0x36d   : > { %v6795_v63 = vpop.permute.xlu0 %1914  ;;  %2078 = vrot.lane.b32.xlu0 %v2027_v4, %s5303_s26  ;;  %2828 = vmatprep.subr.bf16.mxu1 %v1783_v54 }
 0x36e   : > { %2072 = vrot.lane.b32.xlu1 %v2024_v3, %s5303_s26  ;;  %v6928_v3 = vld [vmem:[#allocation3 + $0x88] sm:$0xff] }
 0x370   : > { %2829 = vmatpush1.bf16.msra.mxu1 %v1782_v14  ;;  %v6816_v42 = vpop.permute.xlu1 %1918  ;;  %v6934_v14 = vld [vmem:[#allocation3 + $0xb0] sm:$0xff] }
 0x371   : > { %2194 = vrot.lane.b32.xlu0 %v2156_v28, %s5304_s29  ;;  %2830 = vmatprep.subr.bf16.mxu1 %v1785_v58  ;;  %v6829_v45 = vpop.permute.xlu0 %1912  ;;  %v2168_v28 = vsel %vm8188_vm15, %v6522_v0, 0  ;;  %v6942_v58 = vld [vmem:[#allocation3 + $0xa8] sm:$0xff] }
 0x372   : > { %2082 = vrot.lane.b32.xlu1 %v2029_v48, %s5303_s26 }
 0x373   : > { %2808 = vmatmul.mubr.bf16.gmra.mrb[12].mxu1 %v5089_v52  ;;  %v2167_v52 = vsel %vm8192_vm12, %v6918_v49, 0 }
 0x374   : > { %2831 = vmatpush1.bf16.msra.mxu1 %v1784_v11  ;;  %v1775_v12 = vpop.permute.xlu1 %1774  ;;  %2850 = vmatprep.mubr.bf16.mxu1 %v5092_v21  ;;  %v2169_v11 = vsel %vm8187_vm5, %v6942_v58, 0 }
 0x375   : > { %2198 = vrot.lane.b32.xlu0 %v2158_v50, %s5304_s29  ;;  %v1787_v41 = vsel %vm8186_vm14, %v6708_v40, %v1775_v12  ;;  %v6855_v46 = vpop.permute.xlu0 %1922  ;;  %v2028_v40 = vsel %vm2010_vm8, %v6220_v30, 0  ;;  %v2162_v30 = vsel %vm8188_vm15, %v6483_v47, 0  ;;  %v1943_v12 = vsel %vm8193_vm4, %v6723_v10, %v6776_v53 }
 0x376   : > { %2192 = vrot.lane.b32.xlu1 %v2155_v37, %s5304_s29  ;;  %2832 = vmatprep.subr.bf16.mxu1 %v1787_v41  ;;  %v2166_v50 = vsel %vm8187_vm5, %v6928_v3, 0  ;;  %v1942_v37 = vsel %vm8193_vm4, %v6744_v18, %v6723_v10  ;;  %v2170_v53 = vsel %vm8192_vm12, %v6934_v14, 0  ;;  %v2171_v10 = vsel %vm8188_vm15, %v6541_v56, 0 }
 0x378   : > { %2833 = vmatpush1.bf16.msra.mxu1 %v1786_v60  ;;  %v6877_v22 = vpop.permute.xlu1 %1928  ;;  %v1945_v60 = vsel %vm8193_vm4, %v6795_v63, %v6765_v36  ;;  %v5090_v36 = vld [vmem:[%s8123_s4 + $0x8] ss:$28 sps:$4 sm:$0xff]  }
 0x379   : > { %2196 = vrot.lane.b32.xlu0 %v2157_v33, %s5304_s29  ;;  %2834 = vmatprep.subr.bf16.mxu1 %v6840_v29  ;;  %v6879_v15 = vpop.permute.xlu0 %1926  ;;  %v1944_v33 = vsel %vm8193_vm4, %v6829_v45, %v6795_v63  ;;  %v1946_v63 = vsel %vm8193_vm4, %v6816_v42, %v6787_v43  ;;  %v5095_v42 = vld [vmem:[%s8123_s4 + $0x40] ss:$28 sps:$4 sm:$0xff]  }
 0x37a   : > { %2190 = vrot.lane.b32.xlu1 %v2154_v39, %s5304_s29  ;;  %v1947_v39 = vsel %vm8193_vm4, %v6787_v43, %v6855_v46  ;;  %v1949_v45 = vsel %vm8193_vm4, %v6879_v15, %v6877_v22 }
 0x37c   : > { %2835 = vmatpush1.bf16.msra.mxu1 %v6860_v20  ;;  %v6898_v44 = vpop.permute.xlu1 %1932 }
 0x37d   : > { %2080 = vrot.lane.b32.xlu0 %v2028_v40, %s5303_s26  ;;  %2836 = vmatprep.subr.bf16.mxu1 %v6835_v35  ;;  %v6900_v9 = vpop.permute.xlu0 %1924  ;;  %v5093_v40 = vld [vmem:[%s8123_s4 + $0x44] ss:$28 sps:$4 sm:$0xff]  }
 0x37e   : > { %2200 = vrot.lane.b32.xlu1 %v2159_v57, %s5304_s29  ;;  %v1948_v43 = vsel %vm8193_vm4, %v6900_v9, %v6879_v15 }
 0x380   : > { %2837 = vmatpush1.bf16.msra.mxu1 %v6853_v16  ;;  %v6925_v4 = vpop.permute.xlu1 %1930 }
 0x381   : > { %2206 = vrot.lane.b32.xlu0 %v2162_v30, %s5304_s29  ;;  %2838 = vmatprep.subr.bf16.mxu1 %v6886_v62  ;;  %v1935_v54 = vpop.permute.xlu0 %1934  ;;  %v1950_v15 = vsel %vm8193_vm4, %v6925_v4, %v6898_v44  ;;  %v2544_v4 = vld [vmem:[%s8124_s5] sm:$0xff] }
 0x382   : > { %2204 = vrot.lane.b32.xlu1 %v2161_v13, %s5304_s29 }
 0x384   : > { %2839 = vmatpush1.bf16.msra.mxu1 %v6894_v59  ;;  %v6944_v21 = vpop.permute.xlu1 %2290 }
 0x385   : > { %2210 = vrot.lane.b32.xlu0 %v2164_v6, %s5304_s29  ;;  %2840 = vmatprep.subr.bf16.mxu1 %v6896_v19  ;;  %v6946_v48 = vpop.permute.xlu0 %2288  ;;  %vm8190_vm14 = vcmp.ne.s16.totalorder %v6944_v21, 0  ;;  %v5104_v6 = vld [vmem:[%s8123_s4 + $0x14] ss:$28 sps:$4 sm:$0xff]  }
 0x386   : > { %2202 = vrot.lane.b32.xlu1 %v2160_v1, %s5304_s29  ;;  %v6967_v41 = vsel %vm8194_vm10, %v6946_v48, %v6944_v21  ;;  %v2298_v18 = vsel %vm8190_vm14, %v6446_v25, 0  ;;  %vm8189_vm15 = vcmp.ne.s16.totalorder %v6946_v48, 0  ;;  %v2301_v22 = vsel %vm8190_vm14, %v6441_v7, 0  ;;  %v5098_v7 = vld [vmem:[%s8123_s4 + $0x78] ss:$28 sps:$4 sm:$0xff]  }
 0x387   : > { %vm8191_vm5 = vcmp.ne.s16.totalorder %v6967_v41, 0  ;;  %v2299_v57 = vsel %vm8189_vm15, %v6853_v16, 0  ;;  %v2304_v16 = vsel %vm8190_vm14, %v6483_v47, 0  ;;  %v5099_v47 = vld [vmem:[%s8123_s4 + $0xb4] ss:$28 sps:$4 sm:$0xff]   ;;  %v2310_v9 = vsel %vm8190_vm14, %v6522_v0, 0 }
 0x388   : > { %2841 = vmatpush1.bf16.msra.mxu1 %v6912_v2  ;;  %v2297_v25 = vsel %vm8191_vm5, %v6840_v29, 0  ;;  %v2300_v46 = vsel %vm8191_vm5, %v6835_v35, 0  ;;  %v2296_v29 = vsel %vm8189_vm15, %v6860_v20, 0  ;;  %v1951_v35 = vsel %vm8193_vm4, %v6898_v44, %v1935_v54  ;;  %v5096_v20 = vld [vmem:[%s8123_s4 + $0x7c] ss:$28 sps:$4 sm:$0xff]  }
 0x389   : > { %2208 = vrot.lane.b32.xlu0 %v2163_v23, %s5304_s29  ;;  %2842 = vmatprep.subr.bf16.mxu1 %v6918_v49  ;;  %v2303_v30 = vsel %vm8191_vm5, %v6886_v62, 0  ;;  %v2306_v13 = vsel %vm8191_vm5, %v6896_v19, 0  ;;  %v2302_v62 = vsel %vm8189_vm15, %v6894_v59, 0  ;;  %v2305_v44 = vsel %vm8189_vm15, %v6912_v2, 0  ;;  %v5101_v59 = vld [vmem:[%s8123_s4 + $0xb0] ss:$28 sps:$4 sm:$0xff]   ;;  %v1937_v23 = vpop.permute.xlu0 %1936 }
 0x38a   : > { %2212 = vrot.lane.b32.xlu1 %v2165_v61, %s5304_s29  ;;  %v2307_v19 = vsel %vm8190_vm14, %v6496_v5, 0  ;;  %v2309_v5 = vsel %vm8191_vm5, %v6918_v49, 0  ;;  %v2312_v1 = vsel %vm8191_vm5, %v6934_v14, 0  ;;  %v2308_v0 = vsel %vm8189_vm15, %v6928_v3, 0  ;;  %v2545_v61 = vld [vmem:[%s8124_s5 + $0x8] sm:$0xff] }
 0x38b   : > { %v2311_v2 = vsel %vm8189_vm15, %v6942_v58, 0  ;;  %v2313_v49 = vsel %vm8190_vm14, %v6541_v56, 0  ;;  %v2546_v56 = vld [vmem:[%s8124_s5 + $0x10] sm:$0xff]  ;;  %vm8260_vm15 = vcmp.ne.s16.totalorder %v5953_v17, 0 }
 0x38c   : > { %2843 = vmatpush1.bf16.msra.mxu1 %v6928_v3  ;;  %v2547_v3 = vld [vmem:[%s8124_s5 + $0x18] sm:$0xff]  ;;  %vm8261_vm14 = vmmov %vm8260_vm15 }
 0x38d   : > { %2218 = vrot.lane.b32.xlu0 %v2168_v28, %s5304_s29  ;;  %2844 = vmatprep.subr.bf16.mxu1 %v6934_v14  ;;  %v1941_v28 = vpop.permute.xlu1 %1940  ;;  %v2549_v14 = vld [vmem:[%s8124_s5 + $0x28] sm:$0xff]  ;;  %vm8262_vm5 = vmmov %vm8261_vm14 }
 0x38e   : > { %2216 = vrot.lane.b32.xlu1 %v2167_v52, %s5304_s29 }
 0x390   : > { %2845 = vmatpush1.bf16.msra.mxu1 %v6942_v58  ;;  %v2548_v58 = vld [vmem:[%s8124_s5 + $0x20] sm:$0xff] }
 0x391   : > { %2220 = vrot.lane.b32.xlu0 %v2169_v11, %s5304_s29  ;;  %2846 = vmatprep.subr.bf16.mxu1 %v1943_v12  ;;  %v2551_v12 = vld [vmem:[%s8124_s5 + $0x38] sm:$0xff] }
 0x392   : > { %2214 = vrot.lane.b32.xlu1 %v2166_v50, %s5304_s29 }
 0x394   : > { %2847 = vmatpush1.bf16.msra.mxu1 %v1942_v37  ;;  %v2550_v37 = vld [vmem:[%s8124_s5 + $0x30] sm:$0xff] }
 0x395   : > { %2222 = vrot.lane.b32.xlu0 %v2170_v53, %s5304_s29  ;;  %2848 = vmatprep.subr.bf16.mxu1 %v1945_v60  ;;  %v7122_v60 = vld [vmem:[#allocation4 + $0x20] sm:$0xff] }
 0x396   : > { %2224 = vrot.lane.b32.xlu1 %v2171_v10, %s5304_s29  ;;  %v7124_v10 = vld [vmem:[#allocation4] sm:$0xff] }
 0x398   : > { %2849 = vmatpush1.bf16.msra.mxu1 %v1944_v33 }
 0x399   : > { %2891 = vmatprep.subr.bf16.mxu1 %v1947_v39  ;;  %2336 = vrot.lane.b32.xlu0 %v2298_v18, %s5302_s24  ;;  %v3113_v39 = vsel %vm8261_vm14, %v7124_v10, 0  ;;  %vm8264_vm14 = vcmp.ne.s16.totalorder %v5987_v26, 0 }
 0x39a   : > { %2334 = vrot.lane.b32.xlu1 %v2297_v25, %s5302_s24  ;;  %v7136_v25 = vld [vmem:[#allocation4 + $0x40] sm:$0xff]  ;;  %vm8265_vm12 = vmmov %vm8264_vm14 }
 0x39b   : > { %2851 = vmatmul.mubr.bf16.vlgmr.msra.gmra.mrb[0].mxu1 %v5090_v36  ;;  %v3116_v36 = vsel %vm8260_vm15, %v7122_v60, 0  ;;  %vm8263_vm15 = vmmov %vm8262_vm5 }
 0x39c   : > { %2892 = vmatpush1.bf16.msra.mxu1 %v1946_v63  ;;  %2860 = vmatprep.mubr.bf16.mxu1 %v5093_v40  ;;  %v7133_v40 = vld [vmem:[#allocation4 + $0x60] sm:$0xff] }
 0x39d   : > { %2893 = vmatprep.subr.bf16.mxu1 %v1949_v45  ;;  %2340 = vrot.lane.b32.xlu0 %v2300_v46, %s5302_s24  ;;  %v3122_v46 = vsel %vm8262_vm5, %v7133_v40, 0  ;;  %vm8266_vm5 = vmmov %vm8265_vm12 }
 0x39e   : > { %2332 = vrot.lane.b32.xlu1 %v2296_v29, %s5302_s24  ;;  %v3119_v29 = vsel %vm8263_vm15, %v7136_v25, 0  ;;  %vm8267_vm15 = vmmov %vm8266_vm5 }
 0x3a0   : > { %2894 = vmatpush1.bf16.msra.mxu1 %v1948_v43 }
 0x3a1   : > { %2895 = vmatprep.subr.bf16.mxu1 %v1951_v35  ;;  %2338 = vrot.lane.b32.xlu0 %v2299_v57, %s5302_s24  ;;  %v3200_v35 = vsel %vm8264_vm14, %v7122_v60, 0  ;;  %v3197_v57 = vsel %vm8265_vm12, %v7124_v10, 0  ;;  %vm8268_vm12 = vcmask 924672  }
 0x3a2   : > { %2342 = vrot.lane.b32.xlu1 %v2301_v22, %s5302_s24  ;;  %vm8269_vm14 = vmmov %vm8268_vm12 }
 0x3a3   : > { %2861 = vmatmul.mubr.bf16.gmra.mrb[4].mxu1 %v5095_v42 }
 0x3a4   : > { %2896 = vmatpush1.bf16.msra.mxu1 %v1950_v15  ;;  %2870 = vmatprep.mubr.bf16.mxu1 %v5096_v20  ;;  %v3206_v15 = vsel %vm8266_vm5, %v7133_v40, 0  ;;  %vm8270_vm5 = vmmov %vm8268_vm12 }
 0x3a5   : > { %2348 = vrot.lane.b32.xlu0 %v2304_v16, %s5302_s24 }
 0x3a6   : > { %2346 = vrot.lane.b32.xlu1 %v2303_v30, %s5302_s24 }
 0x3a9   : > { %2352 = vrot.lane.b32.xlu0 %v2306_v13, %s5302_s24 }
 0x3aa   : > { %2344 = vrot.lane.b32.xlu1 %v2302_v62, %s5302_s24 }
 0x3ab   : > { %2871 = vmatmul.mubr.bf16.gmra.mrb[8].mxu1 %v5098_v7  ;;  %v3203_v7 = vsel %vm8267_vm15, %v7136_v25, 0  ;;  %vm8271_vm15 = vmmov %vm8270_vm5 }
 0x3ac   : > { %2880 = vmatprep.mubr.bf16.mxu1 %v5099_v47 }
 0x3ad   : > { %2350 = vrot.lane.b32.xlu0 %v2305_v44, %s5302_s24  ;;  %v3284_v44 = vsel %vm1559_vm1, %v7122_v60, 0 }
 0x3ae   : > { %2354 = vrot.lane.b32.xlu1 %v2307_v19, %s5302_s24 }
 0x3b1   : > { %2360 = vrot.lane.b32.xlu0 %v2310_v9, %s5302_s24 }
 0x3b2   : > { %2358 = vrot.lane.b32.xlu1 %v2309_v5, %s5302_s24 }
 0x3b3   : > { %2881 = vmatmul.mubr.bf16.gmra.mrb[12].mxu1 %v5101_v59  ;;  %v3281_v59 = vsel %vm1559_vm1, %v7124_v10, 0 }
 0x3b4   : > { %2923 = vmatprep.mubr.bf16.mxu1 %v5104_v6 }
 0x3b5   : > { %2364 = vrot.lane.b32.xlu0 %v2312_v1, %s5302_s24 }
 0x3b6   : > { %2356 = vrot.lane.b32.xlu1 %v2308_v0, %s5302_s24  ;;  %v3287_v0 = vsel %vm1559_vm1, %v7136_v25, 0 }
 0x3b9   : > { %2362 = vrot.lane.b32.xlu0 %v2311_v2, %s5302_s24 }
 0x3ba   : > { %2366 = vrot.lane.b32.xlu1 %v2313_v49, %s5302_s24 }
 0x3bd   : > { %2559 = vperm.xlu0 %5056, %v2545_v61   ;;  %v2053_v54 = vpop.permute.xlu0 %2052 }
 0x3be   : > { %2554 = vperm.xlu1 %5057, %v2544_v4  }
 0x3c1   : > { %2569 = vperm.xlu0 %5056, %v2547_v3  }
 0x3c2   : > { %2564 = vperm.xlu1 %5057, %v2546_v56  }
 0x3c3   : > { %v2057_v52 = vpop.permute.xlu0 %2056 }
 0x3c4   : > { %v2051_v11 = vpop.permute.xlu1 %2050 }
 0x3c5   : > { %2579 = vperm.xlu0 %5056, %v2549_v14   ;;  %v2085_v13 = vsel %vm8268_vm12, %v2051_v11, %v2053_v54  ;;  %vm8272_vm12 = vmmov %vm8270_vm5 }
 0x3c6   : > { %2574 = vperm.xlu1 %5057, %v2548_v58  }
 0x3c7   : > { %v2055_v50 = vpop.permute.xlu0 %2054 }
 0x3c8   : > { %v2049_v53 = vpop.permute.xlu1 %2048  ;;  %v2086_v1 = vsel %vm8271_vm15, %v2055_v50, %v2057_v52  ;;  %vm8274_vm15 = vmmov %vm8270_vm5 }
 0x3c9   : > { %2589 = vperm.xlu0 %5056, %v2551_v12   ;;  %v2084_v19 = vsel %vm8269_vm14, %v2049_v53, %v2051_v11  ;;  %vm8273_vm14 = vmmov %vm8270_vm5 }
 0x3ca   : > { %2584 = vperm.xlu1 %5057, %v2550_v37  }
 0x3cb   : > { %v2065_v18 = vpop.permute.xlu0 %2064 }
 0x3cc   : > { %v2059_v33 = vpop.permute.xlu1 %2058 }
 0x3cd   : > { %3143 = vrot.lane.b32.xlu0 %v3116_v36, %s5309_s28  ;;  %v2087_v9 = vsel %vm8270_vm5, %v2057_v52, %v2059_v33 }
 0x3ce   : > { %3137 = vrot.lane.b32.xlu1 %v3113_v39, %s5309_s28 }
 0x3cf   : > { %v2069_v63 = vpop.permute.xlu0 %2068 }
 0x3d0   : > { %v2063_v45 = vpop.permute.xlu1 %2062 }
 0x3d1   : > { %3155 = vrot.lane.b32.xlu0 %v3122_v46, %s5309_s28  ;;  %v2089_v2 = vsel %vm8272_vm12, %v2063_v45, %v2065_v18 }
 0x3d2   : > { %3149 = vrot.lane.b32.xlu1 %v3119_v29, %s5309_s28 }
 0x3d3   : > { %v2067_v43 = vpop.permute.xlu0 %2066 }
 0x3d4   : > { %v2061_v42 = vpop.permute.xlu1 %2060  ;;  %v2090_v56 = vsel %vm8274_vm15, %v2067_v43, %v2069_v63 }
 0x3d5   : > { %3227 = vrot.lane.b32.xlu0 %v3200_v35, %s5308_s17  ;;  %v2088_v61 = vsel %vm8273_vm14, %v2061_v42, %v2063_v45 }
 0x3d6   : > { %3221 = vrot.lane.b32.xlu1 %v3197_v57, %s5308_s17 }
 0x3d7   : > { %v1939_v20 = vpop.permute.xlu0 %1938 }
 0x3d8   : > { %v2071_v22 = vpop.permute.xlu1 %2070  ;;  %v1953_v16 = vsel %vm8193_vm4, %v1939_v20, %v1941_v28  ;;  %v1952_v30 = vsel %vm8193_vm4, %v1937_v23, %v1939_v20  ;;  %vm8275_vm4 = vmmov %vm8270_vm5 }
 0x3d9   : > { %3239 = vrot.lane.b32.xlu0 %v3206_v15, %s5308_s17  ;;  %2897 = vmatprep.subr.bf16.mxu1 %v1953_v16  ;;  %v2091_v4 = vsel %vm8270_vm5, %v2069_v63, %v2071_v22  ;;  %vm8276_vm12 = vmmov %vm8275_vm4  ;;  %vm8279_vm5 = vcmask 916480  }
 0x3da   : > { %3233 = vrot.lane.b32.xlu1 %v3203_v7, %s5308_s17  ;;  %2898 = vmatpush1.bf16.msra.mxu1 %v1952_v30  ;;  %vm8277_vm14 = vmmov %vm8275_vm4 }
 0x3db   : > { %v2077_v47 = vpop.permute.xlu0 %2076  ;;  %2899 = vmatprep.subr.bf16.mxu1 %v2085_v13  ;;  %vm8278_vm10 = vmmov %vm8275_vm4 }
 0x3dc   : > { %v2075_v62 = vpop.permute.xlu1 %2074 }
 0x3dd   : > { %3311 = vrot.lane.b32.xlu0 %v3284_v44, %s5307_s27  ;;  %v2093_v28 = vsel %vm8275_vm4, %v2075_v62, %v2077_v47  ;;  %vm8280_vm4 = vmmov %vm8279_vm5 }
 0x3de   : > { %3305 = vrot.lane.b32.xlu1 %v3281_v59, %s5307_s27  ;;  %2900 = vmatpush1.bf16.msra.mxu1 %v2084_v19  ;;  %vm8281_vm15 = vmmov %vm8280_vm4  ;;  %v5102_v59 = vld [vmem:[%s8123_s4 + $0x10] ss:$28 sps:$4 sm:$0xff]  }
 0x3df   : > { %v2079_v6 = vpop.permute.xlu0 %2078  ;;  %2901 = vmatprep.subr.bf16.mxu1 %v2087_v9 }
 0x3e0   : > { %v2073_v5 = vpop.permute.xlu1 %2072 }
 0x3e1   : > { %v2092_v58 = vsel %vm8276_vm12, %v2073_v5, %v2075_v62  ;;  %vm8282_vm12 = vmmov %vm8280_vm4 }
 0x3e2   : > { %3317 = vrot.lane.b32.xlu1 %v3287_v0, %s5307_s27  ;;  %2902 = vmatpush1.bf16.msra.mxu1 %v2086_v1 }
 0x3e3   : > { %v2195_v23 = vpop.permute.xlu0 %2194  ;;  %2903 = vmatprep.subr.bf16.mxu1 %v2089_v2 }
 0x3e4   : > { %v2083_v49 = vpop.permute.xlu1 %2082 }
 0x3e6   : > { %2904 = vmatpush1.bf16.msra.mxu1 %v2088_v61 }
 0x3e7   : > { %v2199_v54 = vpop.permute.xlu0 %2198  ;;  %2905 = vmatprep.subr.bf16.mxu1 %v2091_v4  ;;  %v5108_v4 = vld [vmem:[%s8123_s4 + $0x84] ss:$28 sps:$4 sm:$0xff]  }
 0x3e8   : > { %v2193_v3 = vpop.permute.xlu1 %2192 }
 0x3e9   : > { %v2227_v53 = vsel %vm8279_vm5, %v2193_v3, %v2195_v23  ;;  %vm8285_vm5 = vmmov %vm8280_vm4 }
 0x3ea   : > { %2906 = vmatpush1.bf16.msra.mxu1 %v2090_v56 }
 0x3eb   : > { %v2197_v14 = vpop.permute.xlu0 %2196  ;;  %2907 = vmatprep.subr.bf16.mxu1 %v2093_v28 }
 0x3ec   : > { %v2191_v52 = vpop.permute.xlu1 %2190  ;;  %v2228_v46 = vsel %vm8282_vm12, %v2197_v14, %v2199_v54  ;;  %vm8287_vm12 = vmmov %vm8280_vm4 }
 0x3ed   : > { %v2226_v36 = vsel %vm8280_vm4, %v2191_v52, %v2193_v3 }
 0x3ee   : > { %2908 = vmatpush1.bf16.msra.mxu1 %v2092_v58 }
 0x3ef   : > { %v2081_v11 = vpop.permute.xlu0 %2080 }
 0x3f0   : > { %v2201_v12 = vpop.permute.xlu1 %2200  ;;  %v2095_v50 = vsel %vm8277_vm14, %v2081_v11, %v2083_v49  ;;  %v2094_v37 = vsel %vm8278_vm10, %v2079_v6, %v2081_v11  ;;  %vm8283_vm14 = vmmov %vm8280_vm4  ;;  %v5105_v6 = vld [vmem:[%s8123_s4 + $0x4c] ss:$28 sps:$4 sm:$0xff]   ;;  %v5110_v11 = vld [vmem:[%s8123_s4 + $0x80] ss:$28 sps:$4 sm:$0xff]  }
 0x3f1   : > { %2909 = vmatprep.subr.bf16.mxu1 %v2095_v50  ;;  %v2229_v39 = vsel %vm8281_vm15, %v2199_v54, %v2201_v12  ;;  %vm8284_vm10 = vmmov %vm8280_vm4  ;;  %v5107_v49 = vld [vmem:[%s8123_s4 + $0x48] ss:$28 sps:$4 sm:$0xff]   ;;  %v5111_v50 = vld [vmem:[%s8123_s4 + $0xbc] ss:$28 sps:$4 sm:$0xff]  }
 0x3f2   : > { %2910 = vmatpush1.bf16.msra.mxu1 %v2094_v37  ;;  %vm8286_vm15 = vmmov %vm8280_vm4 }
 0x3f3   : > { %v2207_v18 = vpop.permute.xlu0 %2206  ;;  %2911 = vmatprep.subr.bf16.mxu1 %v2227_v53 }
 0x3f4   : > { %v2205_v33 = vpop.permute.xlu1 %2204 }
 0x3f5   : > { %v2231_v29 = vsel %vm8283_vm14, %v2205_v33, %v2207_v18  ;;  %vm8288_vm14 = vmmov %vm8280_vm4 }
 0x3f6   : > { %2912 = vmatpush1.bf16.msra.mxu1 %v2226_v36 }
 0x3f7   : > { %v2211_v63 = vpop.permute.xlu0 %2210  ;;  %2913 = vmatprep.subr.bf16.mxu1 %v2229_v39 }
 0x3f8   : > { %v2203_v45 = vpop.permute.xlu1 %2202 }
 0x3f9   : > { %v2230_v35 = vsel %vm8284_vm10, %v2203_v45, %v2205_v33  ;;  %vm8289_vm10 = vmmov %vm8280_vm4 }
 0x3fa   : > { %2914 = vmatpush1.bf16.msra.mxu1 %v2228_v46 }
 0x3fb   : > { %v2209_v43 = vpop.permute.xlu0 %2208  ;;  %2915 = vmatprep.subr.bf16.mxu1 %v2231_v29 }
 0x3fc   : > { %v2213_v42 = vpop.permute.xlu1 %2212  ;;  %v2232_v15 = vsel %vm8280_vm4, %v2209_v43, %v2211_v63 }
 0x3fd   : > { %v2233_v57 = vsel %vm8285_vm5, %v2211_v63, %v2213_v42  ;;  %vm8290_vm5 = vcmask 908288   ;;  %v5113_v63 = vld [vmem:[%s8123_s4 + $0xb8] ss:$28 sps:$4 sm:$0xff]   ;;  %v8298_v42 = vmov 0  }
 0x3fe   : > { %2916 = vmatpush1.bf16.msra.mxu1 %v2230_v35  ;;  %vm8291_vm4 = vmmov %vm8290_vm5 }
 0x3ff   : > { %v2219_v20 = vpop.permute.xlu0 %2218  ;;  %2917 = vmatprep.subr.bf16.mxu1 %v2233_v57 }
 0x400   : > { %v2217_v22 = vpop.permute.xlu1 %2216 }
 0x401   : > { %v2235_v16 = vsel %vm8286_vm15, %v2217_v22, %v2219_v20  ;;  %vm8292_vm15 = vmmov %vm8291_vm4 }
 0x402   : > { %2918 = vmatpush1.bf16.msra.mxu1 %v2232_v15 }
 0x403   : > { %v2221_v30 = vpop.permute.xlu0 %2220  ;;  %2919 = vmatprep.subr.bf16.mxu1 %v2235_v16  ;;  %v5114_v16 = vld [vmem:[%s8123_s4 + $0x18] ss:$28 sps:$4 sm:$0xff]  }
 0x404   : > { %v2215_v7 = vpop.permute.xlu1 %2214 }
 0x405   : > { %v2234_v13 = vsel %vm8287_vm12, %v2215_v7, %v2217_v22  ;;  %vm8293_vm12 = vmmov %vm8291_vm4  ;;  %v5116_v7 = vld [vmem:[%s8123_s4 + $0x88] ss:$28 sps:$4 sm:$0xff]  }
 0x406   : > { %2920 = vmatpush1.bf16.msra.mxu1 %v2234_v13  ;;  %v5117_v13 = vld [vmem:[%s8123_s4 + $0xc0] ss:$28 sps:$4 sm:$0xff]  }
 0x407   : > { %v2223_v47 = vpop.permute.xlu0 %2222 }
 0x408   : > { %v2225_v62 = vpop.permute.xlu1 %2224  ;;  %v2236_v44 = vsel %vm8288_vm14, %v2221_v30, %v2223_v47  ;;  %vm8294_vm14 = vmmov %vm8291_vm4  ;;  %v5115_v30 = vld [vmem:[%s8123_s4 + $0x50] ss:$28 sps:$4 sm:$0xff]  }
 0x409   : > { %v2237_v19 = vsel %vm8289_vm10, %v2223_v47, %v2225_v62  ;;  %vm8295_vm10 = vmmov %vm8291_vm4 }
 0x40a   : > { %2921 = vmatprep.subr.bf16.mxu1 %v2237_v19 }
 0x40b   : > { %2922 = vmatpush1.bf16.msra.mxu1 %v2236_v44  ;;  %v2337_v9 = vpop.permute.xlu0 %2336 }
 0x40c   : > { %v2335_v5 = vpop.permute.xlu1 %2334 }
 0x40d   : > { %v2369_v1 = vsel %vm8290_vm5, %v2335_v5, %v2337_v9  ;;  %vm8296_vm5 = vmmov %vm8291_vm4 }
 0x40e   : > { %2964 = vmatprep.subr.bf16.mxu1 %v2369_v1  ;;  %2924 = vmatmul.mubr.bf16.vlgmr.msra.gmra.mrb[0].mxu1 %v5102_v59 }
 0x40f   : > { %v2341_v0 = vpop.permute.xlu0 %2340  ;;  %2933 = vmatprep.mubr.bf16.mxu1 %v5105_v6 }
 0x410   : > { %v2333_v2 = vpop.permute.xlu1 %2332 }
 0x411   : > { %v2368_v23 = vsel %vm8291_vm4, %v2333_v2, %v2335_v5 }
 0x412   : > { %2965 = vmatpush1.bf16.msra.mxu1 %v2368_v23 }
 0x413   : > { %v2339_v61 = vpop.permute.xlu0 %2338 }
 0x414   : > { %v2370_v54 = vsel %vm8292_vm15, %v2339_v61, %v2341_v0  ;;  %v2343_v3 = vpop.permute.xlu1 %2342  ;;  %vm8297_vm15 = vmmov %vm8291_vm4 }
 0x415   : > { %v2371_v56 = vsel %vm8293_vm12, %v2341_v0, %v2343_v3  ;;  %vm8299_vm12 = vmmov %vm8291_vm4 }
 0x416   : > { %2966 = vmatprep.subr.bf16.mxu1 %v2371_v56  ;;  %2934 = vmatmul.mubr.bf16.gmra.mrb[4].mxu1 %v5107_v49 }
 0x417   : > { %2967 = vmatpush1.bf16.msra.mxu1 %v2370_v54  ;;  %v2349_v28 = vpop.permute.xlu0 %2348  ;;  %2943 = vmatprep.mubr.bf16.mxu1 %v5108_v4 }
 0x418   : > { %v2347_v14 = vpop.permute.xlu1 %2346 }
 0x419   : > { %v2373_v52 = vsel %vm8294_vm14, %v2347_v14, %v2349_v28  ;;  %vm8300_vm14 = vmmov %vm8291_vm4 }
 0x41a   : > { %2968 = vmatprep.subr.bf16.mxu1 %v2373_v52 }
 0x41b   : > { %v2353_v58 = vpop.permute.xlu0 %2352 }
 0x41c   : > { %v2345_v12 = vpop.permute.xlu1 %2344 }
 0x41d   : > { %v2372_v37 = vsel %vm8295_vm10, %v2345_v12, %v2347_v14  ;;  %vm8301_vm10 = vmmov %vm8291_vm4 }
 0x41e   : > { %2969 = vmatpush1.bf16.msra.mxu1 %v2372_v37 }
 0x41f   : > { %v2351_v53 = vpop.permute.xlu0 %2350  ;;  %2944 = vmatmul.mubr.bf16.gmra.mrb[8].mxu1 %v5110_v11 }
 0x420   : > { %v2374_v18 = vsel %vm8296_vm5, %v2351_v53, %v2353_v58  ;;  %v2355_v33 = vpop.permute.xlu1 %2354  ;;  %2953 = vmatprep.mubr.bf16.mxu1 %v5111_v50  ;;  %vm2732_vm5 = vcmask 785408  }
 0x421   : > { %v2375_v36 = vsel %vm8291_vm4, %v2353_v58, %v2355_v33 }
 0x422   : > { %2970 = vmatprep.subr.bf16.mxu1 %v2375_v36 }
 0x423   : > { %2971 = vmatpush1.bf16.msra.mxu1 %v2374_v18  ;;  %v2361_v39 = vpop.permute.xlu0 %2360 }
 0x424   : > { %v2359_v45 = vpop.permute.xlu1 %2358 }
 0x425   : > { %v2377_v46 = vsel %vm8297_vm15, %v2359_v45, %v2361_v39 }
 0x426   : > { %2972 = vmatprep.subr.bf16.mxu1 %v2377_v46 }
 0x427   : > { %v2365_v29 = vpop.permute.xlu0 %2364  ;;  %2954 = vmatmul.mubr.bf16.gmra.mrb[12].mxu1 %v5113_v63 }
 0x428   : > { %v2357_v43 = vpop.permute.xlu1 %2356  ;;  %2996 = vmatprep.mubr.bf16.mxu1 %v8298_v42 }
 0x429   : > { %v2376_v35 = vsel %vm8299_vm12, %v2357_v43, %v2359_v45 }
 0x42a   : > { %2973 = vmatpush1.bf16.msra.mxu1 %v2376_v35 }
 0x42b   : > { %v2363_v57 = vpop.permute.xlu0 %2362 }
 0x42c   : > { %v2378_v20 = vsel %vm8300_vm14, %v2363_v57, %v2365_v29  ;;  %v2367_v22 = vpop.permute.xlu1 %2366 }
 0x42d   : > { %v2379_v15 = vsel %vm8301_vm10, %v2365_v29, %v2367_v22 }
 0x42e   : > { %2974 = vmatprep.subr.bf16.mxu1 %v2379_v15 }
 0x42f   : > { %2975 = vmatpush1.bf16.msra.mxu1 %v2378_v20 }
 0x432   : > { %4836 = vmatmul.mubr.msk.bf16.vlgmr.msra.gmra.mrb[0].mxu1 %vm2732_vm5, %v5114_v16 }
 0x433   : > { %3006 = vmatprep.mubr.bf16.mxu1 %v8298_v42 }
 0x43a   : > { %4837 = vmatmul.mubr.msk.bf16.gmra.mrb[4].mxu1 %vm2732_vm5, %v5115_v30 }
 0x43b   : > { %3016 = vmatprep.mubr.bf16.mxu1 %v8298_v42 }
 0x43c   : > { %v2560_v59 = vpop.permute.xlu0 %2559 }
 0x43d   : > { %v2555_v47 = vpop.permute.xlu1 %2554 }
 0x440   : > { %v2570_v50 = vpop.permute.xlu0 %2569 }
 0x441   : > { %v2565_v3 = vpop.permute.xlu1 %2564 }
 0x442   : > { %4838 = vmatmul.mubr.msk.bf16.gmra.mrb[8].mxu1 %vm2732_vm5, %v5116_v7 }
 0x443   : > { %3026 = vmatprep.mubr.bf16.mxu1 %v8298_v42 }
 0x445   : > { %v2575_v7 = vpop.permute.xlu1 %2574 }
 0x44a   : > { %4839 = vmatmul.mubr.msk.bf16.gmra.mrb[12].mxu1 %vm2732_vm5, %v5117_v13 }
 0x505   : > { %v2998_v62 = vpop.f32.mrb[0].mxu1 }
 0x506   : > { %v4861_v44 = vadd.f32 %v2998_v62, %v2555_v47  ;;  %v3000_v19 = vpop.f32.mrb[1].mxu1 }
 0x507   : > { %v4862_v9 = vadd.f32 %v3000_v19, %v2555_v47  ;;  %v3002_v6 = vpop.f32.mrb[2].mxu1 }
 0x508   : > { %v3053_v5 = vmul.f32 0.2, %v4861_v44  ;;  %v4863_v1 = vadd.f32 %v3002_v6, %v2560_v59  ;;  %v3004_v0 = vpop.f32.mrb[3].mxu1  ;;  %vm3037_vm4 = vcmp.gt.f32.partialorder %v4861_v44, 0.0  ;;  %v2580_v6 = vpop.permute.xlu0 %2579 }
 0x509   : > { %v3054_v2 = vmul.f32 0.2, %v4862_v9  ;;  %v4864_v23 = vadd.f32 %v3004_v0, %v2560_v59  ;;  %vm3038_vm15 = vcmp.gt.f32.partialorder %v4862_v9, 0.0 }
 0x50a   : > { %vm3039_vm12 = vcmp.gt.f32.partialorder %v4863_v1, 0.0  ;;  %v3055_v49 = vmul.f32 0.2, %v4863_v1  ;;  %v3069_v4 = vsel %vm3037_vm4, %v4861_v44, %v3053_v5 }
 0x50b   : > { %vm3040_vm14 = vcmp.gt.f32.partialorder %v4864_v23, 0.0  ;;  %v3056_v61 = vmul.f32 0.2, %v4864_v23  ;;  %v3070_v56 = vsel %vm3038_vm15, %v4862_v9, %v3054_v2 }
 0x50c   : > { %v3071_v54 = vsel %vm3039_vm12, %v4863_v1, %v3055_v49 }
 0x50d   : > { %v7249_v28 = vpack.c.bf16 %v3071_v54, %v3069_v4  ;;  %v3072_v14 = vsel %vm3040_vm14, %v4864_v23, %v3056_v61  ;;  %v3008_v52 = vpop.f32.mrb[4].mxu1  ;;  %v8306_v4 = vld [vmem:[#allocation24_spill] sm:$0xff] }
 0x50e   : > { %v7251_v58 = vpack.c.bf16 %v3072_v14, %v3070_v56  ;;  %v4865_v11 = vadd.f32 %v3008_v52, %v2565_v3  ;;  %v3010_v12 = vpop.f32.mrb[5].mxu1  ;;  %vm8307_vm12 = vcmp.ne.s16.totalorder %v8306_v4, 0 }
 0x50f   : > { %v4866_v37 = vadd.f32 %v3010_v12, %v2565_v3  ;;  %v3012_v53 = vpop.f32.mrb[6].mxu1  ;;  %v3114_v18 = vsel %vm1276_vm9, %v7249_v28, 0  ;;  %v3198_v20 = vsel %vm1418_vm0, %v7249_v28, 0  ;;  %v3282_v2 = vsel %vm1560_vm11, %v7249_v28, 0 }
 0x510   : > { %v3057_v33 = vmul.f32 0.2, %v4865_v11  ;;  %v4867_v36 = vadd.f32 %v3012_v53, %v2570_v50  ;;  %v3014_v39 = vpop.f32.mrb[7].mxu1  ;;  %3139 = vrot.lane.b32.xlu1 %v3114_v18, %s5309_s28  ;;  %v3115_v45 = vsel %vm1277_vm7, %v7251_v58, 0  ;;  %vm3041_vm10 = vcmp.gt.f32.partialorder %v4865_v11, 0.0  ;;  %v2585_v53 = vpop.permute.xlu1 %2584 }
 0x511   : > { %v3058_v46 = vmul.f32 0.2, %v4866_v37  ;;  %v4868_v29 = vadd.f32 %v3014_v39, %v2570_v50  ;;  %3141 = vrot.lane.b32.xlu0 %v3115_v45, %s5309_s28  ;;  %vm3042_vm5 = vcmp.gt.f32.partialorder %v4866_v37, 0.0  ;;  %v3199_v30 = vsel %vm1419_vm13, %v7251_v58, 0 }
 0x512   : > { %vm3043_vm4 = vcmp.gt.f32.partialorder %v4867_v36, 0.0  ;;  %v3059_v43 = vmul.f32 0.2, %v4867_v36  ;;  %v3073_v22 = vsel %vm3041_vm10, %v4865_v11, %v3057_v33  ;;  %v3283_v54 = vsel %vm8307_vm12, %v7251_v58, 0 }
 0x513   : > { %vm3044_vm15 = vcmp.gt.f32.partialorder %v4868_v29, 0.0  ;;  %v3060_v35 = vmul.f32 0.2, %v4868_v29  ;;  %v3074_v13 = vsel %vm3042_vm5, %v4866_v37, %v3058_v46 }
 0x514   : > { %v3075_v15 = vsel %vm3043_vm4, %v4867_v36, %v3059_v43  ;;  %3223 = vrot.lane.b32.xlu1 %v3198_v20, %s5308_s17  ;;  %v2590_v43 = vpop.permute.xlu0 %2589 }
 0x515   : > { %v7268_v47 = vpack.c.bf16 %v3075_v15, %v3073_v22  ;;  %v3076_v62 = vsel %vm3044_vm15, %v4868_v29, %v3060_v35  ;;  %v3018_v44 = vpop.f32.mrb[8].mxu1  ;;  %3225 = vrot.lane.b32.xlu0 %v3199_v30, %s5308_s17 }
 0x516   : > { %v7271_v19 = vpack.c.bf16 %v3076_v62, %v3074_v13  ;;  %v4869_v59 = vadd.f32 %v3018_v44, %v2575_v7  ;;  %v3020_v9 = vpop.f32.mrb[9].mxu1 }
 0x517   : > { %v4870_v5 = vadd.f32 %v3020_v9, %v2575_v7  ;;  %v3022_v1 = vpop.f32.mrb[10].mxu1  ;;  %v3117_v37 = vsel %vm1276_vm9, %v7268_v47, 0  ;;  %v3201_v13 = vsel %vm1418_vm0, %v7268_v47, 0 }
 0x518   : > { %v3061_v23 = vmul.f32 0.2, %v4869_v59  ;;  %v4871_v49 = vadd.f32 %v3022_v1, %v2580_v6  ;;  %v3024_v61 = vpop.f32.mrb[11].mxu1  ;;  %3307 = vrot.lane.b32.xlu1 %v3282_v2, %s5307_s27  ;;  %vm3045_vm14 = vcmp.gt.f32.partialorder %v4869_v59, 0.0  ;;  %v3118_v11 = vsel %vm1277_vm7, %v7271_v19, 0 }
 0x519   : > { %v3062_v3 = vmul.f32 0.2, %v4870_v5  ;;  %v4872_v56 = vadd.f32 %v3024_v61, %v2580_v6  ;;  %3309 = vrot.lane.b32.xlu0 %v3283_v54, %s5307_s27  ;;  %vm3046_vm10 = vcmp.gt.f32.partialorder %v4870_v5, 0.0  ;;  %v3202_v22 = vsel %vm1419_vm13, %v7271_v19, 0 }
 0x51a   : > { %vm3047_vm5 = vcmp.gt.f32.partialorder %v4871_v49, 0.0  ;;  %v3063_v14 = vmul.f32 0.2, %v4871_v49  ;;  %v3077_v12 = vsel %vm3045_vm14, %v4869_v59, %v3061_v23  ;;  %v3285_v2 = vsel %vm1560_vm11, %v7268_v47, 0 }
 0x51b   : > { %vm3048_vm4 = vcmp.gt.f32.partialorder %v4872_v56, 0.0  ;;  %v3064_v52 = vmul.f32 0.2, %v4872_v56  ;;  %v3078_v18 = vsel %vm3046_vm10, %v4870_v5, %v3062_v3 }
 0x51c   : > { %v3079_v50 = vsel %vm3047_vm5, %v4871_v49, %v3063_v14  ;;  %3147 = vrot.lane.b32.xlu1 %v3118_v11, %s5309_s28  ;;  %vm8308_vm5 = vcmp.ne.s16.totalorder %v8306_v4, 0 }
 0x51d   : > { %v7288_v33 = vpack.c.bf16 %v3079_v50, %v3077_v12  ;;  %v3080_v36 = vsel %vm3048_vm4, %v4872_v56, %v3064_v52  ;;  %v3028_v39 = vpop.f32.mrb[12].mxu1  ;;  %3145 = vrot.lane.b32.xlu0 %v3117_v37, %s5309_s28  ;;  %v3286_v6 = vsel %vm8308_vm5, %v7271_v19, 0  ;;  %vm8309_vm4 = vmmov %vm8308_vm5 }
 0x51e   : > { %v7291_v45 = vpack.c.bf16 %v3080_v36, %v3078_v18  ;;  %v4873_v46 = vadd.f32 %v3028_v39, %v2585_v53  ;;  %v3030_v29 = vpop.f32.mrb[13].mxu1  ;;  %v3290_v36 = vsel %vm1559_vm1, %v7133_v40, 0 }
 0x51f   : > { %v4874_v35 = vadd.f32 %v3030_v29, %v2585_v53  ;;  %v3032_v20 = vpop.f32.mrb[14].mxu1  ;;  %v3120_v3 = vsel %vm1276_vm9, %v7288_v33, 0  ;;  %v3204_v14 = vsel %vm1418_vm0, %v7288_v33, 0  ;;  %v3288_v11 = vsel %vm1560_vm11, %v7288_v33, 0  ;;  %v8310_v53 = vld [vmem:[#allocation28_spill] sm:$0xff] }
 0x520   : > { %v3065_v15 = vmul.f32 0.2, %v4873_v46  ;;  %v4875_v30 = vadd.f32 %v3032_v20, %v2590_v43  ;;  %v3034_v7 = vpop.f32.mrb[15].mxu1  ;;  %3231 = vrot.lane.b32.xlu1 %v3202_v22, %s5308_s17  ;;  %vm3049_vm15 = vcmp.gt.f32.partialorder %v4873_v46, 0.0  ;;  %v3121_v56 = vsel %vm1277_vm7, %v7291_v45, 0 }
 0x521   : > { %v3066_v62 = vmul.f32 0.2, %v4874_v35  ;;  %v4876_v44 = vadd.f32 %v3034_v7, %v2590_v43  ;;  %3229 = vrot.lane.b32.xlu0 %v3201_v13, %s5308_s17  ;;  %vm3050_vm12 = vcmp.gt.f32.partialorder %v4874_v35, 0.0  ;;  %v3205_v52 = vsel %vm1419_vm13, %v7291_v45, 0  ;;  %v8313_v43 = vld [vmem:[#allocation27_spill] sm:$0xff] }
 0x522   : > { %vm3051_vm14 = vcmp.gt.f32.partialorder %v4875_v30, 0.0  ;;  %v3067_v59 = vmul.f32 0.2, %v4875_v30  ;;  %v3081_v5 = vsel %vm3049_vm15, %v4873_v46, %v3065_v15  ;;  %v3289_v12 = vsel %vm8309_vm4, %v7291_v45, 0 }
 0x523   : > { %vm3052_vm10 = vcmp.gt.f32.partialorder %v4876_v44, 0.0  ;;  %v3068_v9 = vmul.f32 0.2, %v4876_v44  ;;  %v3082_v23 = vsel %vm3050_vm12, %v4874_v35, %v3066_v62  ;;  %vm8311_vm15 = vcmp.ne.s16.totalorder %v8310_v53, 0 }
 0x524   : > { %v3083_v1 = vsel %vm3051_vm14, %v4875_v30, %v3067_v59  ;;  %3315 = vrot.lane.b32.xlu1 %v3286_v6, %s5307_s27  ;;  %v3366_v18 = vsel %vm8311_vm15, %v7249_v28, 0  ;;  %v3365_v46 = vsel %vm1701_vm3, %v7124_v10, 0  ;;  %vm8314_vm12 = vcmp.ne.s16.totalorder %v8313_v43, 0  ;;  %v8321_v59 = vld [vmem:[#allocation29_spill] sm:$0xff] }
 0x525   : > { %v7308_v49 = vpack.c.bf16 %v3083_v1, %v3081_v5  ;;  %v3084_v61 = vsel %vm3052_vm10, %v4876_v44, %v3068_v9  ;;  %3313 = vrot.lane.b32.xlu0 %v3285_v2, %s5307_s27  ;;  %v3370_v35 = vsel %vm8314_vm12, %v7271_v19, 0  ;;  %vm8315_vm14 = vmmov %vm8314_vm12  ;;  %v3371_v7 = vsel %vm1701_vm3, %v7136_v25, 0  ;;  %v7416_v5 = vld [vmem:[#allocation4 + $0x38] sm:$0xff] }
 0x526   : > { %v7311_v54 = vpack.c.bf16 %v3084_v61, %v3082_v23  ;;  %v3367_v22 = vsel %vm8315_vm14, %v7251_v58, 0  ;;  %vm8316_vm10 = vmmov %vm8311_vm15  ;;  %v3368_v13 = vsel %vm1701_vm3, %v7122_v60, 0  ;;  %v3466_v62 = vsel %vm1868_vm6, %v7251_v58, 0  ;;  %v7419_v1 = vld [vmem:[#allocation4 + $0x18] sm:$0xff] }
 0x527   : > { %v3123_v37 = vsel %vm1276_vm9, %v7308_v49, 0  ;;  %v3207_v29 = vsel %vm1418_vm0, %v7308_v49, 0  ;;  %v3291_v20 = vsel %vm1560_vm11, %v7308_v49, 0  ;;  %v3372_v15 = vsel %vm8316_vm10, %v7288_v33, 0  ;;  %vm8317_vm5 = vmmov %vm8316_vm10  ;;  %v8323_v2 = vld [vmem:[#allocation30_spill] sm:$0xff] }
 0x528   : > { %3151 = vrot.lane.b32.xlu1 %v3120_v3, %s5309_s28  ;;  %v3124_v50 = vsel %vm1277_vm7, %v7311_v54, 0  ;;  %v3208_v10 = vsel %vm1419_vm13, %v7311_v54, 0  ;;  %v3369_v30 = vsel %vm8317_vm5, %v7268_v47, 0  ;;  %vm8318_vm4 = vmmov %vm8314_vm12  ;;  %vm8319_vm15 = vcmp.ne.s16.totalorder %v8306_v4, 0  ;;  %v5120_v61 = vld [vmem:[%s8125_s6 + $0x4] ss:$20 sps:$4 sm:$0xff]  }
 0x529   : > { %3153 = vrot.lane.b32.xlu0 %v3121_v56, %s5309_s28  ;;  %v3373_v44 = vsel %vm8318_vm4, %v7291_v45, 0  ;;  %v3292_v25 = vsel %vm8319_vm15, %v7311_v54, 0  ;;  %vm8320_vm12 = vmmov %vm8317_vm5  ;;  %vm8322_vm14 = vcmp.ne.s16.totalorder %v8321_v59, 0  ;;  %v3374_v6 = vsel %vm1701_vm3, %v7133_v40, 0  ;;  %3986 = vmatprep.mubr.bf16.mxu0 %v5120_v61  ;;  %v3138_v56 = vpop.permute.xlu1 %3137 }
 0x52a   : > { %v3375_v60 = vsel %vm8320_vm12, %v7308_v49, 0  ;;  %v3465_v9 = vsel %vm8322_vm14, %v7249_v28, 0  ;;  %vm8324_vm10 = vcmp.ne.s16.totalorder %v8323_v2, 0  ;;  %v3472_v3 = vsel %vm1868_vm6, %v7291_v45, 0  ;;  %vm8326_vm15 = vmmov %vm8322_vm14 }
 0x52b   : > { %v3470_v23 = vsel %vm8324_vm10, %v7416_v5, 0  ;;  %vm8325_vm5 = vmmov %vm8324_vm10 }
 0x52c   : > { %3235 = vrot.lane.b32.xlu1 %v3204_v14, %s5308_s17  ;;  %v3467_v40 = vsel %vm8325_vm5, %v7419_v1, 0  ;;  %v3469_v14 = vsel %vm1868_vm6, %v7271_v19, 0  ;;  %vm8327_vm12 = vmmov %vm8322_vm14 }
 0x52d   : > { %3237 = vrot.lane.b32.xlu0 %v3205_v52, %s5308_s17  ;;  %v3376_v52 = vsel %vm8318_vm4, %v7311_v54, 0  ;;  %vm8328_vm14 = vmmov %vm8325_vm5  ;;  %vm8331_vm4 = vcmp.ne.s16.totalorder %v6633_v38, 0 }
 0x52e   : > { %vm8329_vm10 = vmmov %vm8325_vm5 }
 0x52f   : > { %vm8330_vm5 = vmmov %vm8327_vm12 }
 0x530   : > { %3319 = vrot.lane.b32.xlu1 %v3288_v11, %s5307_s27  ;;  %v3468_v11 = vsel %vm8326_vm15, %v7268_v47, 0  ;;  %vm8332_vm15 = vmmov %vm8331_vm4 }
 0x531   : > { %3321 = vrot.lane.b32.xlu0 %v3289_v12, %s5307_s27  ;;  %v7448_v12 = vld [vmem:[#allocation4 + $0x58] sm:$0xff] }
 0x534   : > { %3159 = vrot.lane.b32.xlu1 %v3124_v50, %s5309_s28  ;;  %v7450_v50 = vpop.permute.xlu1 %3149 }
 0x535   : > { %3157 = vrot.lane.b32.xlu0 %v3123_v37, %s5309_s28  ;;  %v7452_v37 = vpop.permute.xlu0 %3143 }
 0x538   : > { %3391 = vrot.lane.b32.xlu1 %v3366_v18, %s5306_s13  ;;  %v3471_v18 = vsel %vm8327_vm12, %v7288_v33, 0  ;;  %vm8333_vm12 = vmmov %vm8331_vm4 }
 0x539   : > { %3323 = vrot.lane.b32.xlu0 %v3290_v36, %s5307_s27  ;;  %v3473_v36 = vsel %vm8328_vm14, %v7448_v12, 0  ;;  %vm8334_vm14 = vmmov %vm8331_vm4 }
 0x53c   : > { %3389 = vrot.lane.b32.xlu1 %v3365_v46, %s5306_s13  ;;  %v7461_v46 = vld [vmem:[#allocation4 + $0x78] sm:$0xff] }
 0x53d   : > { %3241 = vrot.lane.b32.xlu0 %v3207_v29, %s5308_s17  ;;  %v3476_v29 = vsel %vm8329_vm10, %v7461_v46, 0  ;;  %vm8335_vm10 = vcmask 138240  }
 0x540   : > { %3399 = vrot.lane.b32.xlu1 %v3370_v35, %s5306_s13  ;;  %v7467_v35 = vpop.permute.xlu1 %3221 }
 0x541   : > { %3325 = vrot.lane.b32.xlu0 %v3291_v20, %s5307_s27  ;;  %v3474_v20 = vsel %vm8330_vm5, %v7308_v49, 0  ;;  %vm8336_vm5 = vmmov %vm8335_vm10 }
 0x544   : > { %3243 = vrot.lane.b32.xlu1 %v3208_v10, %s5308_s17  ;;  %v7473_v10 = vpop.permute.xlu0 %3155 }
 0x545   : > { %3393 = vrot.lane.b32.xlu0 %v3367_v22, %s5306_s13  ;;  %v3550_v22 = vsel %vm2010_vm8, %v7251_v58, 0 }
 0x548   : > { %3403 = vrot.lane.b32.xlu1 %v3372_v15, %s5306_s13  ;;  %v3551_v15 = vsel %vm2011_vm2, %v7419_v1, 0 }
 0x549   : > { %3397 = vrot.lane.b32.xlu0 %v3369_v30, %s5306_s13  ;;  %v7484_v30 = vpop.permute.xlu1 %3233 }
 0x54c   : > { %3401 = vrot.lane.b32.xlu1 %v3371_v7, %s5306_s13  ;;  %v7486_v7 = vpop.permute.xlu0 %3227 }
 0x54d   : > { %3395 = vrot.lane.b32.xlu0 %v3368_v13, %s5306_s13  ;;  %v3549_v13 = vsel %vm8331_vm4, %v7249_v28, 0  ;;  %vm8337_vm4 = vcmp.ne.s16.totalorder %v6804_v24, 0 }
 0x550   : > { %3491 = vrot.lane.b32.xlu1 %v3466_v62, %s5305_s12  ;;  %v3553_v62 = vsel %vm2010_vm8, %v7271_v19, 0 }
 0x551   : > { %3405 = vrot.lane.b32.xlu0 %v3373_v44, %s5306_s13  ;;  %v3554_v44 = vsel %vm2011_vm2, %v7416_v5, 0 }
 0x554   : > { %3327 = vrot.lane.b32.xlu1 %v3292_v25, %s5307_s27  ;;  %v7499_v25 = vpop.permute.xlu1 %3305 }
 0x555   : > { %3409 = vrot.lane.b32.xlu0 %v3375_v60, %s5306_s13  ;;  %v3552_v60 = vsel %vm8332_vm15, %v7268_v47, 0  ;;  %vm8338_vm15 = vcmp.ne.s16.totalorder %v6752_v31, 0 }
 0x558   : > { %3489 = vrot.lane.b32.xlu1 %v3465_v9, %s5305_s12  ;;  %v7505_v9 = vpop.permute.xlu0 %3239  ;;  %v7516_v61 = vpop.permute.xlu1 %3317 }
 0x559   : > { %3407 = vrot.lane.b32.xlu0 %v3374_v6, %s5306_s13  ;;  %v3556_v6 = vsel %vm2010_vm8, %v7291_v45, 0 }
 0x55c   : > { %3499 = vrot.lane.b32.xlu1 %v3470_v23, %s5305_s12  ;;  %v3557_v23 = vsel %vm2011_vm2, %v7448_v12, 0 }
 0x55d   : > { %3493 = vrot.lane.b32.xlu0 %v3467_v40, %s5305_s12  ;;  %v7518_v40 = vpop.permute.xlu0 %3311 }
 0x560   : > { %3503 = vrot.lane.b32.xlu1 %v3472_v3, %s5305_s12  ;;  %v3555_v3 = vsel %vm8333_vm12, %v7288_v33, 0  ;;  %vm8339_vm12 = vcmp.ne.s16.totalorder %v6684_v55, 0 }
 0x561   : > { %3497 = vrot.lane.b32.xlu0 %v3469_v14, %s5305_s12  ;;  %v3558_v14 = vsel %vm8334_vm14, %v7308_v49, 0  ;;  %vm8340_vm14 = vmmov %vm8337_vm4 }
 0x564   : > { %3411 = vrot.lane.b32.xlu1 %v3376_v52, %s5306_s13 }
 0x565   : > { %3495 = vrot.lane.b32.xlu0 %v3468_v11, %s5305_s12 }
 0x568   : > { %3501 = vrot.lane.b32.xlu1 %v3471_v18, %s5305_s12  ;;  %v3560_v18 = vsel %vm2011_vm2, %v7461_v46, 0 }
 0x569   : > { %3505 = vrot.lane.b32.xlu0 %v3473_v36, %s5305_s12  ;;  %v3475_v36 = vsel %vm1868_vm6, %v7311_v54, 0 }
 0x56c   : > { %3511 = vrot.lane.b32.xlu1 %v3476_v29, %s5305_s12 }
 0x56d   : > { %3507 = vrot.lane.b32.xlu0 %v3474_v20, %s5305_s12 }
 0x570   : > { %3575 = vrot.lane.b32.xlu1 %v3550_v22, %s5303_s26 }
 0x571   : > { %3577 = vrot.lane.b32.xlu0 %v3551_v15, %s5303_s26 }
 0x574   : > { %3573 = vrot.lane.b32.xlu1 %v3549_v13, %s5303_s26  ;;  %v3634_v13 = vsel %vm8337_vm4, %v7251_v58, 0  ;;  %vm8343_vm4 = vcmask 138240  }
 0x575   : > { %3581 = vrot.lane.b32.xlu0 %v3553_v62, %s5303_s26  ;;  %v3635_v62 = vsel %vm8338_vm15, %v7419_v1, 0 }
 0x578   : > { %3583 = vrot.lane.b32.xlu1 %v3554_v44, %s5303_s26 }
 0x579   : > { %3579 = vrot.lane.b32.xlu0 %v3552_v60, %s5303_s26  ;;  %v3633_v60 = vsel %vm8339_vm12, %v7249_v28, 0 }
 0x57c   : > { %3587 = vrot.lane.b32.xlu1 %v3556_v6, %s5303_s26  ;;  %v3637_v6 = vsel %vm8340_vm14, %v7271_v19, 0 }
 0x57d   : > { %3589 = vrot.lane.b32.xlu0 %v3557_v23, %s5303_s26 }
 0x580   : > { %3585 = vrot.lane.b32.xlu1 %v3555_v3, %s5303_s26 }
 0x581   : > { %3591 = vrot.lane.b32.xlu0 %v3558_v14, %s5303_s26 }
 0x582   : > { %v3140_v52 = vpop.permute.xlu1 %3139 }
 0x583   : > { %v3142_v11 = vpop.permute.xlu0 %3141  ;;  %v3161_v20 = vsel %vm8336_vm5, %v3138_v56, %v3140_v52  ;;  %vm8342_vm5 = vmmov %vm8339_vm12 }
 0x584   : > { %3595 = vrot.lane.b32.xlu1 %v3560_v18, %s5303_s26  ;;  %v3162_v29 = vsel %vm8335_vm10, %v3140_v52, %v3142_v11  ;;  %vm8341_vm10 = vmmov %vm8338_vm15  ;;  %v3636_v52 = vsel %vm8342_vm5, %v7268_v47, 0 }
 0x585   : > { %3509 = vrot.lane.b32.xlu0 %v3475_v36, %s5305_s12  ;;  %3954 = vmatprep.subr.bf16.mxu0 %v3162_v29  ;;  %v3638_v14 = vsel %vm8341_vm10, %v7416_v5, 0  ;;  %vm8344_vm15 = vmmov %vm8343_vm4 }
 0x586   : > { %3955 = vmatpush1.bf16.msra.mxu0 %v3161_v20  ;;  %v7538_v22 = vpop.permute.xlu1 %3223  ;;  %vm8345_vm12 = vmmov %vm8340_vm14 }
 0x587   : > { %v7540_v15 = vpop.permute.xlu0 %3225  ;;  %v3640_v20 = vsel %vm8345_vm12, %v7291_v45, 0  ;;  %vm8346_vm14 = vmmov %vm8342_vm5 }
 0x588   : > { %3659 = vrot.lane.b32.xlu1 %v3634_v13, %s5304_s29  ;;  %v3559_v13 = vsel %vm2010_vm8, %v7311_v54, 0  ;;  %vm8347_vm5 = vmmov %vm8341_vm10 }
 0x589   : > { %3661 = vrot.lane.b32.xlu0 %v3635_v62, %s5304_s29  ;;  %vm8349_vm12 = vmmov %vm8344_vm15 }
 0x58a   : > { %v7550_v44 = vpop.permute.xlu1 %3307 }
 0x58b   : > { %v7552_v56 = vpop.permute.xlu0 %3309 }
 0x58c   : > { %3657 = vrot.lane.b32.xlu1 %v3633_v60, %s5304_s29  ;;  %v3639_v60 = vsel %vm8346_vm14, %v7288_v33, 0 }
 0x58d   : > { %3665 = vrot.lane.b32.xlu0 %v3637_v6, %s5304_s29  ;;  %v3641_v6 = vsel %vm8341_vm10, %v7448_v12, 0  ;;  %vm8351_vm10 = vcmp.ne.s16.totalorder %v6944_v21, 0 }
 0x58e   : > { %v3148_v23 = vpop.permute.xlu1 %3147 }
 0x58f   : > { %v3146_v3 = vpop.permute.xlu0 %3145 }
 0x590   : > { %3667 = vrot.lane.b32.xlu1 %v3638_v14, %s5304_s29  ;;  %v3164_v11 = vsel %vm8343_vm4, %v3146_v3, %v3148_v23  ;;  %v3163_v18 = vsel %vm8344_vm15, %v7452_v37, %v3146_v3  ;;  %v3644_v14 = vsel %vm8347_vm5, %v7461_v46, 0  ;;  %vm8348_vm4 = vmmov %vm8346_vm14  ;;  %vm8350_vm14 = vcmp.ne.s16.totalorder %v6967_v41, 0 }
 0x591   : > { %3663 = vrot.lane.b32.xlu0 %v3636_v52, %s5304_s29  ;;  %3956 = vmatprep.subr.bf16.mxu0 %v3164_v11  ;;  %v3642_v52 = vsel %vm8348_vm4, %v7308_v49, 0  ;;  %vm8352_vm5 = vcmp.ne.s16.totalorder %v6946_v48, 0  ;;  %vm8353_vm4 = vcmp.ne.s16.totalorder %v6804_v24, 0 }
 0x592   : > { %3957 = vmatpush1.bf16.msra.mxu0 %v3163_v18  ;;  %v3232_v36 = vpop.permute.xlu1 %3231 }
 0x593   : > { %v3230_v29 = vpop.permute.xlu0 %3229 }
 0x594   : > { %3671 = vrot.lane.b32.xlu1 %v3640_v20, %s5304_s29 }
 0x595   : > { %3593 = vrot.lane.b32.xlu0 %v3559_v13, %s5303_s26 }
 0x596   : > { %v7581_v62 = vpop.permute.xlu1 %3315 }
 0x597   : > { %v7583_v37 = vpop.permute.xlu0 %3313 }
 0x598   : > { %3669 = vrot.lane.b32.xlu1 %v3639_v60, %s5304_s29  ;;  %v3718_v60 = vsel %vm8350_vm14, %v7251_v58, 0 }
 0x599   : > { %3673 = vrot.lane.b32.xlu0 %v3641_v6, %s5304_s29  ;;  %v3719_v6 = vsel %vm8351_vm10, %v7419_v1, 0 }
 0x59a   : > { %v3152_v23 = vpop.permute.xlu1 %3151 }
 0x59b   : > { %v3154_v3 = vpop.permute.xlu0 %3153  ;;  %v3165_v18 = vsel %vm8349_vm12, %v7450_v50, %v3152_v23  ;;  %v3717_v50 = vsel %vm8352_vm5, %v7249_v28, 0  ;;  %vm8355_vm12 = vmmov %vm8350_vm14  ;;  %vm8356_vm14 = vcmask 138240   ;;  %vm8358_vm5 = vcmask 130048  }
 0x59c   : > { %3679 = vrot.lane.b32.xlu1 %v3644_v14, %s5304_s29  ;;  %v3166_v11 = vsel %vm8344_vm15, %v3152_v23, %v3154_v3  ;;  %v3643_v23 = vsel %vm8353_vm4, %v7311_v54, 0  ;;  %vm8354_vm15 = vmmov %vm8351_vm10 }
 0x59d   : > { %3675 = vrot.lane.b32.xlu0 %v3642_v52, %s5304_s29  ;;  %3958 = vmatprep.subr.bf16.mxu0 %v3166_v11  ;;  %v3722_v11 = vsel %vm8354_vm15, %v7416_v5, 0  ;;  %vm8357_vm10 = vmmov %vm8356_vm14  ;;  %v3246_v5 = vsel %vm8358_vm5, %v7538_v22, %v7540_v15  ;;  %vm8360_vm15 = vcmp.ne.s16.totalorder %v6946_v48, 0 }
 0x59e   : > { %3959 = vmatpush1.bf16.msra.mxu0 %v3165_v18  ;;  %v3236_v20 = vpop.permute.xlu1 %3235  ;;  %v3721_v18 = vsel %vm8355_vm12, %v7271_v19, 0  ;;  %vm8359_vm4 = vmmov %vm8355_vm12 }
 0x59f   : > { %v3238_v13 = vpop.permute.xlu0 %3237  ;;  %vm8361_vm12 = vmmov %vm8358_vm5 }
 0x5a0   : > { %3743 = vrot.lane.b32.xlu1 %v3718_v60, %s5302_s24 }
 0x5a1   : > { %3745 = vrot.lane.b32.xlu0 %v3719_v6, %s5302_s24 }
 0x5a2   : > { %v7612_v3 = vpop.permute.xlu1 %3319 }
 0x5a3   : > { %v7614_v14 = vpop.permute.xlu0 %3321 }
 0x5a4   : > { %3741 = vrot.lane.b32.xlu1 %v3717_v50, %s5302_s24 }
 0x5a5   : > { %3677 = vrot.lane.b32.xlu0 %v3643_v23, %s5304_s29 }
 0x5a6   : > { %v3160_v52 = vpop.permute.xlu1 %3159 }
 0x5a7   : > { %v3158_v1 = vpop.permute.xlu0 %3157 }
 0x5a8   : > { %3751 = vrot.lane.b32.xlu1 %v3722_v11, %s5302_s24  ;;  %v3168_v60 = vsel %vm8356_vm14, %v3158_v1, %v3160_v52  ;;  %v3167_v6 = vsel %vm8357_vm10, %v7473_v10, %v3158_v1  ;;  %v3724_v52 = vsel %vm8359_vm4, %v7291_v45, 0  ;;  %v3720_v10 = vsel %vm8360_vm15, %v7268_v47, 0  ;;  %vm8362_vm14 = vmmov %vm8358_vm5 }
 0x5a9   : > { %3749 = vrot.lane.b32.xlu0 %v3721_v18, %s5302_s24  ;;  %3960 = vmatprep.subr.bf16.mxu0 %v3168_v60  ;;  %v3245_v1 = vsel %vm8361_vm12, %v7467_v35, %v7538_v22  ;;  %v3248_v11 = vsel %vm8362_vm14, %v3230_v29, %v3232_v36  ;;  %vm8363_vm10 = vmmov %vm8360_vm15  ;;  %vm8364_vm5 = vcmp.ne.s16.totalorder %v6944_v21, 0  ;;  %vm8368_vm14 = vcmp.ne.s16.totalorder %v6967_v41, 0 }
 0x5aa   : > { %3961 = vmatpush1.bf16.msra.mxu0 %v3167_v6  ;;  %v7635_v50 = vpop.permute.xlu1 %3391  ;;  %v3723_v60 = vsel %vm8363_vm10, %v7288_v33, 0  ;;  %v3725_v6 = vsel %vm8364_vm5, %v7448_v12, 0  ;;  %vm8365_vm4 = vmmov %vm8361_vm12  ;;  %v3727_v12 = vsel %vm8368_vm14, %v7311_v54, 0 }
 0x5ab   : > { %v7640_v23 = vpop.permute.xlu0 %3323  ;;  %3962 = vmatprep.subr.bf16.mxu0 %v3246_v5  ;;  %v3247_v35 = vsel %vm8365_vm4, %v7486_v7, %v3230_v29  ;;  %vm8366_vm15 = vmmov %vm8365_vm4  ;;  %v3873_v29 = vld [vmem:[%s8370_s25] sm:$0xff] }
 0x5ac   : > { %3755 = vrot.lane.b32.xlu1 %v3724_v52, %s5302_s24  ;;  %v3250_v36 = vsel %vm8366_vm15, %v3236_v20, %v3238_v13  ;;  %vm8367_vm12 = vmmov %vm8364_vm5 }
 0x5ad   : > { %3747 = vrot.lane.b32.xlu0 %v3720_v10, %s5302_s24  ;;  %v3728_v52 = vsel %vm8367_vm12, %v7461_v46, 0  ;;  %vm8369_vm10 = vmmov %vm8365_vm4  ;;  %vm8374_vm12 = vcmask 121856  }
 0x5ae   : > { %3963 = vmatpush1.bf16.msra.mxu0 %v3245_v1  ;;  %v7653_v15 = vpop.permute.xlu1 %3389  ;;  %v3249_v7 = vsel %vm8369_vm10, %v7484_v30, %v3236_v20  ;;  %vm8371_vm5 = vmmov %vm8365_vm4  ;;  %vm8372_vm4 = vcmp.ne.s16.totalorder %v6946_v48, 0  ;;  %v3875_v20 = vld [vmem:[%s8370_s25 + $0x10] sm:$0xff] }
 0x5af   : > { %v3242_v18 = vpop.permute.xlu0 %3241  ;;  %3964 = vmatprep.subr.bf16.mxu0 %v3248_v11  ;;  %v3726_v1 = vsel %vm8372_vm4, %v7308_v49, 0  ;;  %vm8373_vm15 = vmmov %vm8371_vm5 }
 0x5b0   : > { %3753 = vrot.lane.b32.xlu1 %v3723_v60, %s5302_s24  ;;  %v3251_v30 = vsel %vm8373_vm15, %v7505_v9, %v3242_v18  ;;  %v3330_v60 = vsel %vm8374_vm12, %v7550_v44, %v7552_v56  ;;  %vm8375_vm14 = vmmov %vm8374_vm12 }
 0x5b1   : > { %3757 = vrot.lane.b32.xlu0 %v3725_v6, %s5302_s24  ;;  %v3874_v6 = vld [vmem:[%s8370_s25 + $0x8] sm:$0xff]  ;;  %v3329_v9 = vsel %vm8375_vm14, %v7499_v25, %v7550_v44  ;;  %vm8376_vm10 = vmmov %vm8374_vm12  ;;  %v7716_v44 = vld [vmem:[#allocation3 + $0x20] sm:$0xff]  ;;  %vm8380_vm12 = vcmp.ne.s16.totalorder %v5987_v26, 0 }
 0x5b2   : > { %3965 = vmatpush1.bf16.msra.mxu0 %v3247_v35  ;;  %v7666_v22 = vpop.permute.xlu1 %3399  ;;  %v3332_v56 = vsel %vm8376_vm10, %v7583_v37, %v7581_v62  ;;  %vm8378_vm4 = vmmov %vm8376_vm10 }
 0x5b3   : > { %v3326_v5 = vpop.permute.xlu0 %3325  ;;  %3966 = vmatprep.subr.bf16.mxu0 %v3250_v36  ;;  %v7698_v36 = vld [vmem:[#allocation3] sm:$0xff]  ;;  %v3331_v25 = vsel %vm8378_vm4, %v7518_v40, %v7583_v37  ;;  %vm8379_vm15 = vmmov %vm8378_vm4 }
 0x5b4   : > { %3763 = vrot.lane.b32.xlu1 %v3728_v52, %s5302_s24  ;;  %v3876_v52 = vld [vmem:[%s8370_s25 + $0x18] sm:$0xff]  ;;  %vm8382_vm10 = vmmov %vm8378_vm4 }
 0x5b5   : > { %3761 = vrot.lane.b32.xlu0 %v3727_v12, %s5302_s24  ;;  %v3333_v37 = vsel %vm8382_vm10, %v7516_v61, %v7612_v3 }
 0x5b6   : > { %3967 = vmatpush1.bf16.msra.mxu0 %v3249_v7  ;;  %v3244_v13 = vpop.permute.xlu1 %3243 }
 0x5b7   : > { %v3394_v10 = vpop.permute.xlu0 %3393  ;;  %v3252_v46 = vsel %vm8371_vm5, %v3242_v18, %v3244_v13  ;;  %vm8377_vm5 = vcmp.ne.s16.totalorder %v5953_v17, 0 }
 0x5b8   : > { %3879 = vperm.xlu1 %5057, %v3873_v29   ;;  %3968 = vmatprep.subr.bf16.mxu0 %v3252_v46  ;;  %v4151_v7 = vsel %vm8377_vm5, %v7698_v36, 0  ;;  %v3334_v29 = vsel %vm8379_vm15, %v7612_v3, %v7614_v14  ;;  %v4193_v46 = vsel %vm8380_vm12, %v7698_v36, 0  ;;  %vm8381_vm14 = vmmov %vm8377_vm5 }
 0x5b9   : > { %3759 = vrot.lane.b32.xlu0 %v3726_v1, %s5302_s24  ;;  %v4154_v40 = vsel %vm8381_vm14, %v7716_v44, 0  ;;  %vm8383_vm5 = vmmov %vm8378_vm4 }
 0x5ba   : > { %3969 = vmatpush1.bf16.msra.mxu0 %v3251_v30  ;;  %v3404_v11 = vpop.permute.xlu1 %3403  ;;  %v4235_v30 = vsel %vm1559_vm1, %v7698_v36, 0  ;;  %vm8384_vm4 = vmmov %vm8380_vm12  ;;  %vm8386_vm12 = vcmask 7168  }
 0x5bb   : > { %v3398_v35 = vpop.permute.xlu0 %3397  ;;  %3970 = vmatprep.subr.bf16.mxu0 %v3330_v60  ;;  %v4196_v17 = vsel %vm8384_vm4, %v7716_v44, 0  ;;  %vm8385_vm15 = vmmov %vm8383_vm5  ;;  %v3414_v60 = vsel %vm8386_vm12, %v7635_v50, %v3394_v10 }
 0x5bc   : > { %3889 = vperm.xlu1 %5057, %v3875_v20   ;;  %v3335_v61 = vsel %vm8385_vm15, %v7640_v23, %v3326_v5  ;;  %vm8387_vm14 = vmmov %vm8386_vm12 }
 0x5bd   : > { %3884 = vperm.xlu0 %5056, %v3874_v6   ;;  %vm8388_vm10 = vmmov %vm8386_vm12 }
 0x5be   : > { %3971 = vmatpush1.bf16.msra.mxu0 %v3329_v9  ;;  %v3402_v18 = vpop.permute.xlu1 %3401  ;;  %v3413_v9 = vsel %vm8387_vm14, %v7653_v15, %v7635_v50  ;;  %v3416_v26 = vsel %vm8388_vm10, %v3398_v35, %v7666_v22 }
 0x5bf   : > { %v3396_v12 = vpop.permute.xlu0 %3395  ;;  %3972 = vmatprep.subr.bf16.mxu0 %v3332_v56 }
 0x5c0   : > { %4163 = vrot.lane.b32.xlu1 %v4151_v7, %s5309_s28 }
 0x5c1   : > { %3894 = vperm.xlu0 %5056, %v3876_v52  }
 0x5c2   : > { %3973 = vmatpush1.bf16.msra.mxu0 %v3331_v25  ;;  %v7718_v62 = vpop.permute.xlu1 %3491 }
 0x5c3   : > { %v3406_v13 = vpop.permute.xlu0 %3405  ;;  %3974 = vmatprep.subr.bf16.mxu0 %v3334_v29 }
 0x5c4   : > { %4205 = vrot.lane.b32.xlu1 %v4193_v46, %s5308_s17 }
 0x5c5   : > { %4169 = vrot.lane.b32.xlu0 %v4154_v40, %s5309_s28  ;;  %v5123_v40 = vld [vmem:[%s8125_s6 + $0x28] ss:$20 sps:$4 sm:$0xff]  }
 0x5c6   : > { %3975 = vmatpush1.bf16.msra.mxu0 %v3333_v37  ;;  %v3328_v14 = vpop.permute.xlu1 %3327 }
 0x5c7   : > { %v3410_v1 = vpop.permute.xlu0 %3409  ;;  %v3336_v20 = vsel %vm8383_vm5, %v3326_v5, %v3328_v14  ;;  %vm8389_vm5 = vmmov %vm8388_vm10  ;;  %v5126_v14 = vld [vmem:[%s8125_s6 + $0xc] ss:$20 sps:$4 sm:$0xff]   ;;  %vm8394_vm10 = vcmask 1039360  }
 0x5c8   : > { %4247 = vrot.lane.b32.xlu1 %v4235_v30, %s5307_s27  ;;  %3976 = vmatprep.subr.bf16.mxu0 %v3336_v20  ;;  %v3415_v23 = vsel %vm8389_vm5, %v3396_v12, %v3398_v35  ;;  %vm8390_vm4 = vmmov %vm8389_vm5  ;;  %v5118_v35 = vld [vmem:[%s8125_s6] ss:$20 sps:$4 sm:$0xff]  }
 0x5c9   : > { %4211 = vrot.lane.b32.xlu0 %v4196_v17, %s5308_s17  ;;  %v3418_v7 = vsel %vm8390_vm4, %v3404_v11, %v3406_v13  ;;  %vm8391_vm15 = vmmov %vm8390_vm4  ;;  %v5121_v13 = vld [vmem:[%s8125_s6 + $0x2c] ss:$20 sps:$4 sm:$0xff]  }
 0x5ca   : > { %3977 = vmatpush1.bf16.msra.mxu0 %v3335_v61  ;;  %v3490_v3 = vpop.permute.xlu1 %3489  ;;  %v3417_v25 = vsel %vm8391_vm15, %v3402_v18, %v3404_v11  ;;  %vm8392_vm12 = vmmov %vm8390_vm4 }
 0x5cb   : > { %v3408_v6 = vpop.permute.xlu0 %3407  ;;  %3978 = vmatprep.subr.bf16.mxu0 %v3414_v60  ;;  %vm8393_vm14 = vmmov %vm8390_vm4 }
 0x5cc   : > { %v3419_v22 = vsel %vm8393_vm14, %v3408_v6, %v3410_v1  ;;  %vm8395_vm5 = vmmov %vm8394_vm10 }
 0x5cd   : > { %v3513_v20 = vsel %vm8395_vm5, %v3490_v3, %v7718_v62  ;;  %vm8396_vm4 = vmmov %vm8395_vm5 }
 0x5ce   : > { %3979 = vmatpush1.bf16.msra.mxu0 %v3413_v9  ;;  %v3500_v56 = vpop.permute.xlu1 %3499  ;;  %vm8397_vm15 = vmmov %vm8396_vm4 }
 0x5cf   : > { %v3494_v52 = vpop.permute.xlu0 %3493  ;;  %3980 = vmatprep.subr.bf16.mxu0 %v3416_v26  ;;  %vm8399_vm14 = vmmov %vm8396_vm4 }
 0x5d0   : > { %vm8401_vm5 = vmmov %vm8396_vm4 }
 0x5d2   : > { %3981 = vmatpush1.bf16.msra.mxu0 %v3415_v23  ;;  %v3504_v5 = vpop.permute.xlu1 %3503 }
 0x5d3   : > { %v3498_v10 = vpop.permute.xlu0 %3497  ;;  %3982 = vmatprep.subr.bf16.mxu0 %v3418_v7 }
 0x5d6   : > { %3983 = vmatpush1.bf16.msra.mxu0 %v3417_v25  ;;  %v3412_v29 = vpop.permute.xlu1 %3411 }
 0x5d7   : > { %v3496_v50 = vpop.permute.xlu0 %3495  ;;  %v3420_v15 = vsel %vm8392_vm12, %v3410_v1, %v3412_v29  ;;  %vm8398_vm12 = vmmov %vm8396_vm4 }
 0x5d8   : > { %3984 = vmatprep.subr.bf16.mxu0 %v3420_v15  ;;  %v3515_v61 = vsel %vm8397_vm15, %v3496_v50, %v3498_v10 }
 0x5da   : > { %3985 = vmatpush1.bf16.msra.mxu0 %v3419_v22  ;;  %v3502_v12 = vpop.permute.xlu1 %3501 }
 0x5db   : > { %v3506_v46 = vpop.permute.xlu0 %3505  ;;  %4007 = vmatprep.subr.bf16.mxu0 %v7251_v58  ;;  %v3517_v6 = vsel %vm8399_vm14, %v3502_v12, %v3504_v5 }
 0x5dd   : > { %3987 = vmatmul.mubr.bf16.vlgmr.msra.gmra.mrb[24].mxu0 %v5118_v35 }
 0x5de   : > { %4008 = vmatpush1.bf16.msra.mxu0 %v7249_v28  ;;  %v3512_v11 = vpop.permute.xlu1 %3511  ;;  %3996 = vmatprep.mubr.bf16.mxu0 %v5121_v13 }
 0x5df   : > { %v3508_v18 = vpop.permute.xlu0 %3507  ;;  %4009 = vmatprep.subr.bf16.mxu0 %v7271_v19 }
 0x5e2   : > { %4010 = vmatpush1.bf16.msra.mxu0 %v7268_v47  ;;  %v3576_v37 = vpop.permute.xlu1 %3575  ;;  %v3514_v47 = vsel %vm8394_vm10, %v7718_v62, %v3494_v52  ;;  %vm8400_vm10 = vmmov %vm8396_vm4 }
 0x5e3   : > { %v3578_v58 = vpop.permute.xlu0 %3577  ;;  %4011 = vmatprep.subr.bf16.mxu0 %v7291_v45 }
 0x5e5   : > { %3997 = vmatmul.mubr.bf16.gmra.mrb[28].mxu0 %v5123_v40 }
 0x5e6   : > { %4012 = vmatpush1.bf16.msra.mxu0 %v7288_v33  ;;  %v3574_v28 = vpop.permute.xlu1 %3573  ;;  %4039 = vmatprep.mubr.bf16.mxu0 %v5126_v14  ;;  %v3516_v33 = vsel %vm8396_vm4, %v3498_v10, %v3500_v56  ;;  %vm8402_vm4 = vcmask 924672  }
 0x5e7   : > { %v3582_v19 = vpop.permute.xlu0 %3581  ;;  %4013 = vmatprep.subr.bf16.mxu0 %v7311_v54  ;;  %v3598_v52 = vsel %vm8402_vm4, %v3576_v37, %v3578_v58  ;;  %vm8403_vm15 = vmmov %vm8402_vm4 }
 0x5e8   : > { %v3597_v7 = vsel %vm8403_vm15, %v3574_v28, %v3576_v37  ;;  %vm8405_vm14 = vmmov %vm8402_vm4 }
 0x5e9   : > { %vm8408_vm15 = vmmov %vm8402_vm4 }
 0x5ea   : > { %4014 = vmatpush1.bf16.msra.mxu0 %v7308_v49  ;;  %v3584_v1 = vpop.permute.xlu1 %3583  ;;  %v3518_v49 = vsel %vm8398_vm12, %v3504_v5, %v3506_v46  ;;  %vm8404_vm12 = vmmov %vm8402_vm4 }
 0x5eb   : > { %v3580_v30 = vpop.permute.xlu0 %3579  ;;  %4015 = vmatprep.subr.bf16.mxu0 %v3514_v47  ;;  %v3600_v5 = vsel %vm8404_vm12, %v3582_v19, %v3584_v1  ;;  %vm8409_vm12 = vcmask 916480  }
 0x5ec   : > { %v3599_v29 = vsel %vm8405_vm14, %v3580_v30, %v3582_v19  ;;  %vm8410_vm14 = vmmov %vm8409_vm12 }
 0x5ee   : > { %4016 = vmatpush1.bf16.msra.mxu0 %v3513_v20  ;;  %v3588_v45 = vpop.permute.xlu1 %3587 }
 0x5ef   : > { %v3590_v17 = vpop.permute.xlu0 %3589  ;;  %4017 = vmatprep.subr.bf16.mxu0 %v3516_v33 }
 0x5f2   : > { %4018 = vmatpush1.bf16.msra.mxu0 %v3515_v61  ;;  %v3586_v54 = vpop.permute.xlu1 %3585 }
 0x5f3   : > { %v3592_v60 = vpop.permute.xlu0 %3591  ;;  %4019 = vmatprep.subr.bf16.mxu0 %v3518_v49  ;;  %v5124_v49 = vld [vmem:[%s8125_s6 + $0x8] ss:$20 sps:$4 sm:$0xff]  }
 0x5f6   : > { %4020 = vmatpush1.bf16.msra.mxu0 %v3517_v6  ;;  %v3596_v9 = vpop.permute.xlu1 %3595 }
 0x5f7   : > { %v3510_v26 = vpop.permute.xlu0 %3509 }
 0x5f8   : > { %v3519_v62 = vsel %vm8400_vm10, %v3508_v18, %v3510_v26  ;;  %v3520_v3 = vsel %vm8401_vm5, %v3510_v26, %v3512_v11  ;;  %vm8406_vm10 = vmmov %vm8402_vm4 }
 0x5f9   : > { %4021 = vmatprep.subr.bf16.mxu0 %v3520_v3  ;;  %v3602_v15 = vsel %vm8406_vm10, %v3588_v45, %v3590_v17  ;;  %vm8407_vm5 = vmmov %vm8402_vm4 }
 0x5fa   : > { %4022 = vmatpush1.bf16.msra.mxu0 %v3519_v62  ;;  %v3660_v56 = vpop.permute.xlu1 %3659  ;;  %v3601_v35 = vsel %vm8407_vm5, %v3586_v54, %v3588_v45  ;;  %vm8411_vm10 = vmmov %vm8409_vm12 }
 0x5fb   : > { %v3662_v23 = vpop.permute.xlu0 %3661  ;;  %4023 = vmatprep.subr.bf16.mxu0 %v3598_v52  ;;  %vm8412_vm5 = vmmov %vm8411_vm10 }
 0x5fc   : > { %v3682_v40 = vsel %vm8409_vm12, %v3660_v56, %v3662_v23 }
 0x5fe   : > { %4024 = vmatpush1.bf16.msra.mxu0 %v3597_v7  ;;  %v3658_v10 = vpop.permute.xlu1 %3657  ;;  %v5129_v7 = vld [vmem:[%s8125_s6 + $0x30] ss:$20 sps:$4 sm:$0xff]  }
 0x5ff   : > { %v3666_v25 = vpop.permute.xlu0 %3665  ;;  %4025 = vmatprep.subr.bf16.mxu0 %v3600_v5  ;;  %v3681_v14 = vsel %vm8410_vm14, %v3658_v10, %v3660_v56 }
 0x602   : > { %4026 = vmatpush1.bf16.msra.mxu0 %v3599_v29  ;;  %v3668_v50 = vpop.permute.xlu1 %3667 }
 0x603   : > { %v3664_v22 = vpop.permute.xlu0 %3663  ;;  %4027 = vmatprep.subr.bf16.mxu0 %v3602_v15  ;;  %v3684_v28 = vsel %vm8411_vm10, %v3666_v25, %v3668_v50  ;;  %vm8417_vm10 = vcmask 908288  }
 0x604   : > { %v3683_v1 = vsel %vm8412_vm5, %v3664_v22, %v3666_v25 }
 0x606   : > { %4028 = vmatpush1.bf16.msra.mxu0 %v3601_v35  ;;  %v3672_v12 = vpop.permute.xlu1 %3671 }
 0x607   : > { %v3594_v13 = vpop.permute.xlu0 %3593 }
 0x608   : > { %v3603_v46 = vsel %vm8402_vm4, %v3592_v60, %v3594_v13  ;;  %v3604_v11 = vsel %vm8408_vm15, %v3594_v13, %v3596_v9  ;;  %vm8413_vm4 = vmmov %vm8412_vm5  ;;  %v5127_v9 = vld [vmem:[%s8125_s6 + $0x34] ss:$20 sps:$4 sm:$0xff]   ;;  %v5130_v13 = vld [vmem:[%s8125_s6 + $0x10] ss:$20 sps:$4 sm:$0xff]  }
 0x609   : > { %4029 = vmatprep.subr.bf16.mxu0 %v3604_v11  ;;  %vm8414_vm15 = vmmov %vm8413_vm4 }
 0x60a   : > { %4030 = vmatpush1.bf16.msra.mxu0 %v3603_v46  ;;  %v3670_v18 = vpop.permute.xlu1 %3669  ;;  %vm8415_vm12 = vmmov %vm8413_vm4  ;;  %v5131_v46 = vld [vmem:[%s8125_s6 + $0x38] ss:$20 sps:$4 sm:$0xff]  }
 0x60b   : > { %v3674_v37 = vpop.permute.xlu0 %3673  ;;  %4031 = vmatprep.subr.bf16.mxu0 %v3682_v40  ;;  %v3685_v45 = vsel %vm8414_vm15, %v3670_v18, %v3672_v12  ;;  %vm8416_vm14 = vmmov %vm8413_vm4 }
 0x60c   : > { %v3686_v30 = vsel %vm8413_vm4, %v3672_v12, %v3674_v37  ;;  %vm8418_vm5 = vmmov %vm8417_vm10 }
 0x60d   : > { %vm8419_vm4 = vmmov %vm8418_vm5 }
 0x60e   : > { %4032 = vmatpush1.bf16.msra.mxu0 %v3681_v14  ;;  %v3680_v58 = vpop.permute.xlu1 %3679  ;;  %vm8420_vm15 = vmmov %vm8419_vm4 }
 0x60f   : > { %v3676_v19 = vpop.permute.xlu0 %3675  ;;  %4033 = vmatprep.subr.bf16.mxu0 %v3684_v28 }
 0x612   : > { %4034 = vmatpush1.bf16.msra.mxu0 %v3683_v1  ;;  %v3744_v47 = vpop.permute.xlu1 %3743 }
 0x613   : > { %v3746_v20 = vpop.permute.xlu0 %3745  ;;  %4035 = vmatprep.subr.bf16.mxu0 %v3686_v30 }
 0x614   : > { %v3766_v6 = vsel %vm8417_vm10, %v3744_v47, %v3746_v20  ;;  %vm8423_vm10 = vmmov %vm8419_vm4 }
 0x616   : > { %4036 = vmatpush1.bf16.msra.mxu0 %v3685_v45  ;;  %v3742_v33 = vpop.permute.xlu1 %3741 }
 0x617   : > { %v3678_v17 = vpop.permute.xlu0 %3677  ;;  %v3765_v62 = vsel %vm8418_vm5, %v3742_v33, %v3744_v47  ;;  %vm8424_vm5 = vmmov %vm8419_vm4 }
 0x618   : > { %v3687_v61 = vsel %vm8415_vm12, %v3676_v19, %v3678_v17  ;;  %v3688_v54 = vsel %vm8416_vm14, %v3678_v17, %v3680_v58  ;;  %vm8421_vm12 = vmmov %vm8419_vm4 }
 0x619   : > { %4037 = vmatprep.subr.bf16.mxu0 %v3688_v54  ;;  %vm8422_vm14 = vmmov %vm8419_vm4 }
 0x61a   : > { %4038 = vmatpush1.bf16.msra.mxu0 %v3687_v61  ;;  %v3752_v60 = vpop.permute.xlu1 %3751 }
 0x61b   : > { %v3750_v26 = vpop.permute.xlu0 %3749  ;;  %4060 = vmatprep.subr.bf16.mxu0 %v3766_v6 }
 0x61c   : > { %v3768_v56 = vsel %vm8419_vm4, %v3750_v26, %v3752_v60  ;;  %vm3947_vm4 = vcmask 523264  }
 0x61d   : > { %4040 = vmatmul.mubr.bf16.vlgmr.msra.gmra.mrb[24].mxu0 %v5124_v49 }
 0x61e   : > { %4061 = vmatpush1.bf16.msra.mxu0 %v3765_v62  ;;  %v3756_v3 = vpop.permute.xlu1 %3755  ;;  %4049 = vmatprep.mubr.bf16.mxu0 %v5127_v9 }
 0x61f   : > { %v3748_v52 = vpop.permute.xlu0 %3747  ;;  %4062 = vmatprep.subr.bf16.mxu0 %v3768_v56 }
 0x620   : > { %v3767_v23 = vsel %vm8420_vm15, %v3748_v52, %v3750_v26 }
 0x622   : > { %4063 = vmatpush1.bf16.msra.mxu0 %v3767_v23  ;;  %v3754_v10 = vpop.permute.xlu1 %3753 }
 0x623   : > { %v3758_v5 = vpop.permute.xlu0 %3757  ;;  %v3769_v29 = vsel %vm8422_vm14, %v3754_v10, %v3756_v3 }
 0x624   : > { %v3770_v25 = vsel %vm8421_vm12, %v3756_v3, %v3758_v5 }
 0x625   : > { %4064 = vmatprep.subr.bf16.mxu0 %v3770_v25  ;;  %4050 = vmatmul.mubr.bf16.gmra.mrb[28].mxu0 %v5129_v7 }
 0x626   : > { %4065 = vmatpush1.bf16.msra.mxu0 %v3769_v29  ;;  %v3764_v50 = vpop.permute.xlu1 %3763  ;;  %4092 = vmatprep.mubr.bf16.mxu0 %v8298_v42 }
 0x627   : > { %v3762_v15 = vpop.permute.xlu0 %3761 }
 0x628   : > { %v3772_v22 = vsel %vm8423_vm10, %v3762_v15, %v3764_v50 }
 0x629   : > { %4066 = vmatprep.subr.bf16.mxu0 %v3772_v22 }
 0x62b   : > { %v3760_v35 = vpop.permute.xlu0 %3759 }
 0x62c   : > { %v3771_v12 = vsel %vm8424_vm5, %v3760_v35, %v3762_v15 }
 0x62d   : > { %4067 = vmatpush1.bf16.msra.mxu0 %v3771_v12 }
 0x630   : > { %4850 = vmatmul.mubr.msk.bf16.vlgmr.msra.gmra.mrb[24].mxu0 %vm3947_vm4, %v5130_v13 }
 0x631   : > { %4102 = vmatprep.mubr.bf16.mxu0 %v8298_v42 }
 0x637   : > { %v3880_v11 = vpop.permute.xlu1 %3879 }
 0x638   : > { %4851 = vmatmul.mubr.msk.bf16.gmra.mrb[28].mxu0 %vm3947_vm4, %v5131_v46 }
 0x63b   : > { %v3890_v54 = vpop.permute.xlu1 %3889 }
 0x63c   : > { %v3885_v14 = vpop.permute.xlu0 %3884 }
 0x640   : > { %v3895_v56 = vpop.permute.xlu0 %3894 }
 0x703   : > { %v4094_v18 = vpop.f32.mrb[24].mxu0 }
 0x704   : > { %v4877_v40 = vadd.f32 %v4094_v18, %v3880_v11  ;;  %v4096_v37 = vpop.f32.mrb[25].mxu0 }
 0x705   : > { %v4878_v58 = vadd.f32 %v4096_v37, %v3880_v11  ;;  %v4098_v28 = vpop.f32.mrb[26].mxu0 }
 0x706   : > { %v4121_v19 = vmul.f32 0.2, %v4877_v40  ;;  %v4879_v1 = vadd.f32 %v4098_v28, %v3885_v14  ;;  %v4100_v47 = vpop.f32.mrb[27].mxu0  ;;  %vm4113_vm15 = vcmp.gt.f32.partialorder %v4877_v40, 0.0 }
 0x707   : > { %v4122_v30 = vmul.f32 0.2, %v4878_v58  ;;  %v4880_v20 = vadd.f32 %v4100_v47, %v3885_v14  ;;  %vm4114_vm12 = vcmp.gt.f32.partialorder %v4878_v58, 0.0 }
 0x708   : > { %vm4115_vm14 = vcmp.gt.f32.partialorder %v4879_v1, 0.0  ;;  %v4123_v45 = vmul.f32 0.2, %v4879_v1  ;;  %v4129_v17 = vsel %vm4113_vm15, %v4877_v40, %v4121_v19 }
 0x709   : > { %vm4116_vm10 = vcmp.gt.f32.partialorder %v4880_v20, 0.0  ;;  %v4124_v33 = vmul.f32 0.2, %v4880_v20  ;;  %v4130_v49 = vsel %vm4114_vm12, %v4878_v58, %v4122_v30  ;;  %v4238_v30 = vsel %vm1559_vm1, %v7716_v44, 0 }
 0x70a   : > { %v4131_v61 = vsel %vm4115_vm14, %v4879_v1, %v4123_v45  ;;  %vm8428_vm1 = vcmp.ne.s16.totalorder %v8313_v43, 0  ;;  %v4280_v45 = vsel %vm1701_vm3, %v7716_v44, 0  ;;  %v4326_v43 = vld [vmem:[#allocation3 + $0x38] sm:$0xff] }
 0x70b   : > { %v7830_v60 = vpack.c.bf16 %v4131_v61, %v4129_v17  ;;  %v4132_v6 = vsel %vm4116_vm10, %v4880_v20, %v4124_v33  ;;  %v4104_v9 = vpop.f32.mrb[28].mxu0  ;;  %vm8425_vm10 = vcmp.ne.s16.totalorder %v8306_v4, 0  ;;  %v4277_v20 = vsel %vm1701_vm3, %v7698_v36, 0  ;;  %v4323_v33 = vld [vmem:[#allocation3 + $0x18] sm:$0xff] }
 0x70c   : > { %v7832_v26 = vpack.c.bf16 %v4132_v6, %v4130_v49  ;;  %v4881_v62 = vadd.f32 %v4104_v9, %v3890_v54  ;;  %v4106_v3 = vpop.f32.mrb[29].mxu0  ;;  %v4374_v49 = vsel %vm2011_vm2, %v4326_v43, 0 }
 0x70d   : > { %4141 = vst [vmem:[#allocation3 + $0x8] sm:$0xff] %v7830_v60  ;;  %v4882_v52 = vadd.f32 %v4106_v3, %v3890_v54  ;;  %v4108_v23 = vpop.f32.mrb[30].mxu0  ;;  %v4152_v7 = vsel %vm1276_vm9, %v7830_v60, 0  ;;  %v4194_v12 = vsel %vm1418_vm0, %v7830_v60, 0  ;;  %v4236_v58 = vsel %vm1560_vm11, %v7830_v60, 0 }
 0x70e   : > { %4142 = vst [vmem:[#allocation3 + $0x10] sm:$0xff] %v7832_v26  ;;  %v4125_v10 = vmul.f32 0.2, %v4881_v62  ;;  %v4883_v5 = vadd.f32 %v4108_v23, %v3895_v56  ;;  %v4110_v25 = vpop.f32.mrb[31].mxu0  ;;  %4165 = vrot.lane.b32.xlu1 %v4152_v7, %s5309_s28  ;;  %v4153_v29 = vsel %vm1277_vm7, %v7832_v26, 0  ;;  %vm4117_vm5 = vcmp.gt.f32.partialorder %v4881_v62, 0.0 }
 0x70f   : > { %v4126_v50 = vmul.f32 0.2, %v4882_v52  ;;  %v4884_v15 = vadd.f32 %v4110_v25, %v3895_v56  ;;  %4167 = vrot.lane.b32.xlu0 %v4153_v29, %s5309_s28  ;;  %vm4118_vm15 = vcmp.gt.f32.partialorder %v4882_v52, 0.0  ;;  %v4195_v11 = vsel %vm1419_vm13, %v7832_v26, 0  ;;  %v4170_v29 = vpop.permute.xlu0 %4169 }
 0x710   : > { %vm4119_vm12 = vcmp.gt.f32.partialorder %v4883_v5, 0.0  ;;  %v4127_v22 = vmul.f32 0.2, %v4883_v5  ;;  %v4133_v13 = vsel %vm4117_vm5, %v4881_v62, %v4125_v10  ;;  %v4237_v28 = vsel %vm8425_vm10, %v7832_v26, 0 }
 0x711   : > { %vm4120_vm14 = vcmp.gt.f32.partialorder %v4884_v15, 0.0  ;;  %v4128_v35 = vmul.f32 0.2, %v4884_v15  ;;  %v4134_v18 = vsel %vm4118_vm15, %v4882_v52, %v4126_v50  ;;  %vm8426_vm5 = vcmp.ne.s16.totalorder %v8310_v53, 0 }
 0x712   : > { %v4135_v46 = vsel %vm4119_vm12, %v4883_v5, %v4127_v22  ;;  %4207 = vrot.lane.b32.xlu1 %v4194_v12, %s5308_s17  ;;  %v4278_v47 = vsel %vm8426_vm5, %v7830_v60, 0  ;;  %v4279_v57 = vsel %vm8428_vm1, %v7832_v26, 0  ;;  %v4328_v36 = vsel %vm1868_vm6, %v7832_v26, 0 }
 0x713   : > { %v7851_v40 = vpack.c.bf16 %v4135_v46, %v4133_v13  ;;  %v4136_v37 = vsel %vm4120_vm14, %v4884_v15, %v4128_v35  ;;  %4209 = vrot.lane.b32.xlu0 %v4195_v11, %s5308_s17  ;;  %v4370_v44 = vsel %vm2010_vm8, %v7832_v26, 0  ;;  %v4371_v54 = vsel %vm2011_vm2, %v4323_v33, 0  ;;  %v4212_v15 = vpop.permute.xlu0 %4211 }
 0x714   : > { %v7854_v14 = vpack.c.bf16 %v4136_v37, %v4134_v18  ;;  %vm8435_vm12 = vcmp.ne.s16.totalorder %v6633_v38, 0  ;;  %vm8438_vm2 = vcmp.ne.s16.totalorder %v6684_v55, 0 }
 0x715   : > { %4143 = vst [vmem:[#allocation3 + $0x28] sm:$0xff] %v7851_v40  ;;  %v4155_v1 = vsel %vm1276_vm9, %v7851_v40, 0  ;;  %v4197_v8 = vsel %vm1418_vm0, %v7851_v40, 0  ;;  %v4239_v32 = vsel %vm1560_vm11, %v7851_v40, 0  ;;  %vm8427_vm9 = vmmov %vm8425_vm10  ;;  %vm8432_vm0 = vcmp.ne.s16.totalorder %v8323_v2, 0 }
 0x716   : > { %4144 = vst [vmem:[#allocation3 + $0x30] sm:$0xff] %v7854_v14  ;;  %4249 = vrot.lane.b32.xlu1 %v4236_v58, %s5307_s27  ;;  %v4156_v19 = vsel %vm1277_vm7, %v7854_v14, 0  ;;  %v4198_v63 = vsel %vm1419_vm13, %v7854_v14, 0  ;;  %v4240_v16 = vsel %vm8427_vm9, %v7854_v14, 0  ;;  %vm8429_vm11 = vmmov %vm8426_vm5  ;;  %vm8431_vm13 = vcmp.ne.s16.totalorder %v8321_v59, 0 }
 0x717   : > { %4251 = vrot.lane.b32.xlu0 %v4237_v28, %s5307_s27  ;;  %v4281_v0 = vsel %vm8429_vm11, %v7851_v40, 0  ;;  %vm8430_vm7 = vmmov %vm8428_vm1  ;;  %v4327_v53 = vsel %vm8431_vm13, %v7830_v60, 0  ;;  %v4329_v17 = vsel %vm8432_vm0, %v4323_v33, 0  ;;  %v4369_v2 = vsel %vm8435_vm12, %v7830_v60, 0 }
 0x718   : > { %v4282_v4 = vsel %vm8430_vm7, %v7854_v14, 0  ;;  %vm8433_vm15 = vmmov %vm8432_vm0  ;;  %v4331_v59 = vsel %vm1868_vm6, %v7854_v14, 0  ;;  %vm8437_vm10 = vcmp.ne.s16.totalorder %v6804_v24, 0  ;;  %v4373_v27 = vsel %vm2010_vm8, %v7854_v14, 0 }
 0x719   : > { %v4332_v61 = vsel %vm8433_vm15, %v4326_v43, 0  ;;  %vm8434_vm3 = vmmov %vm8431_vm13  ;;  %v4412_v9 = vsel %vm8437_vm10, %v7832_v26, 0  ;;  %v4411_v51 = vsel %vm8438_vm2, %v7830_v60, 0  ;;  %vm8440_vm6 = vcmp.ne.s16.totalorder %v6752_v31, 0 }
 0x71a   : > { %4173 = vrot.lane.b32.xlu1 %v4156_v19, %s5309_s28  ;;  %v4330_v39 = vsel %vm8434_vm3, %v7851_v40, 0  ;;  %vm8436_vm14 = vmmov %vm8435_vm12  ;;  %v4413_v62 = vsel %vm8440_vm6, %v4323_v33, 0  ;;  %vm8443_vm9 = vcmp.ne.s16.totalorder %v6967_v41, 0  ;;  %vm8445_vm11 = vcmp.ne.s16.totalorder %v6946_v48, 0 }
 0x71b   : > { %4171 = vrot.lane.b32.xlu0 %v4155_v1, %s5309_s28  ;;  %v4372_v6 = vsel %vm8436_vm14, %v7851_v40, 0  ;;  %vm8441_vm8 = vmmov %vm8440_vm6  ;;  %v4454_v52 = vsel %vm8443_vm9, %v7832_v26, 0  ;;  %v4453_v31 = vsel %vm8445_vm11, %v7830_v60, 0  ;;  %vm8446_vm7 = vcmp.ne.s16.totalorder %v6944_v21, 0  ;;  %v4164_v21 = vpop.permute.xlu1 %4163 }
 0x71c   : > { %v4416_v3 = vsel %vm8441_vm8, %v4326_v43, 0  ;;  %vm8442_vm5 = vmmov %vm8437_vm10  ;;  %v4455_v24 = vsel %vm8446_vm7, %v4323_v33, 0  ;;  %vm8451_vm3 = vcmask 138240  }
 0x71d   : > { %v4415_v56 = vsel %vm8442_vm5, %v7854_v14, 0  ;;  %vm8444_vm1 = vmmov %vm8438_vm2  ;;  %vm8455_vm2 = vcmask 130048  }
 0x71e   : > { %4291 = vrot.lane.b32.xlu1 %v4278_v47, %s5306_s13  ;;  %v4414_v23 = vsel %vm8444_vm1, %v7851_v40, 0  ;;  %vm8447_vm13 = vmmov %vm8446_vm7 }
 0x71f   : > { %4253 = vrot.lane.b32.xlu0 %v4238_v30, %s5307_s27  ;;  %v4458_v7 = vsel %vm8447_vm13, %v4326_v43, 0  ;;  %vm8448_vm0 = vmmov %vm8443_vm9  ;;  %v4206_v25 = vpop.permute.xlu1 %4205  ;;  %vm8459_vm9 = vcmask 121856   ;;  %vm8463_vm13 = vcmask 7168  }
 0x720   : > { %v4457_v55 = vsel %vm8448_vm0, %v7854_v14, 0  ;;  %vm8450_vm15 = vmmov %vm8445_vm11 }
 0x721   : > { %v4456_v5 = vsel %vm8450_vm15, %v7851_v40, 0  ;;  %vm8452_vm12 = vmmov %vm8451_vm3 }
 0x722   : > { %4215 = vrot.lane.b32.xlu1 %v4198_v63, %s5308_s17  ;;  %vm8453_vm14 = vmmov %vm8451_vm3 }
 0x723   : > { %4213 = vrot.lane.b32.xlu0 %v4197_v8, %s5308_s17  ;;  %s8449_s17 = sld [smem:[#allocation34_spill]]  ;;  %v4248_v50 = vpop.permute.xlu1 %4247  ;;  %vm8454_vm10 = vmmov %vm8451_vm3 }
 0x724   : > { %vm8456_vm6 = vmmov %vm8455_vm2 }
 0x725   : > { %vm8457_vm8 = vmmov %vm8455_vm2 }
 0x726   : > { %4289 = vrot.lane.b32.xlu1 %v4277_v20, %s5306_s13  ;;  %vm8458_vm5 = vmmov %vm8455_vm2 }
 0x727   : > { %4255 = vrot.lane.b32.xlu0 %v4239_v32, %s5307_s27  ;;  %vm8460_vm1 = vmmov %vm8459_vm9 }
 0x728   : > { %vm8461_vm11 = vmmov %vm8460_vm1 }
 0x729   : > { %v4527_v10 = vld [vmem:[%s8449_s17] sm:$0xff]  ;;  %vm8462_vm7 = vmmov %vm8460_vm1  ;;  %s4639_s17 = scalar_lea.sflag [#allocation7], %s5531_s21 }
 0x72a   : > { %4257 = vrot.lane.b32.xlu1 %v4240_v16, %s5307_s27  ;;  %s8439_s27 = sld [smem:[#allocation33_spill]]  ;;  %vm8464_vm0 = vmmov %vm8463_vm13 }
 0x72b   : > { %4293 = vrot.lane.b32.xlu0 %v4279_v57, %s5306_s13  ;;  %vm8465_vm15 = vmmov %vm8464_vm0 }
 0x72e   : > { %4341 = vrot.lane.b32.xlu1 %v4328_v36, %s5305_s12 }
 0x72f   : > { %4297 = vrot.lane.b32.xlu0 %v4281_v0, %s5306_s13 }
 0x730   : > { %v7972_v38 = vld [vmem:[%s8439_s27] sm:$0xff] }
 0x731   : > { %v4853_v34 = vcombine.high %v7972_v38, %v7972_v38 }
 0x732   : > { %4299 = vrot.lane.b32.xlu1 %v4282_v4, %s5306_s13 }
 0x733   : > { %4295 = vrot.lane.b32.xlu0 %v4280_v45, %s5306_s13  ;;  %4579 = vmatprep.mubr.bf16.mxu0 %v4853_v34 }
 0x736   : > { %4339 = vrot.lane.b32.xlu1 %v4327_v53, %s5305_s12 }
 0x737   : > { %4343 = vrot.lane.b32.xlu0 %v4329_v17, %s5305_s12 }
 0x73a   : > { %4349 = vrot.lane.b32.xlu1 %v4332_v61, %s5305_s12 }
 0x73b   : > { %4345 = vrot.lane.b32.xlu0 %v4330_v39, %s5305_s12 }
 0x73e   : > { %4383 = vrot.lane.b32.xlu1 %v4370_v44, %s5303_s26 }
 0x73f   : > { %4385 = vrot.lane.b32.xlu0 %v4371_v54, %s5303_s26 }
 0x742   : > { %4381 = vrot.lane.b32.xlu1 %v4369_v2, %s5303_s26 }
 0x743   : > { %4347 = vrot.lane.b32.xlu0 %v4331_v59, %s5305_s12 }
 0x746   : > { %4391 = vrot.lane.b32.xlu1 %v4374_v49, %s5303_s26 }
 0x747   : > { %4387 = vrot.lane.b32.xlu0 %v4372_v6, %s5303_s26 }
 0x74a   : > { %4425 = vrot.lane.b32.xlu1 %v4412_v9, %s5304_s29 }
 0x74b   : > { %4389 = vrot.lane.b32.xlu0 %v4373_v27, %s5303_s26  ;;  %s8485_s26 = sld [smem:[#allocation35_spill]] }
 0x74e   : > { %4423 = vrot.lane.b32.xlu1 %v4411_v51, %s5304_s29 }
 0x74f   : > { %4427 = vrot.lane.b32.xlu0 %v4413_v62, %s5304_s29 }
 0x752   : > { %4433 = vrot.lane.b32.xlu1 %v4416_v3, %s5304_s29 }
 0x753   : > { %4431 = vrot.lane.b32.xlu0 %v4415_v56, %s5304_s29 }
 0x756   : > { %4467 = vrot.lane.b32.xlu1 %v4454_v52, %s5302_s24 }
 0x757   : > { %4429 = vrot.lane.b32.xlu0 %v4414_v23, %s5304_s29  ;;  %s8064_s29 = scalar_lea.hbm %s8485_s26, %s4858_s9 }
 0x75a   : > { %4465 = vrot.lane.b32.xlu1 %v4453_v31, %s5302_s24 }
 0x75b   : > { %4469 = vrot.lane.b32.xlu0 %v4455_v24, %s5302_s24 }
 0x75e   : > { %4475 = vrot.lane.b32.xlu1 %v4458_v7, %s5302_s24 }
 0x75f   : > { %4473 = vrot.lane.b32.xlu0 %v4457_v55, %s5302_s24 }
 0x762   : > { %4530 = vperm.xlu1 %5057, %v4527_v10  }
 0x763   : > { %4471 = vrot.lane.b32.xlu0 %v4456_v5, %s5302_s24  ;;  %s5311_s24 = smov [#allocation10]  }
 0x764   : > { %s5197_s28 = sshll.u32 %s5311_s24, 4  ;;  %s5198_s28 = int_to_ptr.vmem [resolvable:$false] %s5197_s28 }
 0x765   : > { %s5199_s23 = scalar_lea.vmem %s5198_s28, 256  ;;  %p5200_p4 = scmp.lt.s32.totalorder %s8066_s22, %s5198_s28 }
 0x766   : > { %p5201_p3 = scmp.lt.s32.totalorder %s5199_s23, %s5193_s16 }
 0x768   : > { %p5202_p7 = por %p5201_p3, %p5200_p4 }
 0x76a   : > { %p5203_p8 = pnand %p5202_p7, %p5196_p0 }
 0x780   : > { %v4166_v41 = vpop.permute.xlu1 %4165 }
 0x781   : > { %v4168_v22 = vpop.permute.xlu0 %4167  ;;  %v4175_v12 = vsel %vm8452_vm12, %v4164_v21, %v4166_v41  ;;  %vm8467_vm12 = vcmask 1039360  }
 0x782   : > { %v4176_v35 = vsel %vm8451_vm3, %v4166_v41, %v4168_v22  ;;  %vm8466_vm3 = vmmov %vm8464_vm0 }
 0x783   : > { %4547 = vmatprep.subr.bf16.mxu0 %v4176_v35 }
 0x784   : > { %4548 = vmatpush1.bf16.msra.mxu0 %v4175_v12  ;;  %v4208_v13 = vpop.permute.xlu1 %4207 }
 0x785   : > { %v4210_v46 = vpop.permute.xlu0 %4209  ;;  %v4217_v30 = vsel %vm8456_vm6, %v4206_v25, %v4208_v13  ;;  %vm8471_vm6 = vcmask 924672  }
 0x786   : > { %v4218_v1 = vsel %vm8455_vm2, %v4208_v13, %v4210_v46  ;;  %v4852_v13 = vcombine.low %v7972_v38, %v7972_v38 }
 0x788   : > { %v4250_v11 = vpop.permute.xlu1 %4249 }
 0x789   : > { %v4252_v48 = vpop.permute.xlu0 %4251  ;;  %v4259_v0 = vsel %vm8460_vm1, %v4248_v50, %v4250_v11  ;;  %vm8475_vm1 = vcmask 916480  }
 0x78a   : > { %v4260_v57 = vsel %vm8459_vm9, %v4250_v11, %v4252_v48 }
 0x78c   : > { %v4174_v18 = vpop.permute.xlu1 %4173 }
 0x78d   : > { %v4172_v37 = vpop.permute.xlu0 %4171 }
 0x78e   : > { %v4177_v58 = vsel %vm8453_vm14, %v4170_v29, %v4172_v37  ;;  %v4178_v28 = vsel %vm8454_vm10, %v4172_v37, %v4174_v18  ;;  %vm8468_vm14 = vmmov %vm8467_vm12 }
 0x78f   : > { %4549 = vmatprep.subr.bf16.mxu0 %v4178_v28  ;;  %vm8469_vm10 = vmmov %vm8467_vm12 }
 0x790   : > { %4550 = vmatpush1.bf16.msra.mxu0 %v4177_v58  ;;  %v4292_v19 = vpop.permute.xlu1 %4291  ;;  %vm8470_vm2 = vmmov %vm8469_vm10 }
 0x791   : > { %v4254_v47 = vpop.permute.xlu0 %4253  ;;  %4551 = vmatprep.subr.bf16.mxu0 %v4218_v1  ;;  %v5134_v1 = vld [vmem:[%s8439_s27 + $0x8] ss:$0 sps:$4 sm:$0xff]  }
 0x794   : > { %4552 = vmatpush1.bf16.msra.mxu0 %v4217_v30  ;;  %v4216_v63 = vpop.permute.xlu1 %4215 }
 0x795   : > { %v4214_v8 = vpop.permute.xlu0 %4213 }
 0x796   : > { %v4219_v20 = vsel %vm8457_vm8, %v4212_v15, %v4214_v8  ;;  %v4220_v32 = vsel %vm8458_vm5, %v4214_v8, %v4216_v63  ;;  %vm8472_vm8 = vmmov %vm8471_vm6 }
 0x797   : > { %4553 = vmatprep.subr.bf16.mxu0 %v4220_v32  ;;  %vm8473_vm5 = vmmov %vm8471_vm6 }
 0x798   : > { %4554 = vmatpush1.bf16.msra.mxu0 %v4219_v20  ;;  %v4290_v16 = vpop.permute.xlu1 %4289  ;;  %vm8474_vm9 = vmmov %vm8473_vm5 }
 0x799   : > { %v4256_v36 = vpop.permute.xlu0 %4255  ;;  %4555 = vmatprep.subr.bf16.mxu0 %v4260_v57  ;;  %v4301_v39 = vsel %vm8464_vm0, %v4290_v16, %v4292_v19  ;;  %vm8479_vm0 = vcmask 908288  }
 0x79a   : > { %v4261_v53 = vsel %vm8462_vm7, %v4254_v47, %v4256_v36  ;;  %vm8477_vm7 = vmmov %vm8475_vm1 }
 0x79c   : > { %4556 = vmatpush1.bf16.msra.mxu0 %v4259_v0  ;;  %v4258_v4 = vpop.permute.xlu1 %4257 }
 0x79d   : > { %v4294_v45 = vpop.permute.xlu0 %4293  ;;  %v4262_v33 = vsel %vm8461_vm11, %v4256_v36, %v4258_v4  ;;  %vm8476_vm11 = vmmov %vm8475_vm1 }
 0x79e   : > { %4557 = vmatprep.subr.bf16.mxu0 %v4262_v33  ;;  %v4302_v43 = vsel %vm8463_vm13, %v4292_v19, %v4294_v45  ;;  %vm8478_vm13 = vmmov %vm8475_vm1 }
 0x7a0   : > { %4558 = vmatpush1.bf16.msra.mxu0 %v4261_v53  ;;  %v4342_v17 = vpop.permute.xlu1 %4341 }
 0x7a1   : > { %v4298_v61 = vpop.permute.xlu0 %4297  ;;  %4559 = vmatprep.subr.bf16.mxu0 %v4302_v43 }
 0x7a4   : > { %4560 = vmatpush1.bf16.msra.mxu0 %v4301_v39  ;;  %v4300_v44 = vpop.permute.xlu1 %4299 }
 0x7a5   : > { %v4296_v54 = vpop.permute.xlu0 %4295  ;;  %v4304_v2 = vsel %vm8465_vm15, %v4298_v61, %v4300_v44  ;;  %vm8480_vm15 = vmmov %vm8479_vm0 }
 0x7a6   : > { %v4303_v59 = vsel %vm8466_vm3, %v4296_v54, %v4298_v61  ;;  %4561 = vmatprep.subr.bf16.mxu0 %v4304_v2  ;;  %vm8481_vm3 = vmmov %vm8479_vm0 }
 0x7a8   : > { %4562 = vmatpush1.bf16.msra.mxu0 %v4303_v59  ;;  %v4340_v49 = vpop.permute.xlu1 %4339 }
 0x7a9   : > { %v4344_v6 = vpop.permute.xlu0 %4343  ;;  %4563 = vmatprep.subr.bf16.mxu0 %v7832_v26  ;;  %v4351_v3 = vsel %vm8468_vm14, %v4340_v49, %v4342_v17  ;;  %vm4543_vm14 = vcmask 261120  }
 0x7aa   : > { %v4352_v62 = vsel %vm8467_vm12, %v4342_v17, %v4344_v6  ;;  %vm8482_vm12 = vmmov %vm8479_vm0 }
 0x7ac   : > { %4564 = vmatpush1.bf16.msra.mxu0 %v7830_v60  ;;  %v4350_v9 = vpop.permute.xlu1 %4349 }
 0x7ad   : > { %v4346_v27 = vpop.permute.xlu0 %4345  ;;  %4565 = vmatprep.subr.bf16.mxu0 %v7854_v14 }
 0x7b0   : > { %4566 = vmatpush1.bf16.msra.mxu0 %v7851_v40  ;;  %v4384_v51 = vpop.permute.xlu1 %4383 }
 0x7b1   : > { %v4386_v34 = vpop.permute.xlu0 %4385  ;;  %4567 = vmatprep.subr.bf16.mxu0 %v4352_v62 }
 0x7b2   : > { %v4394_v14 = vsel %vm8471_vm6, %v4384_v51, %v4386_v34 }
 0x7b4   : > { %4568 = vmatpush1.bf16.msra.mxu0 %v4351_v3  ;;  %v4382_v56 = vpop.permute.xlu1 %4381 }
 0x7b5   : > { %v4348_v52 = vpop.permute.xlu0 %4347  ;;  %v4393_v31 = vsel %vm8472_vm8, %v4382_v56, %v4384_v51 }
 0x7b6   : > { %v4353_v26 = vsel %vm8469_vm10, %v4346_v27, %v4348_v52  ;;  %v4354_v60 = vsel %vm8470_vm2, %v4348_v52, %v4350_v9 }
 0x7b7   : > { %4569 = vmatprep.subr.bf16.mxu0 %v4354_v60 }
 0x7b8   : > { %4570 = vmatpush1.bf16.msra.mxu0 %v4353_v26  ;;  %v4392_v23 = vpop.permute.xlu1 %4391 }
 0x7b9   : > { %v4388_v40 = vpop.permute.xlu0 %4387  ;;  %4571 = vmatprep.subr.bf16.mxu0 %v4394_v14 }
 0x7bc   : > { %4572 = vmatpush1.bf16.msra.mxu0 %v4393_v31  ;;  %v4426_v24 = vpop.permute.xlu1 %4425 }
 0x7bd   : > { %v4390_v7 = vpop.permute.xlu0 %4389 }
 0x7be   : > { %v4395_v55 = vsel %vm8473_vm5, %v4388_v40, %v4390_v7  ;;  %v4396_v10 = vsel %vm8474_vm9, %v4390_v7, %v4392_v23 }
 0x7bf   : > { %4573 = vmatprep.subr.bf16.mxu0 %v4396_v10 }
 0x7c0   : > { %4574 = vmatpush1.bf16.msra.mxu0 %v4395_v55  ;;  %v4424_v5 = vpop.permute.xlu1 %4423 }
 0x7c1   : > { %v4428_v21 = vpop.permute.xlu0 %4427  ;;  %v4435_v29 = vsel %vm8476_vm11, %v4424_v5, %v4426_v24 }
 0x7c2   : > { %v4436_v25 = vsel %vm8475_vm1, %v4426_v24, %v4428_v21 }
 0x7c3   : > { %4575 = vmatprep.subr.bf16.mxu0 %v4436_v25 }
 0x7c4   : > { %4576 = vmatpush1.bf16.msra.mxu0 %v4435_v29  ;;  %v4434_v50 = vpop.permute.xlu1 %4433 }
 0x7c5   : > { %v4432_v15 = vpop.permute.xlu0 %4431 }
 0x7c6   : > { %v4438_v41 = vsel %vm8477_vm7, %v4432_v15, %v4434_v50 }
 0x7c7   : > { %4577 = vmatprep.subr.bf16.mxu0 %v4438_v41 }
 0x7c8   : > { %v4468_v22 = vpop.permute.xlu1 %4467 }
 0x7c9   : > { %v4430_v35 = vpop.permute.xlu0 %4429 }
 0x7ca   : > { %v4437_v12 = vsel %vm8478_vm13, %v4430_v35, %v4432_v15 }
 0x7cb   : > { %4578 = vmatpush1.bf16.msra.mxu0 %v4437_v12 }
 0x7cc   : > { %v4466_v46 = vpop.permute.xlu1 %4465 }
 0x7cd   : > { %v4470_v11 = vpop.permute.xlu0 %4469  ;;  %v4477_v18 = vsel %vm8480_vm15, %v4466_v46, %v4468_v22 }
 0x7ce   : > { %4580 = vmatmul.mubr.bf16.vlgmr.msra.gmra.mrb[32].mxu0 %v4852_v13  ;;  %v4478_v48 = vsel %vm8479_vm0, %v4468_v22, %v4470_v11 }
 0x7cf   : > { %4588 = vmatprep.subr.bf16.mxu0 %v4478_v48  ;;  %4620 = vmatprep.mubr.bf16.mxu0 %v8298_v42 }
 0x7d0   : > { %4589 = vmatpush1.bf16.msra.mxu0 %v4477_v18  ;;  %v4476_v37 = vpop.permute.xlu1 %4475 }
 0x7d1   : > { %v4474_v58 = vpop.permute.xlu0 %4473 }
 0x7d2   : > { %v4480_v28 = vsel %vm8481_vm3, %v4474_v58, %v4476_v37 }
 0x7d3   : > { %4590 = vmatprep.subr.bf16.mxu0 %v4480_v28 }
 0x7d5   : > { %v4472_v19 = vpop.permute.xlu0 %4471 }
 0x7d6   : > { %v4479_v38 = vsel %vm8482_vm12, %v4472_v19, %v4474_v58 }
 0x7d7   : > { %4591 = vmatpush1.bf16.msra.mxu0 %v4479_v38 }
 0x7da   : > { %4855 = vmatmul.mubr.msk.bf16.vlgmr.msra.gmra.mrb[32].mxu0 %vm4543_vm14, %v5134_v1 }
 0x7e1   : > { %v4531_v42 = vpop.permute.xlu1 %4530 }
 0x8ad   : > { %v4622_v47 = vpop.f32.mrb[32].mxu0 }
 0x8ae   : > { %v4885_v30 = vadd.f32 %v4622_v47, %v4531_v42  ;;  %v4624_v63 = vpop.f32.mrb[33].mxu0 }
 0x8af   : > { %v4886_v8 = vadd.f32 %v4624_v63, %v4531_v42  ;;  %v4626_v20 = vpop.f32.mrb[34].mxu0 }
 0x8b0   : > { %v4627_v32 = vpop.f32.mrb[35].mxu0  ;;  %4631 = vrot.lane.b32.xlu0 %v4885_v30, %s5310_s30 }
 0x8b1   : > { %4633 = vrot.lane.b32.xlu1 %v4886_v8, %s5310_s30 }
 0x922   : > { %v4632_v16 = vpop.permute.xlu0 %4631 }
 0x923   : > { %v4634_v57 = vpop.permute.xlu1 %4633 }
 0x924   : > { %v4635_v36 = vsel %vm3947_vm4, %v4632_v16, %v4634_v57 }
 0x925   : > { %4637 = vst [vmem:[%s408_s7] sm:$0xff] %v4635_v36 }
 0x926   : > { %5206 = shalt.err (!%p5203_p8)
}
 0x927   : > { %s5207_s21 = scalar_lea.hbm %s8064_s29, 128  ;;  %s5211_s1 = scalar_lea.hbm %s8485_s26, 512 }
 0x928   : > { %p5208_p1 = scmp.ne.s32.totalorder %s8064_s29, %s5207_s21  ;;  %p5212_p12 = scmp.lt.u32.totalorder %s8064_s29, %s8485_s26 }
 0x929   : > { %p5213_p2 = scmp.lt.u32.totalorder %s5211_s1, %s5207_s21  ;;  %p5215_p10 = scmp.lt.u32.totalorder %s5207_s21, %s8064_s29 }
 0x92a   : > { %p5209_p5 = pnand %p5208_p1, %p8486_p11 }
 0x92b   : > { %p5214_p9 = por %p5213_p2, %p5212_p12 }
 0x92c   : > { %p5210_p6 = pneg %p5209_p5 }
 0x92d   : > { %p5216_p13 = por %p5215_p10, %p5214_p9 }
 0x92f   : > { %p5217_p0 = pnand %p5216_p13, %p5210_p6 }
 0x931   : > { %5220 = shalt.err (!%p5217_p0)
}
 0x932   : > { %4961 = dma.vmem_to_hbm [thread:$0]  (%p8486_p11), %s8066_s22, 128, %s8064_s29, %s4639_s17  }
 0x933 PF: > { %s8487_s7 = sld [smem:[#allocation17_spill]]  ;;  %s8488_s12 = sld [smem:[#allocation14_spill]] }
 0x934   : > { %s8489_s13 = sld [smem:[#allocation19_spill]] }
 0x939   : > { %p4978_p4 = scmp.ge.s32.totalorder %s8487_s7, 2  ;;  %s4666_s16 = sand.u32 1, %s8488_s12  }
 0x93a   : > { %p8490_p3 = scmp.ne.s32.totalorder %s8489_s13, 0  ;;  %s4667_s24 = scalar_lea.sflag [#allocation7], %s4666_s16 }
 0x93c   : > { %p4972_p7 = pnand %p4978_p4, %p8490_p3 }
 0x93e   : > { %5262 = dma.done.wait (!%p4972_p7), %s4667_s24, 128  }
 0x93f   : > { %5264 = vsyncadd (!%p4972_p7), %s4667_s24, 4294967168  ;;  %s27_s20 = sadd.s32 1, %s8487_s7   ;;  %s8491_s16 = sld [smem:[#allocation16_spill]] }
 0x940   : > { %p24_p8 = scmp.ge.s32.totalorder %s27_s20, 6   ;;  %s8492_s11 = sld [smem:[#allocation20_spill]] }
 0x941   : > { %s8493_s13 = smov %s5271_s14  ;;  %s8494_s14 = smov %s5275_s15 }
 0x942   : > { %s8495_s15 = smov %s5498_s18  ;;  %s8496_s17 = smov %s5291_s19 }
 0x943   : > { %s8498_s19 = smov %s8504_s10  ;;  %26 = sbr.rel (!%p24_p8) target bundleno = 14 (0xe), region = 110 }
 0x946   : > { %s8497_s18 = smov %s8492_s11 }
 0x94a   :  { %4672 = vsyncpa [#allocation6], 1 }
 0x94b   :  { %4674 = vsyncpa [#allocation6 + $0x1], 1 }
 0x94c   :  { %4675 = vsyncpa [#allocation9], 1 }
 0x94d   :  { %4676 = vsyncpa [#allocation7], 1 }
 0x94e   :  { %4678 = vsyncpa [#allocation7 + $0x1], 1 }

</bundles_post_ra>
